<compile_context>
chip_gen: v6e
topology: v6e:2x2x1
jax: 0.10.0
libtpu: 0.0.40
codegen_flags: <defaults>
</compile_context>

<pallas_src>
import functools

import jax
import jax.numpy as jnp
from jax.experimental import pallas as pl
from jax.experimental.pallas import tpu as pltpu


def _round_up(n, m):
    return ((n + m - 1) // m) * m


def _pad2(x, rows, cols):
    r, c = x.shape
    return jnp.pad(x, ((0, rows - r), (0, cols - c)))


# ----------------------------------------------------------------------------
# Fused kernel: one grid step = `graph_tile` graph pairs through the whole net
# ----------------------------------------------------------------------------
def _gcnnet_kernel(
        x1_ref, a1_ref, m1_ref, x2_ref, a2_ref, m2_ref, cell_ref,
        g1w, g1b, g2w, g2b, g3w, g3b,
        fg1w, fg1b, fg2w, fg2b,
        r1w, r1b, r2w, r2b, r3w, r3b,
        f1wa, f1wb, f1wc, f1b, f2w, f2b, ow, ob,
        o_ref, *, gt, npg):
    f32 = jnp.float32
    bf16 = jnp.bfloat16

    # Both drug branches share the drug1_* weights -> stack along the graph
    # axis and run them together (doubles matmul M, halves instruction count).
    h = jnp.concatenate([x1_ref[...], x2_ref[...]], axis=0)      # (2gt,npg,128) bf16
    a = jnp.concatenate([a1_ref[...], a2_ref[...]], axis=0)      # (2gt,npg,npg) bf16
    mask = jnp.concatenate([m1_ref[...], m2_ref[...]], axis=0)   # (2gt,npg,1)   f32

    def gcn(h_in, w_ref, b_ref):
        # Aggregate first ((A @ H) @ W): the per-graph N^2 matmul runs at the
        # narrower input width (cheaper for layers 2/3 where F_out > F_in).
        hb = h_in.astype(bf16)
        ah = jnp.einsum('gij,gjf->gif', a, hb,
                        preferred_element_type=f32)              # (2gt,npg,f_in) f32
        f_in = hb.shape[-1]
        f_out = w_ref.shape[-1]
        y = jnp.dot(ah.reshape(2 * gt * npg, f_in).astype(bf16), w_ref[...],
                    preferred_element_type=f32)                  # (2gt*npg,f_out)
        y = y.reshape(2 * gt, npg, f_out) + b_ref[...]
        return jnp.maximum(y, 0.0)

    h = gcn(h, g1w, g1b)                                         # (2gt,npg,128)
    h = gcn(h, g2w, g2b)                                         # (2gt,npg,256)
    h = gcn(h, g3w, g3b)                                         # (2gt,npg,384), >= 0

    # global max pool per graph.  h is post-ReLU (>= 0), so zeroing the padded
    # node slots with the mask is exact (padded/empty graphs pool to 0).
    pooled = jnp.max(h * mask, axis=1)                           # (2gt, 384) f32

    def dense(z, w_ref, b_ref, relu):
        y = jnp.dot(z.astype(bf16), w_ref[...],
                    preferred_element_type=f32) + b_ref[...]
        return jnp.maximum(y, 0.0) if relu else y

    hg = dense(pooled, fg1w, fg1b, True)                         # fc_g1 + relu (2gt,256)
    hg = dense(hg, fg2w, fg2b, False)                            # fc_g2        (2gt,128)
    # dropout: identity (eval mode)
    hg1 = hg[:gt]                                                # drug1 embeddings
    hg2 = hg[gt:]                                                # drug2 embeddings

    # cell branch: F.normalize(p=2, dim=1) + 3-layer reduction MLP
    c = cell_ref[...]                                            # (gt, 1024) f32
    ss = jnp.sum(c * c, axis=1, keepdims=True)
    # x / max(||x||, 1e-12)  ==  x * rsqrt(max(||x||^2, 1e-24))
    cv = c * jax.lax.rsqrt(jnp.maximum(ss, 1e-24))
    cv = dense(cv, r1w, r1b, True)                               # 1024 -> 512
    cv = dense(cv, r2w, r2b, True)                               # 512  -> 256
    cv = dense(cv, r3w, r3b, False)                              # 256  -> 128

    # head: fc1 over the concat [hg1, hg2, cv] WITHOUT materializing the
    # concat -- three partial matmuls summed into one f32 accumulator.
    z = (jnp.dot(hg1.astype(bf16), f1wa[...], preferred_element_type=f32)
         + jnp.dot(hg2.astype(bf16), f1wb[...], preferred_element_type=f32)
         + jnp.dot(cv.astype(bf16), f1wc[...], preferred_element_type=f32)
         + f1b[...])
    z = jnp.maximum(z, 0.0)                                      # fc1 + relu
    z = dense(z, f2w, f2b, True)                                 # fc2 + relu
    o_ref[...] = dense(z, ow, ob, False)                         # out (gt,128); first n_output cols valid


# ----------------------------------------------------------------------------
# Host/XLA-side prep: flat PyG-style batch -> padded per-graph layout
# ----------------------------------------------------------------------------
def _to_padded_graphs(x, edge_index, batch, gp, npg, dp):
    """Returns (features (gp,npg,dp) bf16, A_hat (gp,npg,npg) bf16, mask (gp,npg,1) f32).

    A_hat follows PyG gcn_norm with add_remaining_self_loops: duplicate edges
    accumulate weight, a unit self-loop is added only for nodes without one.
    Pure XLA ops; for a fixed dataset this can be precomputed/cached per batch.
    """
    n, d_in = x.shape
    counts = jnp.zeros((gp,), jnp.int32).at[batch].add(1)
    offsets = jnp.concatenate(
        [jnp.zeros((1,), jnp.int32), jnp.cumsum(counts)[:-1]])

    local = jnp.arange(n, dtype=jnp.int32) - offsets[batch]
    xb = jnp.zeros((gp, npg, dp), jnp.float32)
    xb = xb.at[batch, local, :d_in].set(x)

    src, dst = edge_index[0], edge_index[1]
    g_e = batch[src]
    ls = src - offsets[g_e]
    ld = dst - offsets[g_e]
    # A[g, i, j] = weight of edge j -> i (messages flow source -> target)
    a = jnp.zeros((gp, npg, npg), jnp.float32).at[g_e, ld, ls].add(1.0)

    idx = jnp.arange(npg)
    node_valid = idx[None, :] < counts[:, None]                  # (gp, npg)
    diag = a[:, idx, idx]
    add_diag = jnp.where((diag == 0) & node_valid, 1.0, 0.0)     # remaining self loops
    a = a + add_diag[:, :, None] * jnp.eye(npg, dtype=jnp.float32)[None]

    deg = jnp.sum(a, axis=2)
    dis = jnp.where(deg > 0, jax.lax.rsqrt(jnp.maximum(deg, 1e-12)), 0.0)
    a_hat = a * dis[:, :, None] * dis[:, None, :]

    mask = node_valid.astype(jnp.float32)[:, :, None]            # (gp, npg, 1)
    return xb.astype(jnp.bfloat16), a_hat.astype(jnp.bfloat16), mask


_PARAM_ORDER = (
    "gcn1_w", "gcn1_b", "gcn2_w", "gcn2_b", "gcn3_w", "gcn3_b",
    "fcg1_w", "fcg1_b", "fcg2_w", "fcg2_b",
    "red1_w", "red1_b", "red2_w", "red2_b", "red3_w", "red3_b",
    "fc1_wa", "fc1_wb", "fc1_wc", "fc1_b", "fc2_w", "fc2_b", "out_w", "out_b",
)


def _resident_spec(arr):
    ndim = arr.ndim
    return pl.BlockSpec(arr.shape, lambda g, _nd=ndim: (0,) * _nd)


def gcnnet_forward(params, x1, edge_index1, batch1, x2, edge_index2, batch2,
                   cell, *, num_graphs, npg=16, graph_tile=8, n_output=2):
    """npg: padded nodes per graph (multiple of 8, >= max graph size).
    graph_tile: graph pairs per grid step (multiple of 8)."""
    assert npg % 8 == 0 and graph_tile % 8 == 0
    GT = graph_tile
    gp = _round_up(max(num_graphs, GT), GT)
    dp = 128
    ct_in = cell.shape[1]
    ctp = _round_up(ct_in, 128)

    x1b, a1b, m1b = _to_padded_graphs(x1, edge_index1, batch1, gp, npg, dp)
    x2b, a2b, m2b = _to_padded_graphs(x2, edge_index2, batch2, gp, npg, dp)
    cell_p = jnp.zeros((gp, ctp), jnp.float32).at[:num_graphs, :ct_in].set(cell)

    flat = [params[k] for k in _PARAM_ORDER]

    data_specs = [
        pl.BlockSpec((GT, npg, dp), lambda g: (g, 0, 0)),    # x1 tile
        pl.BlockSpec((GT, npg, npg), lambda g: (g, 0, 0)),   # a1 tile
        pl.BlockSpec((GT, npg, 1), lambda g: (g, 0, 0)),     # mask1 tile
        pl.BlockSpec((GT, npg, dp), lambda g: (g, 0, 0)),    # x2 tile
        pl.BlockSpec((GT, npg, npg), lambda g: (g, 0, 0)),   # a2 tile
        pl.BlockSpec((GT, npg, 1), lambda g: (g, 0, 0)),     # mask2 tile
        pl.BlockSpec((GT, ctp), lambda g: (g, 0)),           # cell tile
    ]
    # weights: constant index_map -> resident in VMEM across the grid
    weight_specs = [_resident_spec(w) for w in flat]

    # --- VMEM budget + advisory cost estimate -------------------------------
    weight_bytes = sum(int(w.size) * w.dtype.itemsize for w in flat)
    per_step_bytes = GT * (2 * npg * dp * 2 + 2 * npg * npg * 2
                           + 2 * npg * 4 + ctp * 4 + 128 * 4)
    vmem_limit = int(min(56 << 20,
                         max(32 << 20,
                             2 * weight_bytes + 8 * per_step_bytes + (8 << 20))))

    npg2 = npg * npg
    gcn_flops = 2 * gp * (2 * npg2 * dp + 2 * npg * dp * dp
                          + 2 * npg2 * dp + 2 * npg * dp * 256
                          + 2 * npg2 * 256 + 2 * npg * 256 * 384)
    fcg_flops = 2 * gp * 2 * (384 * 256 + 256 * 128)
    red_flops = gp * 2 * (ctp * 512 + 512 * 256 + 256 * 128)
    head_flops = gp * 2 * (3 * 128 * 256 + 256 * 128 + 128 * 128)
    bytes_accessed = (sum(int(v.size) * v.dtype.itemsize for v in
                          (x1b, a1b, m1b, x2b, a2b, m2b, cell_p))
                      + weight_bytes + gp * 128 * 4)

    out_padded = pl.pallas_call(
        functools.partial(_gcnnet_kernel, gt=GT, npg=npg),
        out_shape=jax.ShapeDtypeStruct((gp, 128), jnp.float32),
        grid_spec=pltpu.PrefetchScalarGridSpec(
            num_scalar_prefetch=0,
            grid=(gp // GT,),
            in_specs=data_specs + weight_specs,
            out_specs=pl.BlockSpec((GT, 128), lambda g: (g, 0)),
        ),
        compiler_params=pltpu.CompilerParams(
            dimension_semantics=(pltpu.PARALLEL,),
            vmem_limit_bytes=vmem_limit),
        cost_estimate=pl.CostEstimate(
            flops=int(gcn_flops + fcg_flops + red_flops + head_flops),
            transcendentals=int(gp),
            bytes_accessed=int(bytes_accessed)),
    )(x1b, a1b, m1b, x2b, a2b, m2b, cell_p, *flat)

    return out_padded[:num_graphs, :n_output]


# ----------------------------------------------------------------------------
# Parameter init: lane-padded, weights cast to bf16, biases kept f32
# ----------------------------------------------------------------------------
def init_params(key, num_features_xd=78, num_features_xt=954,
                output_dim=128, n_output=2):
    d = num_features_xd
    dp = _round_up(d, 128)            # 128
    d2p = _round_up(2 * d, 128)       # 256
    d4p = _round_up(4 * d, 128)       # 384
    ctp = _round_up(num_features_xt, 128)   # 1024
    odp = _round_up(output_dim, 128)        # 128
    nop = _round_up(n_output, 128)          # 128

    keys = iter(jax.random.split(key, 64))

    def w(rows, cols, rp, cp, scale=0.05):
        wl = (scale * jax.random.normal(next(keys), (rows, cols))).astype(jnp.float32)
        return _pad2(wl, rp, cp).astype(jnp.bfloat16)

    def b(cols, cp):
        bl = (0.01 * jax.random.normal(next(keys), (1, cols))).astype(jnp.float32)
        return _pad2(bl, 1, cp)

    # fc1 acts on cat([x1, x2, cell]); split into 3 row-blocks of output_dim
    fc1_full = w(3 * output_dim, 256, 3 * odp, 256)

    return {
        # drug branch (drug1_* -- shared by both drug inputs in the forward)
        "gcn1_w": w(d, d, dp, dp),                 "gcn1_b": b(d, dp),
        "gcn2_w": w(d, 2 * d, dp, d2p),            "gcn2_b": b(2 * d, d2p),
        "gcn3_w": w(2 * d, 4 * d, d2p, d4p),       "gcn3_b": b(4 * d, d4p),
        "fcg1_w": w(4 * d, 2 * d, d4p, d2p),       "fcg1_b": b(2 * d, d2p),
        "fcg2_w": w(2 * d, output_dim, d2p, odp),  "fcg2_b": b(output_dim, odp),
        # cell reduction MLP: 954 -> 512 -> 256 -> 128
        "red1_w": w(num_features_xt, 512, ctp, 512), "red1_b": b(512, 512),
        "red2_w": w(512, 256, 512, 256),             "red2_b": b(256, 256),
        "red3_w": w(256, output_dim, 256, odp),      "red3_b": b(output_dim, odp),
        # head
        "fc1_wa": fc1_full[:odp],                  # multiplies drug1 embedding
        "fc1_wb": fc1_full[odp:2 * odp],           # multiplies drug2 embedding
        "fc1_wc": fc1_full[2 * odp:],              # multiplies cell embedding
        "fc1_b": b(256, 256),
        "fc2_w": w(256, 128, 256, 128),            "fc2_b": b(128, 128),
        "out_w": w(128, n_output, 128, nop),       "out_b": b(n_output, nop),
    }


# ----------------------------------------------------------------------------
# Example run
# ----------------------------------------------------------------------------
def make_batched_ring_graph(num_graphs, nodes_per_graph):
    """Batched undirected ring graphs (PyG-style node-offset batching)."""
    srcs, dsts, batch = [], [], []
    for g in range(num_graphs):
        off = g * nodes_per_graph
        for i in range(nodes_per_graph):
            j = (i + 1) % nodes_per_graph
            srcs += [off + i, off + j]
            dsts += [off + j, off + i]
        batch += [g] * nodes_per_graph
    edge_index = jnp.array([srcs, dsts], dtype=jnp.int32)
    batch = jnp.array(batch, dtype=jnp.int32)
    return edge_index, batch


if __name__ == "__main__":
    key = jax.random.PRNGKey(0)
    k_param, k_x1, k_x2, k_cell = jax.random.split(key, 4)

    num_graphs = 16          # graph pairs in the batch
    nodes_per_graph = 12     # <= npg
    npg = 16                 # padded nodes per graph (multiple of 8)
    graph_tile = 8           # graph pairs per grid step -> grid = (2,)
    num_nodes = num_graphs * nodes_per_graph
    num_features_xd = 78
    num_features_xt = 954

    params = init_params(k_param, num_features_xd=num_features_xd,
                         num_features_xt=num_features_xt)

    edge_index1, batch1 = make_batched_ring_graph(num_graphs, nodes_per_graph)
    edge_index2, batch2 = make_batched_ring_graph(num_graphs, nodes_per_graph)

    x1 = jax.random.normal(k_x1, (num_nodes, num_features_xd), jnp.float32)
    x2 = jax.random.normal(k_x2, (num_nodes, num_features_xd), jnp.float32)
    cell = jax.random.normal(k_cell, (num_graphs, num_features_xt), jnp.float32)

    fwd = jax.jit(gcnnet_forward,
                  static_argnames=("num_graphs", "npg", "graph_tile", "n_output"))
    out = fwd(params, x1, edge_index1, batch1, x2, edge_index2, batch2, cell,
              num_graphs=num_graphs, npg=npg, graph_tile=graph_tile)
    out = jax.block_until_ready(out)

    assert out.shape == (num_graphs, 2)
    assert bool(jnp.all(jnp.isfinite(out)))
    print("KERNEL_OK")
</pallas_src>

<mosaic_0001>
module attributes {stable_mosaic.version = 11 : i64} {
  func.func private @main(%arg0: i32) attributes {dimension_semantics = [#tpu.dimension_semantics<core_parallel>], iteration_bounds = array<i64: 2>, tpu.core_type = #tpu.core_type<sc_scalar_subcore>, window_params = []} {
    return
  }
}

module attributes {stable_mosaic.version = 11 : i64} {
  func.func private @main(%arg0: i32) attributes {dimension_semantics = [#tpu.dimension_semantics<core_parallel>], iteration_bounds = array<i64: 2>, tpu.core_type = #tpu.core_type<sc_scalar_subcore>, window_params = []} {
    return
  }
}

module attributes {stable_mosaic.version = 11 : i64} {
  func.func @_gcnnet_kernel(%arg0: i32, %arg1: memref<8x16x128xbf16, #tpu.memory_space<vmem>>, %arg2: memref<8x16x16xbf16, #tpu.memory_space<vmem>>, %arg3: memref<8x16x1xf32, #tpu.memory_space<vmem>>, %arg4: memref<8x16x128xbf16, #tpu.memory_space<vmem>>, %arg5: memref<8x16x16xbf16, #tpu.memory_space<vmem>>, %arg6: memref<8x16x1xf32, #tpu.memory_space<vmem>>, %arg7: memref<8x1024xf32, #tpu.memory_space<vmem>>, %arg8: memref<128x128xbf16, #tpu.memory_space<vmem>>, %arg9: memref<1x128xf32, #tpu.memory_space<vmem>>, %arg10: memref<128x256xbf16, #tpu.memory_space<vmem>>, %arg11: memref<1x256xf32, #tpu.memory_space<vmem>>, %arg12: memref<256x384xbf16, #tpu.memory_space<vmem>>, %arg13: memref<1x384xf32, #tpu.memory_space<vmem>>, %arg14: memref<384x256xbf16, #tpu.memory_space<vmem>>, %arg15: memref<1x256xf32, #tpu.memory_space<vmem>>, %arg16: memref<256x128xbf16, #tpu.memory_space<vmem>>, %arg17: memref<1x128xf32, #tpu.memory_space<vmem>>, %arg18: memref<1024x512xbf16, #tpu.memory_space<vmem>>, %arg19: memref<1x512xf32, #tpu.memory_space<vmem>>, %arg20: memref<512x256xbf16, #tpu.memory_space<vmem>>, %arg21: memref<1x256xf32, #tpu.memory_space<vmem>>, %arg22: memref<256x128xbf16, #tpu.memory_space<vmem>>, %arg23: memref<1x128xf32, #tpu.memory_space<vmem>>, %arg24: memref<128x256xbf16, #tpu.memory_space<vmem>>, %arg25: memref<128x256xbf16, #tpu.memory_space<vmem>>, %arg26: memref<128x256xbf16, #tpu.memory_space<vmem>>, %arg27: memref<1x256xf32, #tpu.memory_space<vmem>>, %arg28: memref<256x128xbf16, #tpu.memory_space<vmem>>, %arg29: memref<1x128xf32, #tpu.memory_space<vmem>>, %arg30: memref<128x128xbf16, #tpu.memory_space<vmem>>, %arg31: memref<1x128xf32, #tpu.memory_space<vmem>>, %arg32: memref<8x128xf32, #tpu.memory_space<vmem>>) attributes {dimension_semantics = [#tpu.dimension_semantics<parallel>], iteration_bounds = array<i64: 2>, scalar_prefetch = 0 : i64, scratch_operands = 0 : i64, tpu.core_type = #tpu.core_type<tc>, window_params = [{transform_indices = @transform_0, window_bounds = array<i64: 8, 16, 128>}, {transform_indices = @transform_1, window_bounds = array<i64: 8, 16, 16>}, {transform_indices = @transform_2, window_bounds = array<i64: 8, 16, 1>}, {transform_indices = @transform_3, window_bounds = array<i64: 8, 16, 128>}, {transform_indices = @transform_4, window_bounds = array<i64: 8, 16, 16>}, {transform_indices = @transform_5, window_bounds = array<i64: 8, 16, 1>}, {transform_indices = @transform_6, window_bounds = array<i64: 8, 1024>}, {pipeline_mode = #tpu.pipeline_mode<synchronous>, transform_indices = @transform_7, window_bounds = array<i64: 128, 128>}, {pipeline_mode = #tpu.pipeline_mode<synchronous>, transform_indices = @transform_8, window_bounds = array<i64: 1, 128>}, {pipeline_mode = #tpu.pipeline_mode<synchronous>, transform_indices = @transform_9, window_bounds = array<i64: 128, 256>}, {pipeline_mode = #tpu.pipeline_mode<synchronous>, transform_indices = @transform_10, window_bounds = array<i64: 1, 256>}, {pipeline_mode = #tpu.pipeline_mode<synchronous>, transform_indices = @transform_11, window_bounds = array<i64: 256, 384>}, {pipeline_mode = #tpu.pipeline_mode<synchronous>, transform_indices = @transform_12, window_bounds = array<i64: 1, 384>}, {pipeline_mode = #tpu.pipeline_mode<synchronous>, transform_indices = @transform_13, window_bounds = array<i64: 384, 256>}, {pipeline_mode = #tpu.pipeline_mode<synchronous>, transform_indices = @transform_14, window_bounds = array<i64: 1, 256>}, {pipeline_mode = #tpu.pipeline_mode<synchronous>, transform_indices = @transform_15, window_bounds = array<i64: 256, 128>}, {pipeline_mode = #tpu.pipeline_mode<synchronous>, transform_indices = @transform_16, window_bounds = array<i64: 1, 128>}, {pipeline_mode = #tpu.pipeline_mode<synchronous>, transform_indices = @transform_17, window_bounds = array<i64: 1024, 512>}, {pipeline_mode = #tpu.pipeline_mode<synchronous>, transform_indices = @transform_18, window_bounds = array<i64: 1, 512>}, {pipeline_mode = #tpu.pipeline_mode<synchronous>, transform_indices = @transform_19, window_bounds = array<i64: 512, 256>}, {pipeline_mode = #tpu.pipeline_mode<synchronous>, transform_indices = @transform_20, window_bounds = array<i64: 1, 256>}, {pipeline_mode = #tpu.pipeline_mode<synchronous>, transform_indices = @transform_21, window_bounds = array<i64: 256, 128>}, {pipeline_mode = #tpu.pipeline_mode<synchronous>, transform_indices = @transform_22, window_bounds = array<i64: 1, 128>}, {pipeline_mode = #tpu.pipeline_mode<synchronous>, transform_indices = @transform_23, window_bounds = array<i64: 128, 256>}, {pipeline_mode = #tpu.pipeline_mode<synchronous>, transform_indices = @transform_24, window_bounds = array<i64: 128, 256>}, {pipeline_mode = #tpu.pipeline_mode<synchronous>, transform_indices = @transform_25, window_bounds = array<i64: 128, 256>}, {pipeline_mode = #tpu.pipeline_mode<synchronous>, transform_indices = @transform_26, window_bounds = array<i64: 1, 256>}, {pipeline_mode = #tpu.pipeline_mode<synchronous>, transform_indices = @transform_27, window_bounds = array<i64: 256, 128>}, {pipeline_mode = #tpu.pipeline_mode<synchronous>, transform_indices = @transform_28, window_bounds = array<i64: 1, 128>}, {pipeline_mode = #tpu.pipeline_mode<synchronous>, transform_indices = @transform_29, window_bounds = array<i64: 128, 128>}, {pipeline_mode = #tpu.pipeline_mode<synchronous>, transform_indices = @transform_30, window_bounds = array<i64: 1, 128>}, {transform_indices = @transform_31, window_bounds = array<i64: 8, 128>}]} {
    %c0 = arith.constant 0 : index
    %c0_0 = arith.constant 0 : index
    %c0_1 = arith.constant 0 : index
    %0 = vector.load %arg1[%c0, %c0_0, %c0_1] : memref<8x16x128xbf16, #tpu.memory_space<vmem>>, vector<8x16x128xbf16>
    %c0_2 = arith.constant 0 : index
    %c0_3 = arith.constant 0 : index
    %c0_4 = arith.constant 0 : index
    %1 = vector.load %arg4[%c0_2, %c0_3, %c0_4] : memref<8x16x128xbf16, #tpu.memory_space<vmem>>, vector<8x16x128xbf16>
    %2 = tpu.concatenate %0, %1 in 0 : vector<8x16x128xbf16>, vector<8x16x128xbf16> -> vector<16x16x128xbf16>
    %c0_5 = arith.constant 0 : index
    %c0_6 = arith.constant 0 : index
    %c0_7 = arith.constant 0 : index
    %3 = vector.load %arg2[%c0_5, %c0_6, %c0_7] : memref<8x16x16xbf16, #tpu.memory_space<vmem>>, vector<8x16x16xbf16>
    %c0_8 = arith.constant 0 : index
    %c0_9 = arith.constant 0 : index
    %c0_10 = arith.constant 0 : index
    %4 = vector.load %arg5[%c0_8, %c0_9, %c0_10] : memref<8x16x16xbf16, #tpu.memory_space<vmem>>, vector<8x16x16xbf16>
    %5 = tpu.concatenate %3, %4 in 0 : vector<8x16x16xbf16>, vector<8x16x16xbf16> -> vector<16x16x16xbf16>
    %c0_11 = arith.constant 0 : index
    %c0_12 = arith.constant 0 : index
    %c0_13 = arith.constant 0 : index
    %6 = vector.load %arg3[%c0_11, %c0_12, %c0_13] : memref<8x16x1xf32, #tpu.memory_space<vmem>>, vector<8x16x1xf32>
    %c0_14 = arith.constant 0 : index
    %c0_15 = arith.constant 0 : index
    %c0_16 = arith.constant 0 : index
    %7 = vector.load %arg6[%c0_14, %c0_15, %c0_16] : memref<8x16x1xf32, #tpu.memory_space<vmem>>, vector<8x16x1xf32>
    %8 = tpu.concatenate %6, %7 in 0 : vector<8x16x1xf32>, vector<8x16x1xf32> -> vector<16x16x1xf32>
    "tpu.trace_start"() <{level = 10 : i32, message = "gij,gjf->gif"}> : () -> ()
    %cst = arith.constant dense<0.000000e+00> : vector<16x16x128xf32>
    %9 = tpu.matmul %5, %2, %cst {dimension_numbers = #tpu.dot_dimension_numbers<[2], [1], [1], [2], [0, 0, 0, 1, 1, 2], [0], [0]>} : vector<16x16x16xbf16>, vector<16x16x128xbf16>, vector<16x16x128xf32> -> vector<16x16x128xf32>
    "tpu.trace_stop"() : () -> ()
    %10 = vector.shape_cast %9 : vector<16x16x128xf32> to vector<256x128xf32>
    %11 = arith.truncf %10 : vector<256x128xf32> to vector<256x128xbf16>
    %c0_17 = arith.constant 0 : index
    %c0_18 = arith.constant 0 : index
    %12 = vector.load %arg8[%c0_17, %c0_18] : memref<128x128xbf16, #tpu.memory_space<vmem>>, vector<128x128xbf16>
    %cst_19 = arith.constant dense<0.000000e+00> : vector<256x128xf32>
    %13 = tpu.matmul %11, %12, %cst_19 {dimension_numbers = #tpu.dot_dimension_numbers<[1], [0], [0], [1], [0, 0, 1, 1], [], []>} : vector<256x128xbf16>, vector<128x128xbf16>, vector<256x128xf32> -> vector<256x128xf32>
    %14 = vector.shape_cast %13 : vector<256x128xf32> to vector<16x16x128xf32>
    %c0_20 = arith.constant 0 : index
    %c0_21 = arith.constant 0 : index
    %15 = vector.load %arg9[%c0_20, %c0_21] : memref<1x128xf32, #tpu.memory_space<vmem>>, vector<1x128xf32>
    %16 = vector.shape_cast %15 : vector<1x128xf32> to vector<1x1x128xf32>
    %17 = vector.broadcast %16 : vector<1x1x128xf32> to vector<16x16x128xf32>
    %18 = arith.addf %14, %17 : vector<16x16x128xf32>
    %cst_22 = arith.constant 0.000000e+00 : f32
    %19 = vector.broadcast %cst_22 : f32 to vector<16x16x128xf32>
    %20 = arith.maximumf %18, %19 : vector<16x16x128xf32>
    %21 = arith.truncf %20 : vector<16x16x128xf32> to vector<16x16x128xbf16>
    "tpu.trace_start"() <{level = 10 : i32, message = "gij,gjf->gif"}> : () -> ()
    %cst_23 = arith.constant dense<0.000000e+00> : vector<16x16x128xf32>
    %22 = tpu.matmul %5, %21, %cst_23 {dimension_numbers = #tpu.dot_dimension_numbers<[2], [1], [1], [2], [0, 0, 0, 1, 1, 2], [0], [0]>} : vector<16x16x16xbf16>, vector<16x16x128xbf16>, vector<16x16x128xf32> -> vector<16x16x128xf32>
    "tpu.trace_stop"() : () -> ()
    %23 = vector.shape_cast %22 : vector<16x16x128xf32> to vector<256x128xf32>
    %24 = arith.truncf %23 : vector<256x128xf32> to vector<256x128xbf16>
    %c0_24 = arith.constant 0 : index
    %c0_25 = arith.constant 0 : index
    %25 = vector.load %arg10[%c0_24, %c0_25] : memref<128x256xbf16, #tpu.memory_space<vmem>>, vector<128x256xbf16>
    %cst_26 = arith.constant dense<0.000000e+00> : vector<256x256xf32>
    %26 = tpu.matmul %24, %25, %cst_26 {dimension_numbers = #tpu.dot_dimension_numbers<[1], [0], [0], [1], [0, 0, 1, 1], [], []>} : vector<256x128xbf16>, vector<128x256xbf16>, vector<256x256xf32> -> vector<256x256xf32>
    %27 = vector.shape_cast %26 : vector<256x256xf32> to vector<16x16x256xf32>
    %c0_27 = arith.constant 0 : index
    %c0_28 = arith.constant 0 : index
    %28 = vector.load %arg11[%c0_27, %c0_28] : memref<1x256xf32, #tpu.memory_space<vmem>>, vector<1x256xf32>
    %29 = vector.shape_cast %28 : vector<1x256xf32> to vector<1x1x256xf32>
    %30 = vector.broadcast %29 : vector<1x1x256xf32> to vector<16x16x256xf32>
    %31 = arith.addf %27, %30 : vector<16x16x256xf32>
    %cst_29 = arith.constant 0.000000e+00 : f32
    %32 = vector.broadcast %cst_29 : f32 to vector<16x16x256xf32>
    %33 = arith.maximumf %31, %32 : vector<16x16x256xf32>
    %34 = arith.truncf %33 : vector<16x16x256xf32> to vector<16x16x256xbf16>
    "tpu.trace_start"() <{level = 10 : i32, message = "gij,gjf->gif"}> : () -> ()
    %cst_30 = arith.constant dense<0.000000e+00> : vector<16x16x256xf32>
    %35 = tpu.matmul %5, %34, %cst_30 {dimension_numbers = #tpu.dot_dimension_numbers<[2], [1], [1], [2], [0, 0, 0, 1, 1, 2], [0], [0]>} : vector<16x16x16xbf16>, vector<16x16x256xbf16>, vector<16x16x256xf32> -> vector<16x16x256xf32>
    "tpu.trace_stop"() : () -> ()
    %36 = vector.shape_cast %35 : vector<16x16x256xf32> to vector<256x256xf32>
    %37 = arith.truncf %36 : vector<256x256xf32> to vector<256x256xbf16>
    %c0_31 = arith.constant 0 : index
    %c0_32 = arith.constant 0 : index
    %38 = vector.load %arg12[%c0_31, %c0_32] : memref<256x384xbf16, #tpu.memory_space<vmem>>, vector<256x384xbf16>
    %cst_33 = arith.constant dense<0.000000e+00> : vector<256x384xf32>
    %39 = tpu.matmul %37, %38, %cst_33 {dimension_numbers = #tpu.dot_dimension_numbers<[1], [0], [0], [1], [0, 0, 1, 1], [], []>} : vector<256x256xbf16>, vector<256x384xbf16>, vector<256x384xf32> -> vector<256x384xf32>
    %40 = vector.shape_cast %39 : vector<256x384xf32> to vector<16x16x384xf32>
    %c0_34 = arith.constant 0 : index
    %c0_35 = arith.constant 0 : index
    %41 = vector.load %arg13[%c0_34, %c0_35] : memref<1x384xf32, #tpu.memory_space<vmem>>, vector<1x384xf32>
    %42 = vector.shape_cast %41 : vector<1x384xf32> to vector<1x1x384xf32>
    %43 = vector.broadcast %42 : vector<1x1x384xf32> to vector<16x16x384xf32>
    %44 = arith.addf %40, %43 : vector<16x16x384xf32>
    %cst_36 = arith.constant 0.000000e+00 : f32
    %45 = vector.broadcast %cst_36 : f32 to vector<16x16x384xf32>
    %46 = arith.maximumf %44, %45 : vector<16x16x384xf32>
    %47 = vector.broadcast %8 : vector<16x16x1xf32> to vector<16x16x384xf32>
    %48 = arith.mulf %46, %47 : vector<16x16x384xf32>
    %cst_37 = arith.constant dense<0xFF800000> : vector<16x384xf32>
    %49 = vector.multi_reduction <maximumf>, %48, %cst_37 [1] : vector<16x16x384xf32> to vector<16x384xf32>
    %50 = arith.truncf %49 : vector<16x384xf32> to vector<16x384xbf16>
    %c0_38 = arith.constant 0 : index
    %c0_39 = arith.constant 0 : index
    %51 = vector.load %arg14[%c0_38, %c0_39] : memref<384x256xbf16, #tpu.memory_space<vmem>>, vector<384x256xbf16>
    %cst_40 = arith.constant dense<0.000000e+00> : vector<16x256xf32>
    %52 = tpu.matmul %50, %51, %cst_40 {dimension_numbers = #tpu.dot_dimension_numbers<[1], [0], [0], [1], [0, 0, 1, 1], [], []>} : vector<16x384xbf16>, vector<384x256xbf16>, vector<16x256xf32> -> vector<16x256xf32>
    %c0_41 = arith.constant 0 : index
    %c0_42 = arith.constant 0 : index
    %53 = vector.load %arg15[%c0_41, %c0_42] : memref<1x256xf32, #tpu.memory_space<vmem>>, vector<1x256xf32>
    %54 = vector.broadcast %53 : vector<1x256xf32> to vector<16x256xf32>
    %55 = arith.addf %52, %54 : vector<16x256xf32>
    %cst_43 = arith.constant 0.000000e+00 : f32
    %56 = vector.broadcast %cst_43 : f32 to vector<16x256xf32>
    %57 = arith.maximumf %55, %56 : vector<16x256xf32>
    %58 = arith.truncf %57 : vector<16x256xf32> to vector<16x256xbf16>
    %c0_44 = arith.constant 0 : index
    %c0_45 = arith.constant 0 : index
    %59 = vector.load %arg16[%c0_44, %c0_45] : memref<256x128xbf16, #tpu.memory_space<vmem>>, vector<256x128xbf16>
    %cst_46 = arith.constant dense<0.000000e+00> : vector<16x128xf32>
    %60 = tpu.matmul %58, %59, %cst_46 {dimension_numbers = #tpu.dot_dimension_numbers<[1], [0], [0], [1], [0, 0, 1, 1], [], []>} : vector<16x256xbf16>, vector<256x128xbf16>, vector<16x128xf32> -> vector<16x128xf32>
    %c0_47 = arith.constant 0 : index
    %c0_48 = arith.constant 0 : index
    %61 = vector.load %arg17[%c0_47, %c0_48] : memref<1x128xf32, #tpu.memory_space<vmem>>, vector<1x128xf32>
    %62 = vector.broadcast %61 : vector<1x128xf32> to vector<16x128xf32>
    %63 = arith.addf %60, %62 : vector<16x128xf32>
    %64 = vector.extract_strided_slice %63 {offsets = [0, 0], sizes = [8, 128], strides = [1, 1]} : vector<16x128xf32> to vector<8x128xf32>
    %65 = vector.extract_strided_slice %63 {offsets = [8, 0], sizes = [8, 128], strides = [1, 1]} : vector<16x128xf32> to vector<8x128xf32>
    %c0_49 = arith.constant 0 : index
    %c0_50 = arith.constant 0 : index
    %66 = vector.load %arg7[%c0_49, %c0_50] : memref<8x1024xf32, #tpu.memory_space<vmem>>, vector<8x1024xf32>
    %67 = arith.mulf %66, %66 : vector<8x1024xf32>
    %cst_51 = arith.constant dense<0.000000e+00> : vector<8xf32>
    %68 = vector.multi_reduction <add>, %67, %cst_51 [1] : vector<8x1024xf32> to vector<8xf32>
    %69 = vector.shape_cast %68 : vector<8xf32> to vector<8x1xf32>
    %cst_52 = arith.constant 1.000000e-24 : f32
    %70 = vector.broadcast %cst_52 : f32 to vector<8x1xf32>
    %71 = arith.maximumf %69, %70 : vector<8x1xf32>
    %72 = math.rsqrt %71 : vector<8x1xf32>
    %73 = vector.broadcast %72 : vector<8x1xf32> to vector<8x1024xf32>
    %74 = arith.mulf %66, %73 : vector<8x1024xf32>
    %75 = arith.truncf %74 : vector<8x1024xf32> to vector<8x1024xbf16>
    %c0_53 = arith.constant 0 : index
    %c0_54 = arith.constant 0 : index
    %76 = vector.load %arg18[%c0_53, %c0_54] : memref<1024x512xbf16, #tpu.memory_space<vmem>>, vector<1024x512xbf16>
    %cst_55 = arith.constant dense<0.000000e+00> : vector<8x512xf32>
    %77 = tpu.matmul %75, %76, %cst_55 {dimension_numbers = #tpu.dot_dimension_numbers<[1], [0], [0], [1], [0, 0, 1, 1], [], []>} : vector<8x1024xbf16>, vector<1024x512xbf16>, vector<8x512xf32> -> vector<8x512xf32>
    %c0_56 = arith.constant 0 : index
    %c0_57 = arith.constant 0 : index
    %78 = vector.load %arg19[%c0_56, %c0_57] : memref<1x512xf32, #tpu.memory_space<vmem>>, vector<1x512xf32>
    %79 = vector.broadcast %78 : vector<1x512xf32> to vector<8x512xf32>
    %80 = arith.addf %77, %79 : vector<8x512xf32>
    %cst_58 = arith.constant 0.000000e+00 : f32
    %81 = vector.broadcast %cst_58 : f32 to vector<8x512xf32>
    %82 = arith.maximumf %80, %81 : vector<8x512xf32>
    %83 = arith.truncf %82 : vector<8x512xf32> to vector<8x512xbf16>
    %c0_59 = arith.constant 0 : index
    %c0_60 = arith.constant 0 : index
    %84 = vector.load %arg20[%c0_59, %c0_60] : memref<512x256xbf16, #tpu.memory_space<vmem>>, vector<512x256xbf16>
    %cst_61 = arith.constant dense<0.000000e+00> : vector<8x256xf32>
    %85 = tpu.matmul %83, %84, %cst_61 {dimension_numbers = #tpu.dot_dimension_numbers<[1], [0], [0], [1], [0, 0, 1, 1], [], []>} : vector<8x512xbf16>, vector<512x256xbf16>, vector<8x256xf32> -> vector<8x256xf32>
    %c0_62 = arith.constant 0 : index
    %c0_63 = arith.constant 0 : index
    %86 = vector.load %arg21[%c0_62, %c0_63] : memref<1x256xf32, #tpu.memory_space<vmem>>, vector<1x256xf32>
    %87 = vector.broadcast %86 : vector<1x256xf32> to vector<8x256xf32>
    %88 = arith.addf %85, %87 : vector<8x256xf32>
    %cst_64 = arith.constant 0.000000e+00 : f32
    %89 = vector.broadcast %cst_64 : f32 to vector<8x256xf32>
    %90 = arith.maximumf %88, %89 : vector<8x256xf32>
    %91 = arith.truncf %90 : vector<8x256xf32> to vector<8x256xbf16>
    %c0_65 = arith.constant 0 : index
    %c0_66 = arith.constant 0 : index
    %92 = vector.load %arg22[%c0_65, %c0_66] : memref<256x128xbf16, #tpu.memory_space<vmem>>, vector<256x128xbf16>
    %cst_67 = arith.constant dense<0.000000e+00> : vector<8x128xf32>
    %93 = tpu.matmul %91, %92, %cst_67 {dimension_numbers = #tpu.dot_dimension_numbers<[1], [0], [0], [1], [0, 0, 1, 1], [], []>} : vector<8x256xbf16>, vector<256x128xbf16>, vector<8x128xf32> -> vector<8x128xf32>
    %c0_68 = arith.constant 0 : index
    %c0_69 = arith.constant 0 : index
    %94 = vector.load %arg23[%c0_68, %c0_69] : memref<1x128xf32, #tpu.memory_space<vmem>>, vector<1x128xf32>
    %95 = vector.broadcast %94 : vector<1x128xf32> to vector<8x128xf32>
    %96 = arith.addf %93, %95 : vector<8x128xf32>
    %97 = arith.truncf %64 : vector<8x128xf32> to vector<8x128xbf16>
    %c0_70 = arith.constant 0 : index
    %c0_71 = arith.constant 0 : index
    %98 = vector.load %arg24[%c0_70, %c0_71] : memref<128x256xbf16, #tpu.memory_space<vmem>>, vector<128x256xbf16>
    %cst_72 = arith.constant dense<0.000000e+00> : vector<8x256xf32>
    %99 = tpu.matmul %97, %98, %cst_72 {dimension_numbers = #tpu.dot_dimension_numbers<[1], [0], [0], [1], [0, 0, 1, 1], [], []>} : vector<8x128xbf16>, vector<128x256xbf16>, vector<8x256xf32> -> vector<8x256xf32>
    %100 = arith.truncf %65 : vector<8x128xf32> to vector<8x128xbf16>
    %c0_73 = arith.constant 0 : index
    %c0_74 = arith.constant 0 : index
    %101 = vector.load %arg25[%c0_73, %c0_74] : memref<128x256xbf16, #tpu.memory_space<vmem>>, vector<128x256xbf16>
    %cst_75 = arith.constant dense<0.000000e+00> : vector<8x256xf32>
    %102 = tpu.matmul %100, %101, %cst_75 {dimension_numbers = #tpu.dot_dimension_numbers<[1], [0], [0], [1], [0, 0, 1, 1], [], []>} : vector<8x128xbf16>, vector<128x256xbf16>, vector<8x256xf32> -> vector<8x256xf32>
    %103 = arith.addf %99, %102 : vector<8x256xf32>
    %104 = arith.truncf %96 : vector<8x128xf32> to vector<8x128xbf16>
    %c0_76 = arith.constant 0 : index
    %c0_77 = arith.constant 0 : index
    %105 = vector.load %arg26[%c0_76, %c0_77] : memref<128x256xbf16, #tpu.memory_space<vmem>>, vector<128x256xbf16>
    %cst_78 = arith.constant dense<0.000000e+00> : vector<8x256xf32>
    %106 = tpu.matmul %104, %105, %cst_78 {dimension_numbers = #tpu.dot_dimension_numbers<[1], [0], [0], [1], [0, 0, 1, 1], [], []>} : vector<8x128xbf16>, vector<128x256xbf16>, vector<8x256xf32> -> vector<8x256xf32>
    %107 = arith.addf %103, %106 : vector<8x256xf32>
    %c0_79 = arith.constant 0 : index
    %c0_80 = arith.constant 0 : index
    %108 = vector.load %arg27[%c0_79, %c0_80] : memref<1x256xf32, #tpu.memory_space<vmem>>, vector<1x256xf32>
    %109 = vector.broadcast %108 : vector<1x256xf32> to vector<8x256xf32>
    %110 = arith.addf %107, %109 : vector<8x256xf32>
    %cst_81 = arith.constant 0.000000e+00 : f32
    %111 = vector.broadcast %cst_81 : f32 to vector<8x256xf32>
    %112 = arith.maximumf %110, %111 : vector<8x256xf32>
    %113 = arith.truncf %112 : vector<8x256xf32> to vector<8x256xbf16>
    %c0_82 = arith.constant 0 : index
    %c0_83 = arith.constant 0 : index
    %114 = vector.load %arg28[%c0_82, %c0_83] : memref<256x128xbf16, #tpu.memory_space<vmem>>, vector<256x128xbf16>
    %cst_84 = arith.constant dense<0.000000e+00> : vector<8x128xf32>
    %115 = tpu.matmul %113, %114, %cst_84 {dimension_numbers = #tpu.dot_dimension_numbers<[1], [0], [0], [1], [0, 0, 1, 1], [], []>} : vector<8x256xbf16>, vector<256x128xbf16>, vector<8x128xf32> -> vector<8x128xf32>
    %c0_85 = arith.constant 0 : index
    %c0_86 = arith.constant 0 : index
    %116 = vector.load %arg29[%c0_85, %c0_86] : memref<1x128xf32, #tpu.memory_space<vmem>>, vector<1x128xf32>
    %117 = vector.broadcast %116 : vector<1x128xf32> to vector<8x128xf32>
    %118 = arith.addf %115, %117 : vector<8x128xf32>
    %cst_87 = arith.constant 0.000000e+00 : f32
    %119 = vector.broadcast %cst_87 : f32 to vector<8x128xf32>
    %120 = arith.maximumf %118, %119 : vector<8x128xf32>
    %121 = arith.truncf %120 : vector<8x128xf32> to vector<8x128xbf16>
    %c0_88 = arith.constant 0 : index
    %c0_89 = arith.constant 0 : index
    %122 = vector.load %arg30[%c0_88, %c0_89] : memref<128x128xbf16, #tpu.memory_space<vmem>>, vector<128x128xbf16>
    %cst_90 = arith.constant dense<0.000000e+00> : vector<8x128xf32>
    %123 = tpu.matmul %121, %122, %cst_90 {dimension_numbers = #tpu.dot_dimension_numbers<[1], [0], [0], [1], [0, 0, 1, 1], [], []>} : vector<8x128xbf16>, vector<128x128xbf16>, vector<8x128xf32> -> vector<8x128xf32>
    %c0_91 = arith.constant 0 : index
    %c0_92 = arith.constant 0 : index
    %124 = vector.load %arg31[%c0_91, %c0_92] : memref<1x128xf32, #tpu.memory_space<vmem>>, vector<1x128xf32>
    %125 = vector.broadcast %124 : vector<1x128xf32> to vector<8x128xf32>
    %126 = arith.addf %123, %125 : vector<8x128xf32>
    %c0_93 = arith.constant 0 : index
    %c0_94 = arith.constant 0 : index
    %127 = vector.load %arg32[%c0_93, %c0_94] : memref<8x128xf32, #tpu.memory_space<vmem>>, vector<8x128xf32>
    tpu.vector_store %arg32[%c0_93, %c0_94], %126 {strides = array<i32>} : memref<8x128xf32, #tpu.memory_space<vmem>>, vector<8x128xf32>,
    return
  }
  func.func @transform_0(%arg0: i32) -> (i32, i32, i32) {
    %c0_i32 = arith.constant 0 : i32
    %c0_i32_0 = arith.constant 0 : i32
    %c0_i32_1 = arith.constant 0 : i32
    return %arg0, %c0_i32, %c0_i32_0 : i32, i32, i32
  }
  func.func @transform_1(%arg0: i32) -> (i32, i32, i32) {
    %c0_i32 = arith.constant 0 : i32
    %c0_i32_0 = arith.constant 0 : i32
    %c0_i32_1 = arith.constant 0 : i32
    return %arg0, %c0_i32, %c0_i32_0 : i32, i32, i32
  }
  func.func @transform_2(%arg0: i32) -> (i32, i32, i32) {
    %c0_i32 = arith.constant 0 : i32
    %c0_i32_0 = arith.constant 0 : i32
    %c0_i32_1 = arith.constant 0 : i32
    return %arg0, %c0_i32, %c0_i32_0 : i32, i32, i32
  }
  func.func @transform_3(%arg0: i32) -> (i32, i32, i32) {
    %c0_i32 = arith.constant 0 : i32
    %c0_i32_0 = arith.constant 0 : i32
    %c0_i32_1 = arith.constant 0 : i32
    return %arg0, %c0_i32, %c0_i32_0 : i32, i32, i32
  }
  func.func @transform_4(%arg0: i32) -> (i32, i32, i32) {
    %c0_i32 = arith.constant 0 : i32
    %c0_i32_0 = arith.constant 0 : i32
    %c0_i32_1 = arith.constant 0 : i32
    return %arg0, %c0_i32, %c0_i32_0 : i32, i32, i32
  }
  func.func @transform_5(%arg0: i32) -> (i32, i32, i32) {
    %c0_i32 = arith.constant 0 : i32
    %c0_i32_0 = arith.constant 0 : i32
    %c0_i32_1 = arith.constant 0 : i32
    return %arg0, %c0_i32, %c0_i32_0 : i32, i32, i32
  }
  func.func @transform_6(%arg0: i32) -> (i32, i32) {
    %c0_i32 = arith.constant 0 : i32
    %c0_i32_0 = arith.constant 0 : i32
    return %arg0, %c0_i32 : i32, i32
  }
  func.func @transform_7(%arg0: i32) -> (i32, i32) {
    %c0_i32 = arith.constant 0 : i32
    %c0_i32_0 = arith.constant 0 : i32
    %c0_i32_1 = arith.constant 0 : i32
    return %c0_i32, %c0_i32_0 : i32, i32
  }
  func.func @transform_8(%arg0: i32) -> (i32, i32) {
    %c0_i32 = arith.constant 0 : i32
    %c0_i32_0 = arith.constant 0 : i32
    %c0_i32_1 = arith.constant 0 : i32
    return %c0_i32, %c0_i32_0 : i32, i32
  }
  func.func @transform_9(%arg0: i32) -> (i32, i32) {
    %c0_i32 = arith.constant 0 : i32
    %c0_i32_0 = arith.constant 0 : i32
    %c0_i32_1 = arith.constant 0 : i32
    return %c0_i32, %c0_i32_0 : i32, i32
  }
  func.func @transform_10(%arg0: i32) -> (i32, i32) {
    %c0_i32 = arith.constant 0 : i32
    %c0_i32_0 = arith.constant 0 : i32
    %c0_i32_1 = arith.constant 0 : i32
    return %c0_i32, %c0_i32_0 : i32, i32
  }
  func.func @transform_11(%arg0: i32) -> (i32, i32) {
    %c0_i32 = arith.constant 0 : i32
    %c0_i32_0 = arith.constant 0 : i32
    %c0_i32_1 = arith.constant 0 : i32
    return %c0_i32, %c0_i32_0 : i32, i32
  }
  func.func @transform_12(%arg0: i32) -> (i32, i32) {
    %c0_i32 = arith.constant 0 : i32
    %c0_i32_0 = arith.constant 0 : i32
    %c0_i32_1 = arith.constant 0 : i32
    return %c0_i32, %c0_i32_0 : i32, i32
  }
  func.func @transform_13(%arg0: i32) -> (i32, i32) {
    %c0_i32 = arith.constant 0 : i32
    %c0_i32_0 = arith.constant 0 : i32
    %c0_i32_1 = arith.constant 0 : i32
    return %c0_i32, %c0_i32_0 : i32, i32
  }
  func.func @transform_14(%arg0: i32) -> (i32, i32) {
    %c0_i32 = arith.constant 0 : i32
    %c0_i32_0 = arith.constant 0 : i32
    %c0_i32_1 = arith.constant 0 : i32
    return %c0_i32, %c0_i32_0 : i32, i32
  }
  func.func @transform_15(%arg0: i32) -> (i32, i32) {
    %c0_i32 = arith.constant 0 : i32
    %c0_i32_0 = arith.constant 0 : i32
    %c0_i32_1 = arith.constant 0 : i32
    return %c0_i32, %c0_i32_0 : i32, i32
  }
  func.func @transform_16(%arg0: i32) -> (i32, i32) {
    %c0_i32 = arith.constant 0 : i32
    %c0_i32_0 = arith.constant 0 : i32
    %c0_i32_1 = arith.constant 0 : i32
    return %c0_i32, %c0_i32_0 : i32, i32
  }
  func.func @transform_17(%arg0: i32) -> (i32, i32) {
    %c0_i32 = arith.constant 0 : i32
    %c0_i32_0 = arith.constant 0 : i32
    %c0_i32_1 = arith.constant 0 : i32
    return %c0_i32, %c0_i32_0 : i32, i32
  }
  func.func @transform_18(%arg0: i32) -> (i32, i32) {
    %c0_i32 = arith.constant 0 : i32
    %c0_i32_0 = arith.constant 0 : i32
    %c0_i32_1 = arith.constant 0 : i32
    return %c0_i32, %c0_i32_0 : i32, i32
  }
  func.func @transform_19(%arg0: i32) -> (i32, i32) {
    %c0_i32 = arith.constant 0 : i32
    %c0_i32_0 = arith.constant 0 : i32
    %c0_i32_1 = arith.constant 0 : i32
    return %c0_i32, %c0_i32_0 : i32, i32
  }
  func.func @transform_20(%arg0: i32) -> (i32, i32) {
    %c0_i32 = arith.constant 0 : i32
    %c0_i32_0 = arith.constant 0 : i32
    %c0_i32_1 = arith.constant 0 : i32
    return %c0_i32, %c0_i32_0 : i32, i32
  }
  func.func @transform_21(%arg0: i32) -> (i32, i32) {
    %c0_i32 = arith.constant 0 : i32
    %c0_i32_0 = arith.constant 0 : i32
    %c0_i32_1 = arith.constant 0 : i32
    return %c0_i32, %c0_i32_0 : i32, i32
  }
  func.func @transform_22(%arg0: i32) -> (i32, i32) {
    %c0_i32 = arith.constant 0 : i32
    %c0_i32_0 = arith.constant 0 : i32
    %c0_i32_1 = arith.constant 0 : i32
    return %c0_i32, %c0_i32_0 : i32, i32
  }
  func.func @transform_23(%arg0: i32) -> (i32, i32) {
    %c0_i32 = arith.constant 0 : i32
    %c0_i32_0 = arith.constant 0 : i32
    %c0_i32_1 = arith.constant 0 : i32
    return %c0_i32, %c0_i32_0 : i32, i32
  }
  func.func @transform_24(%arg0: i32) -> (i32, i32) {
    %c0_i32 = arith.constant 0 : i32
    %c0_i32_0 = arith.constant 0 : i32
    %c0_i32_1 = arith.constant 0 : i32
    return %c0_i32, %c0_i32_0 : i32, i32
  }
  func.func @transform_25(%arg0: i32) -> (i32, i32) {
    %c0_i32 = arith.constant 0 : i32
    %c0_i32_0 = arith.constant 0 : i32
    %c0_i32_1 = arith.constant 0 : i32
    return %c0_i32, %c0_i32_0 : i32, i32
  }
  func.func @transform_26(%arg0: i32) -> (i32, i32) {
    %c0_i32 = arith.constant 0 : i32
    %c0_i32_0 = arith.constant 0 : i32
    %c0_i32_1 = arith.constant 0 : i32
    return %c0_i32, %c0_i32_0 : i32, i32
  }
  func.func @transform_27(%arg0: i32) -> (i32, i32) {
    %c0_i32 = arith.constant 0 : i32
    %c0_i32_0 = arith.constant 0 : i32
    %c0_i32_1 = arith.constant 0 : i32
    return %c0_i32, %c0_i32_0 : i32, i32
  }
  func.func @transform_28(%arg0: i32) -> (i32, i32) {
    %c0_i32 = arith.constant 0 : i32
    %c0_i32_0 = arith.constant 0 : i32
    %c0_i32_1 = arith.constant 0 : i32
    return %c0_i32, %c0_i32_0 : i32, i32
  }
  func.func @transform_29(%arg0: i32) -> (i32, i32) {
    %c0_i32 = arith.constant 0 : i32
    %c0_i32_0 = arith.constant 0 : i32
    %c0_i32_1 = arith.constant 0 : i32
    return %c0_i32, %c0_i32_0 : i32, i32
  }
  func.func @transform_30(%arg0: i32) -> (i32, i32) {
    %c0_i32 = arith.constant 0 : i32
    %c0_i32_0 = arith.constant 0 : i32
    %c0_i32_1 = arith.constant 0 : i32
    return %c0_i32, %c0_i32_0 : i32, i32
  }
  func.func @transform_31(%arg0: i32) -> (i32, i32) {
    %c0_i32 = arith.constant 0 : i32
    %c0_i32_0 = arith.constant 0 : i32
    return %arg0, %c0_i32 : i32, i32
  }
}

</mosaic_0001>

<bundles_post_ra>
// kernel: gcnnet_forward.1
= control target key start
LH: loop header
LB: loop body
LE: loop exit
PB: predicated region body
PF: predicated region fallthrough
CT: control target
= control target key end

     0   :  { %s12069_s6 = smov 1   ;;  %s12070_s10 = smov 2   ;;  %s14074_s0 = inlined_call_operand.smem [shape: u32[32], index: -1, kind: input, shape index: {}] }
   0x1   :  { %s12111_s5 = sld [smem:[%s14074_s0]]   ;;  %s12071_s14 = smov 3  }
   0x2   :  { %s12116_s9 = sld [smem:[%s14074_s0 + %s12069_s6]]   ;;  %s12072_s18 = smov 4  }
   0x3   :  { %s12121_s13 = sld [smem:[%s14074_s0 + %s12070_s10]]   ;;  %s12073_s22 = smov 5  }
   0x4   :  { %s12126_s17 = sld [smem:[%s14074_s0 + %s12071_s14]]   ;;  %s12074_s26 = smov 6  }
   0x5   :  { %s12131_s21 = sld [smem:[%s14074_s0 + %s12072_s18]]   ;;  %s12075_s30 = smov 7  }
   0x6   :  { %s12136_s25 = sld [smem:[%s14074_s0 + %s12073_s22]]   ;;  %s12076_s4 = smov 8  }
   0x7   :  { %s12141_s29 = sld [smem:[%s14074_s0 + %s12074_s26]]   ;;  %s12077_s10 = smov 9  }
   0x8   :  { %s12146_s3 = sld [smem:[%s14074_s0 + %s12075_s30]]   ;;  %s12078_s15 = smov 10  }
   0x9   :  { %s12151_s8 = sld [smem:[%s14074_s0 + %s12076_s4]]   ;;  %s12079_s20 = smov 11  }
   0xa   :  { %s12156_s14 = sld [smem:[%s14074_s0 + %s12077_s10]]   ;;  %s12080_s26 = smov 12  }
   0xb   :  { %s12161_s19 = sld [smem:[%s14074_s0 + %s12078_s15]]   ;;  %s12081_s1 = smov 13  }
   0xc   :  { %s12166_s24 = sld [smem:[%s14074_s0 + %s12079_s20]]   ;;  %s12082_s7 = smov 14  }
   0xd   :  { %s12171_s30 = sld [smem:[%s14074_s0 + %s12080_s26]]   ;;  %s12083_s15 = smov 15  }
   0xe   :  { %s12176_s6 = sld [smem:[%s14074_s0 + %s12081_s1]]   ;;  %s12084_s22 = smov 16  }
   0xf   :  { %s12181_s12 = sld [smem:[%s14074_s0 + %s12082_s7]]   ;;  %s12085_s28 = smov 17  }
  0x10   :  { %s12186_s20 = sld [smem:[%s14074_s0 + %s12083_s15]]   ;;  %s12086_s7 = smov 18  }
  0x11   :  { %s12191_s27 = sld [smem:[%s14074_s0 + %s12084_s22]]   ;;  %s12087_s15 = smov 19  }
  0x12   :  { %s12196_s4 = sld [smem:[%s14074_s0 + %s12085_s28]]   ;;  %s12088_s22 = smov 20  }
  0x13   :  { %s12089_s28 = smov 21  }
  0x15   :  { %14102 = sst [smem:[#allocation2_spill]] %s12181_s12 }
  0x16   :  { %14103 = sst [smem:[#allocation3_spill]] %s12186_s20 }
  0x17   :  { %14104 = sst [smem:[#allocation4_spill]] %s12191_s27 }
  0x18   :  { %14105 = sst [smem:[#allocation5_spill]] %s12196_s4 }
  0x19   :  { %s12201_s12 = sld [smem:[%s14074_s0 + %s12086_s7]]   ;;  %s12090_s7 = smov 22  }
  0x1a   :  { %s12206_s20 = sld [smem:[%s14074_s0 + %s12087_s15]]   ;;  %s12091_s15 = smov 23  }
  0x1b   :  { %s12211_s27 = sld [smem:[%s14074_s0 + %s12088_s22]]   ;;  %s12092_s22 = smov 24  }
  0x1c   :  { %s12216_s4 = sld [smem:[%s14074_s0 + %s12089_s28]]   ;;  %s12093_s28 = smov 25  }
  0x1f   :  { %14106 = sst [smem:[#allocation6_spill]] %s12201_s12 }
  0x20   :  { %14107 = sst [smem:[#allocation7_spill]] %s12206_s20 }
  0x21   :  { %14108 = sst [smem:[#allocation8_spill]] %s12211_s27 }
  0x22   :  { %14109 = sst [smem:[#allocation9_spill]] %s12216_s4 }
  0x23   :  { %s12221_s12 = sld [smem:[%s14074_s0 + %s12090_s7]]   ;;  %s12094_s7 = smov 26  }
  0x24   :  { %s12226_s20 = sld [smem:[%s14074_s0 + %s12091_s15]]   ;;  %s12095_s15 = smov 27  }
  0x25   :  { %s12231_s27 = sld [smem:[%s14074_s0 + %s12092_s22]]   ;;  %s12096_s22 = smov 28  }
  0x26   :  { %s12236_s4 = sld [smem:[%s14074_s0 + %s12093_s28]]   ;;  %s12097_s28 = smov 29  }
  0x29   :  { %14110 = sst [smem:[#allocation10_spill]] %s12221_s12 }
  0x2a   :  { %14111 = sst [smem:[#allocation11_spill]] %s12226_s20 }
  0x2b   :  { %14112 = sst [smem:[#allocation12_spill]] %s12231_s27 }
  0x2c   :  { %14113 = sst [smem:[#allocation13_spill]] %s12236_s4 }
  0x2d   :  { %s12241_s12 = sld [smem:[%s14074_s0 + %s12094_s7]]   ;;  %s12098_s7 = smov 30  }
  0x2e   :  { %s12246_s20 = sld [smem:[%s14074_s0 + %s12095_s15]]   ;;  %s12099_s15 = smov 31  }
  0x2f   :  { %s12251_s27 = sld [smem:[%s14074_s0 + %s12096_s22]]   ;;  %s12268_s22 = smov 0  }
  0x30   :  { %s12256_s4 = sld [smem:[%s14074_s0 + %s12097_s28]]  }
  0x33   :  { %14114 = sst [smem:[#allocation14_spill]] %s12241_s12 }
  0x34   :  { %14115 = sst [smem:[#allocation15_spill]] %s12246_s20 }
  0x35   :  { %s12261_s12 = sld [smem:[%s14074_s0 + %s12098_s7]]  }
  0x36   :  { %s12266_s20 = sld [smem:[%s14074_s0 + %s12099_s15]]  }
  0x37 LB: > { %s12274_s23 = sadd.s32 4294967295, %s12067_s22   ;;  %p9985_p0 = scmp.ge.s32.totalorder %s12067_s22, 1  ;;  %s12067_s22 = sphi %s12268_s22, %s73_s22  }
  0x38   : > { %p941_p1 = scmp.lt.s32.totalorder %s12067_s22, 3 }
  0x3a   : > { %p942_p2 = pnand %p9985_p0, %p941_p1 }
  0x3c   : > { %945 = sbr.rel (%p942_p2) target bundleno = 3176 (0xc68), region = 144 }
  0x41   : > { %s9986_s0 = sshll.u32 %s12274_s23, 3  ;;  %v14083_v0 = vmov 0.0   ;;  %vm12101_vm0 = vmmov 0   ;;  %vm1215_vm1 = vcmask 130048   ;;  %v11256_v32 = vld [vmem:[%s12146_s3 + $0x38] sm:$0xff]   ;;  %v11257_v34 = vld [vmem:[%s12146_s3 + $0x30] sm:$0xff]  }
  0x42   : > { %10920 = vmatprep.subr.bf16.mxu0 %v14083_v0  ;;  %p1057_p3 = scmp.lt.s32.totalorder %s9986_s0, 15  ;;  %10922 = vmatprep.mubr.msk.bf16.mxu0 %vm12101_vm0, %v14083_v0  ;;  %v11258_v35 = vld [vmem:[%s12146_s3 + $0x28] sm:$0xff]   ;;  %v11259_v36 = vld [vmem:[%s12146_s3 + $0x20] sm:$0xff]   ;;  %v11260_v37 = vld [vmem:[%s12146_s3 + $0x18] sm:$0xff]   ;;  %p1098_p4 = scmp.lt.s32.totalorder %s12274_s23, 1  ;;  %vm5945_vm2 = vcmask 1041409  }
  0x43   : > { %10938 = vmatprep.subr.bf16.mxu1 %v14083_v0  ;;  %10940 = vmatprep.mubr.msk.bf16.mxu1 %vm12101_vm0, %v14083_v0  ;;  %v11261_v38 = vld [vmem:[%s12146_s3 + $0x10] sm:$0xff]   ;;  %v11262_v39 = vld [vmem:[%s12146_s3 + $0x8] sm:$0xff]   ;;  %v11263_v40 = vld [vmem:[%s12146_s3] sm:$0xff]   ;;  %vm5947_vm3 = vcmask 1042434   ;;  %vm5949_vm4 = vcmask 1043459   ;;  %vm5951_vm5 = vcmask 1044484  }
  0x44   : > { %s14163_s0 = smov (!%p1057_p3, %s9986_s0), 15  ;;  %s14165_s23 = smov (!%p1098_p4, %s12274_s23), 1  ;;  %vm5953_vm6 = vcmask 1045509   ;;  %vm5955_vm7 = vcmask 1046534   ;;  %vm5957_vm8 = vcmask 1047559  }
  0x45   : > { %s12288_s26 = sshll.u32 %s14163_s0, 3  ;;  %s10640_s10 = sshll.u32 %s14163_s0, 4 }
  0x46   : > { %s12292_s28 = scalar_lea.vmem %s12111_s5, %s12288_s26  ;;  %s12297_s1 = scalar_lea.vmem %s12116_s9, %s12288_s26 }
  0x47   : > { %v11224_v1 = vld [vmem:[%s12292_s28] sm:$0xff]   ;;  %v11226_v3 = vld [vmem:[%s12292_s28 + $0x8] sm:$0xff]   ;;  %v11228_v4 = vld [vmem:[%s12292_s28 + $0x18] sm:$0xff]   ;;  %s12324_s2 = scalar_lea.vmem %s12126_s17, %s12288_s26  ;;  %s12328_s7 = scalar_lea.vmem %s12131_s21, %s12288_s26 }
  0x48   : > { %v11225_v2 = vld [vmem:[%s12297_s1] sm:$0xff]   ;;  %10921 = vmatpush3.bf16.msra.mxu0 %v11224_v1  ;;  %v11229_v5 = vld [vmem:[%s12297_s1 + $0x18] sm:$0xff]   ;;  %10939 = vmatpush3.bf16.msra.mxu1 %v11228_v4  ;;  %v11232_v6 = vld [vmem:[%s12292_s28 + $0x28] sm:$0xff]   ;;  %s12787_s11 = scalar_lea.vmem %s12121_s13, %s10640_s10  ;;  %s12794_s15 = scalar_lea.vmem %s12136_s25, %s10640_s10 }
  0x49   : > { %10926 = vmatprep.subr.bf16.mxu0 %v14083_v0  ;;  %10950 = vmatprep.subr.bf16.mxu1 %v14083_v0  ;;  %v11227_v7 = vld [vmem:[%s12297_s1 + $0x8] sm:$0xff]   ;;  %v11230_v8 = vld [vmem:[%s12292_s28 + $0x10] sm:$0xff]   ;;  %v11236_v10 = vld [vmem:[%s12292_s28 + $0x38] sm:$0xff]   ;;  %s10644_s16 = sshll.u32 %s14165_s23, 6  ;;  %s14129_s0 = sld [smem:[#allocation5_spill]] }
  0x4a   : > { %v11233_v9 = vld [vmem:[%s12297_s1 + $0x28] sm:$0xff]   ;;  %v11231_v11 = vld [vmem:[%s12297_s1 + $0x10] sm:$0xff]   ;;  %v11234_v12 = vld [vmem:[%s12292_s28 + $0x20] sm:$0xff]   ;;  %s12837_s18 = scalar_lea.vmem %s12141_s29, %s10644_s16  ;;  %s14143_s26 = sld [smem:[#allocation3_spill]] }
  0x4b   : > { %10923 = vmatmul.mubr.msk.bf16.vlgmr.msra.gmra.mxu0 %vm1215_vm1, %v11225_v2  ;;  %10941 = vmatmul.mubr.msk.bf16.vlgmr.msra.gmra.mxu1 %vm1215_vm1, %v11229_v5  ;;  %v11237_v13 = vld [vmem:[%s12297_s1 + $0x38] sm:$0xff]   ;;  %v11240_v14 = vld [vmem:[%s12324_s2 + $0x8] sm:$0xff]   ;;  %v11235_v15 = vld [vmem:[%s12297_s1 + $0x20] sm:$0xff]   ;;  %s14152_s10 = sld [smem:[#allocation12_spill]] }
  0x4c   : > { %10927 = vmatpush3.bf16.msra.mxu0 %v11226_v3  ;;  %10928 = vmatprep.mubr.msk.bf16.mxu0 %vm12101_vm0, %v14083_v0  ;;  %v11238_v16 = vld [vmem:[%s12292_s28 + $0x30] sm:$0xff]   ;;  %v11241_v17 = vld [vmem:[%s12328_s7 + $0x8] sm:$0xff]   ;;  %v11244_v19 = vld [vmem:[%s12324_s2 + $0x18] sm:$0xff]   ;;  %s14144_s28 = sld [smem:[#allocation2_spill]] }
  0x4d   : > { %10932 = vmatprep.subr.bf16.mxu0 %v14083_v0  ;;  %10951 = vmatpush3.bf16.msra.mxu1 %v11232_v6  ;;  %v11239_v18 = vld [vmem:[%s12297_s1 + $0x30] sm:$0xff]   ;;  %v11242_v20 = vld [vmem:[%s12324_s2] sm:$0xff]   ;;  %v11245_v21 = vld [vmem:[%s12328_s7 + $0x18] sm:$0xff]   ;;  %s14156_s16 = sld [smem:[#allocation13_spill]] }
  0x4e   : > { %10952 = vmatprep.mubr.msk.bf16.mxu1 %vm12101_vm0, %v14083_v0  ;;  %10962 = vmatprep.subr.bf16.mxu1 %v14083_v0  ;;  %v11249_v22 = vld [vmem:[%s12324_s2 + $0x28] sm:$0xff]   ;;  %v11243_v23 = vld [vmem:[%s12328_s7] sm:$0xff]   ;;  %v11246_v24 = vld [vmem:[%s12324_s2 + $0x10] sm:$0xff]  }
  0x4f   : > { %v11251_v25 = vld [vmem:[%s12328_s7 + $0x28] sm:$0xff]   ;;  %v11253_v26 = vld [vmem:[%s12324_s2 + $0x38] sm:$0xff]   ;;  %v11247_v27 = vld [vmem:[%s12328_s7 + $0x10] sm:$0xff]  }
  0x50   : > { %v11248_v28 = vld [vmem:[%s12324_s2 + $0x20] sm:$0xff]   ;;  %v11255_v29 = vld [vmem:[%s12328_s7 + $0x38] sm:$0xff]   ;;  %v11252_v31 = vld [vmem:[%s12324_s2 + $0x30] sm:$0xff]   ;;  %s14148_s2 = sld [smem:[#allocation6_spill]] }
  0x51   : > { %v11250_v30 = vld [vmem:[%s12328_s7 + $0x20] sm:$0xff]   ;;  %v11254_v33 = vld [vmem:[%s12328_s7 + $0x30] sm:$0xff]  }
  0x53   : > { %10929 = vmatmul.mubr.msk.bf16.vlgmr.msra.gmra.mxu0 %vm1215_vm1, %v11227_v7  ;;  %10953 = vmatmul.mubr.msk.bf16.vlgmr.msra.gmra.mxu1 %vm1215_vm1, %v11233_v9 }
  0x54   : > { %10933 = vmatpush3.bf16.msra.mxu0 %v11230_v8  ;;  %10934 = vmatprep.mubr.msk.bf16.mxu0 %vm12101_vm0, %v14083_v0 }
  0x55   : > { %10944 = vmatprep.subr.bf16.mxu0 %v14083_v0  ;;  %10963 = vmatpush3.bf16.msra.mxu1 %v11236_v10 }
  0x56   : > { %10964 = vmatprep.mubr.msk.bf16.mxu1 %vm12101_vm0, %v14083_v0  ;;  %10974 = vmatprep.subr.bf16.mxu1 %v14083_v0 }
  0x5b   : > { %10935 = vmatmul.mubr.msk.bf16.vlgmr.msra.gmra.mxu0 %vm1215_vm1, %v11231_v11  ;;  %10965 = vmatmul.mubr.msk.bf16.vlgmr.msra.gmra.mxu1 %vm1215_vm1, %v11237_v13 }
  0x5c   : > { %10945 = vmatpush3.bf16.msra.mxu0 %v11234_v12  ;;  %10946 = vmatprep.mubr.msk.bf16.mxu0 %vm12101_vm0, %v14083_v0 }
  0x5d   : > { %10956 = vmatprep.subr.bf16.mxu0 %v14083_v0  ;;  %10975 = vmatpush3.bf16.msra.mxu1 %v11240_v14 }
  0x5e   : > { %10976 = vmatprep.mubr.msk.bf16.mxu1 %vm12101_vm0, %v14083_v0  ;;  %10986 = vmatprep.subr.bf16.mxu1 %v14083_v0 }
  0x63   : > { %10947 = vmatmul.mubr.msk.bf16.vlgmr.msra.gmra.mxu0 %vm1215_vm1, %v11235_v15  ;;  %10977 = vmatmul.mubr.msk.bf16.vlgmr.msra.gmra.mxu1 %vm1215_vm1, %v11241_v17 }
  0x64   : > { %10957 = vmatpush3.bf16.msra.mxu0 %v11238_v16  ;;  %10958 = vmatprep.mubr.msk.bf16.mxu0 %vm12101_vm0, %v14083_v0 }
  0x65   : > { %10968 = vmatprep.subr.bf16.mxu0 %v14083_v0  ;;  %10987 = vmatpush3.bf16.msra.mxu1 %v11244_v19 }
  0x66   : > { %10988 = vmatprep.mubr.msk.bf16.mxu1 %vm12101_vm0, %v14083_v0  ;;  %10998 = vmatprep.subr.bf16.mxu1 %v14083_v0 }
  0x6b   : > { %10959 = vmatmul.mubr.msk.bf16.vlgmr.msra.gmra.mxu0 %vm1215_vm1, %v11239_v18  ;;  %10989 = vmatmul.mubr.msk.bf16.vlgmr.msra.gmra.mxu1 %vm1215_vm1, %v11245_v21 }
  0x6c   : > { %10969 = vmatpush3.bf16.msra.mxu0 %v11242_v20  ;;  %10970 = vmatprep.mubr.msk.bf16.mxu0 %vm12101_vm0, %v14083_v0 }
  0x6d   : > { %10980 = vmatprep.subr.bf16.mxu0 %v14083_v0  ;;  %10999 = vmatpush3.bf16.msra.mxu1 %v11249_v22 }
  0x6e   : > { %11000 = vmatprep.mubr.msk.bf16.mxu1 %vm12101_vm0, %v14083_v0  ;;  %11010 = vmatprep.subr.bf16.mxu1 %v14083_v0 }
  0x73   : > { %10971 = vmatmul.mubr.msk.bf16.vlgmr.msra.gmra.mxu0 %vm1215_vm1, %v11243_v23  ;;  %11001 = vmatmul.mubr.msk.bf16.vlgmr.msra.gmra.mxu1 %vm1215_vm1, %v11251_v25 }
  0x74   : > { %10981 = vmatpush3.bf16.msra.mxu0 %v11246_v24  ;;  %10982 = vmatprep.mubr.msk.bf16.mxu0 %vm12101_vm0, %v14083_v0 }
  0x75   : > { %10992 = vmatprep.subr.bf16.mxu0 %v14083_v0  ;;  %11011 = vmatpush3.bf16.msra.mxu1 %v11253_v26 }
  0x76   : > { %11012 = vmatprep.mubr.msk.bf16.mxu1 %vm12101_vm0, %v14083_v0  ;;  %11064 = vmatprep.subr.bf16.mxu1 %v14083_v0 }
  0x7b   : > { %10983 = vmatmul.mubr.msk.bf16.vlgmr.msra.gmra.mxu0 %vm1215_vm1, %v11247_v27  ;;  %11013 = vmatmul.mubr.msk.bf16.vlgmr.msra.gmra.mxu1 %vm1215_vm1, %v11255_v29 }
  0x7c   : > { %10993 = vmatpush3.bf16.msra.mxu0 %v11248_v28  ;;  %10994 = vmatprep.mubr.msk.bf16.mxu0 %vm12101_vm0, %v14083_v0 }
  0x7d   : > { %11004 = vmatprep.subr.bf16.mxu0 %v14083_v0  ;;  %11066 = vmatprep.mubr.msk.bf16.mxu1 %vm12101_vm0, %v14083_v0 }
  0x83   : > { %10995 = vmatmul.mubr.msk.bf16.vlgmr.msra.gmra.mxu0 %vm1215_vm1, %v11250_v30 }
  0x84   : > { %11005 = vmatpush3.bf16.msra.mxu0 %v11252_v31  ;;  %11006 = vmatprep.mubr.msk.bf16.mxu0 %vm12101_vm0, %v14083_v0 }
  0x85   : > { %11016 = vmatprep.subr.bf16.mxu0 %v11256_v32 }
  0x8b   : > { %11007 = vmatmul.mubr.msk.bf16.vlgmr.msra.gmra.mxu0 %vm1215_vm1, %v11254_v33 }
  0x8c   : > { %11017 = vmatpush3.bf16.msra.mxu0 %v11256_v32 }
  0x8d   : > { %11018 = vmatprep.subr.bf16.mxu0 %v11257_v34 }
  0x90   : > { %11019 = vmatpush3.bf16.msra.mxu0 %v11257_v34 }
  0x91   : > { %11020 = vmatprep.subr.bf16.mxu0 %v11258_v35 }
  0x94   : > { %11021 = vmatpush3.bf16.msra.mxu0 %v11258_v35 }
  0x95   : > { %11022 = vmatprep.subr.bf16.mxu0 %v11259_v36 }
  0x98   : > { %11023 = vmatpush3.bf16.msra.mxu0 %v11259_v36 }
  0x99   : > { %11024 = vmatprep.subr.bf16.mxu0 %v11260_v37 }
  0x9c   : > { %11025 = vmatpush3.bf16.msra.mxu0 %v11260_v37 }
  0x9d   : > { %11026 = vmatprep.subr.bf16.mxu0 %v11261_v38 }
  0xa0   : > { %11027 = vmatpush3.bf16.msra.mxu0 %v11261_v38 }
  0xa1   : > { %11028 = vmatprep.subr.bf16.mxu0 %v11262_v39 }
  0xa4   : > { %11029 = vmatpush3.bf16.msra.mxu0 %v11262_v39 }
  0xa5   : > { %11030 = vmatprep.subr.bf16.mxu0 %v11263_v40 }
  0xa8   : > { %11031 = vmatpush3.bf16.msra.mxu0 %v11263_v40 }
  0xa9   : > { %11130 = vmatprep.subr.bf16.mxu0 %v14083_v0 }
 0x10b   : > { %v1253_v41 = vpop.f32.mrf.mxu0  ;;  %v1418_v45 = vpop.f32.mrf.mxu1 }
 0x10d   : > { %v10924_v42 = vpop.f32.mrf.mxu0  ;;  %v10942_v47 = vpop.f32.mrf.mxu1 }
 0x10f   : > { %v1256_v43 = vpop.f32.mrf.mxu0  ;;  %v1421_v49 = vpop.f32.mrf.mxu1 }
 0x110   : > { %v2085_v44 = vpack.c.bf16 %v1256_v43, %v1253_v41  ;;  %v2088_v61 = vpack.c.bf16 %v1421_v49, %v1418_v45 }
 0x111   : > { %v10925_v46 = vpop.f32.mrf.mxu0  ;;  %v10943_v51 = vpop.f32.mrf.mxu1 }
 0x112   : > { %11032 = vmatprep.mubr.bf16.mxu0 %v2085_v44 }
 0x113   : > { %v1308_v48 = vpop.f32.mrf.mxu0  ;;  %v1528_v54 = vpop.f32.mrf.mxu1 }
 0x115   : > { %v10930_v50 = vpop.f32.mrf.mxu0  ;;  %v10954_v56 = vpop.f32.mrf.mxu1 }
 0x117   : > { %v1311_v52 = vpop.f32.mrf.mxu0  ;;  %v1531_v58 = vpop.f32.mrf.mxu1 }
 0x118   : > { %v2086_v53 = vpack.c.bf16 %v1311_v52, %v1308_v48  ;;  %v2090_v8 = vpack.c.bf16 %v1531_v58, %v1528_v54 }
 0x119   : > { %v10931_v55 = vpop.f32.mrf.mxu0  ;;  %v10955_v60 = vpop.f32.mrf.mxu1 }
 0x11a   : > { %11033 = vmatmul.mubr.bf16.vlgmr.msra.gmra.mxu0 %v2086_v53  ;;  %v12411_v60 = vld [vmem:[%s12151_s8] ss:$0 sm:$0xff] }
 0x11b   : > { %v1363_v57 = vpop.f32.mrf.mxu0  ;;  %v1638_v1 = vpop.f32.mrf.mxu1 }
 0x11d   : > { %v10936_v59 = vpop.f32.mrf.mxu0  ;;  %v10966_v3 = vpop.f32.mrf.mxu1 }
 0x11f   : > { %v1366_v62 = vpop.f32.mrf.mxu0  ;;  %v1641_v5 = vpop.f32.mrf.mxu1 }
 0x120   : > { %v2087_v63 = vpack.c.bf16 %v1366_v62, %v1363_v57  ;;  %v2092_v18 = vpack.c.bf16 %v1641_v5, %v1638_v1 }
 0x121   : > { %v10937_v2 = vpop.f32.mrf.mxu0  ;;  %v10967_v7 = vpop.f32.mrf.mxu1 }
 0x122   : > { %11036 = vmatprep.mubr.bf16.mxu0 %v2087_v63 }
 0x123   : > { %v1473_v4 = vpop.f32.mrf.mxu0  ;;  %11037 = vmatmul.mubr.bf16.gmra.mxu0 %v2088_v61  ;;  %v1748_v11 = vpop.f32.mrf.mxu1 }
 0x125   : > { %v10948_v6 = vpop.f32.mrf.mxu0  ;;  %v10978_v13 = vpop.f32.mrf.mxu1 }
 0x127   : > { %v1476_v9 = vpop.f32.mrf.mxu0  ;;  %v1751_v15 = vpop.f32.mrf.mxu1 }
 0x128   : > { %v2089_v10 = vpack.c.bf16 %v1476_v9, %v1473_v4  ;;  %v2094_v28 = vpack.c.bf16 %v1751_v15, %v1748_v11  ;;  %v12420_v15 = vld [vmem:[%s12297_s1] sm:$0xff]  }
 0x129   : > { %v10949_v12 = vpop.f32.mrf.mxu0  ;;  %v10979_v17 = vpop.f32.mrf.mxu1 }
 0x12a   : > { %11040 = vmatprep.mubr.bf16.mxu0 %v2089_v10 }
 0x12b   : > { %v1583_v14 = vpop.f32.mrf.mxu0  ;;  %11041 = vmatmul.mubr.bf16.gmra.mxu0 %v2090_v8  ;;  %v1858_v21 = vpop.f32.mrf.mxu1 }
 0x12d   : > { %v10960_v16 = vpop.f32.mrf.mxu0  ;;  %v10990_v23 = vpop.f32.mrf.mxu1 }
 0x12f   : > { %v1586_v19 = vpop.f32.mrf.mxu0  ;;  %v1861_v25 = vpop.f32.mrf.mxu1 }
 0x130   : > { %v2091_v20 = vpack.c.bf16 %v1586_v19, %v1583_v14  ;;  %v2096_v38 = vpack.c.bf16 %v1861_v25, %v1858_v21 }
 0x131   : > { %v10961_v22 = vpop.f32.mrf.mxu0  ;;  %v10991_v27 = vpop.f32.mrf.mxu1 }
 0x132   : > { %11044 = vmatprep.mubr.bf16.mxu0 %v2091_v20 }
 0x133   : > { %v1693_v24 = vpop.f32.mrf.mxu0  ;;  %11045 = vmatmul.mubr.bf16.gmra.mxu0 %v2092_v18  ;;  %v1968_v31 = vpop.f32.mrf.mxu1 }
 0x135   : > { %v10972_v26 = vpop.f32.mrf.mxu0  ;;  %v11002_v33 = vpop.f32.mrf.mxu1 }
 0x136   : > { %v12431_v26 = vld [vmem:[%s12297_s1 + $0x8] sm:$0xff]  }
 0x137   : > { %v1696_v29 = vpop.f32.mrf.mxu0  ;;  %v1971_v35 = vpop.f32.mrf.mxu1 }
 0x138   : > { %v2093_v30 = vpack.c.bf16 %v1696_v29, %v1693_v24  ;;  %v2098_v49 = vpack.c.bf16 %v1971_v35, %v1968_v31 }
 0x139   : > { %v10973_v32 = vpop.f32.mrf.mxu0  ;;  %v11003_v37 = vpop.f32.mrf.mxu1 }
 0x13a   : > { %11048 = vmatprep.mubr.bf16.mxu0 %v2093_v30 }
 0x13b   : > { %v1803_v34 = vpop.f32.mrf.mxu0  ;;  %11049 = vmatmul.mubr.bf16.gmra.mxu0 %v2094_v28  ;;  %v2078_v41 = vpop.f32.mrf.mxu1 }
 0x13d   : > { %v10984_v36 = vpop.f32.mrf.mxu0  ;;  %v11014_v43 = vpop.f32.mrf.mxu1 }
 0x13e   : > { %v12441_v36 = vld [vmem:[%s12297_s1 + $0x10] sm:$0xff]  }
 0x13f   : > { %v1806_v39 = vpop.f32.mrf.mxu0  ;;  %v2081_v45 = vpop.f32.mrf.mxu1 }
 0x140   : > { %v2095_v40 = vpack.c.bf16 %v1806_v39, %v1803_v34  ;;  %v2100_v55 = vpack.c.bf16 %v2081_v45, %v2078_v41 }
 0x141   : > { %v10985_v42 = vpop.f32.mrf.mxu0  ;;  %v11015_v47 = vpop.f32.mrf.mxu1 }
 0x142   : > { %11052 = vmatprep.mubr.bf16.mxu0 %v2095_v40 }
 0x143   : > { %11053 = vmatmul.mubr.bf16.gmra.mxu0 %v2096_v38  ;;  %v1913_v44 = vpop.f32.mrf.mxu0 }
 0x145   : > { %v10996_v46 = vpop.f32.mrf.mxu0 }
 0x146   : > { %v12457_v46 = vld [vmem:[%s12297_s1 + $0x18] sm:$0xff]  }
 0x147   : > { %v1916_v48 = vpop.f32.mrf.mxu0 }
 0x148   : > { %v2097_v50 = vpack.c.bf16 %v1916_v48, %v1913_v44 }
 0x149   : > { %v10997_v51 = vpop.f32.mrf.mxu0 }
 0x14a   : > { %11056 = vmatprep.mubr.bf16.mxu0 %v2097_v50 }
 0x14b   : > { %11057 = vmatmul.mubr.bf16.gmra.mxu0 %v2098_v49  ;;  %v2023_v52 = vpop.f32.mrf.mxu0 }
 0x14d   : > { %v11008_v53 = vpop.f32.mrf.mxu0 }
 0x14f   : > { %v2026_v54 = vpop.f32.mrf.mxu0 }
 0x150   : > { %v2099_v56 = vpack.c.bf16 %v2026_v54, %v2023_v52 }
 0x151   : > { %v11009_v57 = vpop.f32.mrf.mxu0 }
 0x152   : > { %11060 = vmatprep.mubr.bf16.mxu0 %v2099_v56 }
 0x153   : > { %11061 = vmatmul.mubr.bf16.gmra.mxu0 %v2100_v55 }
 0x154   : > { %11132 = vmatprep.mubr.msk.bf16.mxu0 %vm12101_vm0, %v14083_v0 }
 0x1da   : > { %v11034_v58 = vpop.f32.mrf.mxu0 }
 0x1db   : > { %v2335_v3 = vadd.f32 %v11034_v58, %v12411_v60 }
 0x1dc   : > { %v2199_v59 = vpop.f32.mrf.mxu0 }
 0x1dd   : > { %v2333_v62 = vadd.f32 %v12411_v60, %v2199_v59  ;;  %v2367_v10 = vmax.f32 %v2335_v3, 0.0 }
 0x1de   : > { %v11035_v61 = vpop.f32.mrf.mxu0 }
 0x1df   : > { %v2336_v1 = vadd.f32 %v11035_v61, %v12411_v60  ;;  %v2365_v4 = vmax.f32 %v2333_v62, 0.0  ;;  %v12473_v61 = vld [vmem:[%s12297_s1 + $0x20] sm:$0xff]  }
 0x1e0   : > { %v2202_v63 = vpop.f32.mrf.mxu0 }
 0x1e1   : > { %v2334_v2 = vadd.f32 %v12411_v60, %v2202_v63  ;;  %v2368_v7 = vmax.f32 %v2336_v1, 0.0 }
 0x1e3   : > { %v2366_v5 = vmax.f32 %v2334_v2, 0.0  ;;  %v11038_v6 = vpop.f32.mrf.mxu0  ;;  %v2398_v12 = vpack.c.bf16 %v2368_v7, %v2367_v10 }
 0x1e4   : > { %v2339_v22 = vadd.f32 %v11038_v6, %v12411_v60 }
 0x1e5   : > { %v2397_v8 = vpack.c.bf16 %v2366_v5, %v2365_v4  ;;  %v2215_v9 = vpop.f32.mrf.mxu0 }
 0x1e6   : > { %v2337_v16 = vadd.f32 %v12411_v60, %v2215_v9  ;;  %v2371_v28 = vmax.f32 %v2339_v22, 0.0 }
 0x1e7   : > { %v11039_v11 = vpop.f32.mrf.mxu0  ;;  %11065 = vmatpush3.bf16.msra.mxu1 %v2397_v8 }
 0x1e8   : > { %11070 = vmatprep.subr.bf16.mxu1 %v14083_v0  ;;  %v2369_v20 = vmax.f32 %v2337_v16, 0.0  ;;  %v2340_v23 = vadd.f32 %v11039_v11, %v12411_v60 }
 0x1e9   : > { %v2218_v13 = vpop.f32.mrf.mxu0 }
 0x1ea   : > { %v2338_v14 = vadd.f32 %v12411_v60, %v2218_v13  ;;  %11067 = vmatmul.mubr.msk.bf16.vlgmr.msra.gmra.mxu1 %vm1215_vm1, %v12420_v15  ;;  %v2372_v29 = vmax.f32 %v2340_v23, 0.0  ;;  %v12490_v13 = vld [vmem:[%s12297_s1 + $0x28] sm:$0xff]  }
 0x1eb   : > { %v11042_v17 = vpop.f32.mrf.mxu0  ;;  %11071 = vmatpush3.bf16.msra.mxu1 %v2398_v12  ;;  %11072 = vmatprep.mubr.msk.bf16.mxu1 %vm12101_vm0, %v14083_v0  ;;  %v12039_v12 = vld [vmem:[%s12328_s7 + $0x18] sm:$0xff]  }
 0x1ec   : > { %11076 = vmatprep.subr.bf16.mxu1 %v14083_v0  ;;  %v2370_v18 = vmax.f32 %v2338_v14, 0.0  ;;  %v2400_v32 = vpack.c.bf16 %v2372_v29, %v2371_v28  ;;  %v2343_v42 = vadd.f32 %v11042_v17, %v12411_v60  ;;  %v12041_v29 = vld [vmem:[%s12328_s7 + $0x28] sm:$0xff]  }
 0x1ed   : > { %v2231_v19 = vpop.f32.mrf.mxu0 }
 0x1ee   : > { %v2399_v24 = vpack.c.bf16 %v2370_v18, %v2369_v20  ;;  %v2341_v33 = vadd.f32 %v12411_v60, %v2231_v19  ;;  %v2375_v49 = vmax.f32 %v2343_v42, 0.0  ;;  %v12524_v42 = vld [vmem:[%s12297_s1 + $0x38] sm:$0xff]  }
 0x1ef   : > { %v11043_v21 = vpop.f32.mrf.mxu0 }
 0x1f0   : > { %v2373_v38 = vmax.f32 %v2341_v33, 0.0  ;;  %v2344_v43 = vadd.f32 %v11043_v21, %v12411_v60 }
 0x1f1   : > { %v2234_v25 = vpop.f32.mrf.mxu0 }
 0x1f2   : > { %11073 = vmatmul.mubr.msk.bf16.vlgmr.msra.gmra.mxu1 %vm1215_vm1, %v12431_v26  ;;  %v2342_v34 = vadd.f32 %v12411_v60, %v2234_v25  ;;  %v2376_v50 = vmax.f32 %v2344_v43, 0.0 }
 0x1f3   : > { %11077 = vmatpush3.bf16.msra.mxu1 %v2399_v24  ;;  %v11046_v27 = vpop.f32.mrf.mxu0  ;;  %11078 = vmatprep.mubr.msk.bf16.mxu1 %vm12101_vm0, %v14083_v0 }
 0x1f4   : > { %11082 = vmatprep.subr.bf16.mxu1 %v14083_v0  ;;  %v2374_v39 = vmax.f32 %v2342_v34, 0.0  ;;  %v2402_v55 = vpack.c.bf16 %v2376_v50, %v2375_v49  ;;  %v2347_v8 = vadd.f32 %v11046_v27, %v12411_v60 }
 0x1f5   : > { %v2247_v30 = vpop.f32.mrf.mxu0 }
 0x1f6   : > { %v2401_v44 = vpack.c.bf16 %v2374_v39, %v2373_v38  ;;  %v2345_v56 = vadd.f32 %v12411_v60, %v2247_v30  ;;  %v2379_v19 = vmax.f32 %v2347_v8, 0.0  ;;  %v12508_v30 = vld [vmem:[%s12297_s1 + $0x30] sm:$0xff]   ;;  %v11267_v8 = vld [vmem:[%s12156_s14 + $0x60] ss:$8 sps:$4 sm:$0xff]   ;;  %s14147_s1 = sld [smem:[#allocation7_spill]] }
 0x1f7   : > { %v11047_v31 = vpop.f32.mrf.mxu0 }
 0x1f8   : > { %v2377_v2 = vmax.f32 %v2345_v56, 0.0  ;;  %v2348_v9 = vadd.f32 %v11047_v31, %v12411_v60 }
 0x1f9   : > { %v2250_v35 = vpop.f32.mrf.mxu0 }
 0x1fa   : > { %11079 = vmatmul.mubr.msk.bf16.vlgmr.msra.gmra.mxu1 %vm1215_vm1, %v12441_v36  ;;  %v2346_v57 = vadd.f32 %v12411_v60, %v2250_v35  ;;  %v2380_v20 = vmax.f32 %v2348_v9, 0.0  ;;  %v11272_v9 = vld [vmem:[%s12156_s14 + $0x54] ss:$8 sps:$4 sm:$0xff]  }
 0x1fb   : > { %11083 = vmatpush3.bf16.msra.mxu1 %v2400_v32  ;;  %v12445_v37 = vpop.f32.mrf.mxu0  ;;  %11084 = vmatprep.mubr.msk.bf16.mxu1 %vm12101_vm0, %v14083_v0 }
 0x1fc   : > { %11088 = vmatprep.subr.bf16.mxu1 %v14083_v0  ;;  %v2378_v3 = vmax.f32 %v2346_v57, 0.0  ;;  %v2404_v25 = vpack.c.bf16 %v2380_v20, %v2379_v19  ;;  %v2351_v35 = vadd.f32 %v12445_v37, %v12411_v60  ;;  %v11284_v19 = vld [vmem:[%s12156_s14 + $0x14] ss:$8 sps:$4 sm:$0xff]   ;;  %v11282_v20 = vld [vmem:[%s12156_s14 + $0x10] ss:$8 sps:$4 sm:$0xff]  }
 0x1fd   : > { %v12450_v40 = vpop.f32.mrf.mxu0 }
 0x1fe   : > { %v2403_v10 = vpack.c.bf16 %v2378_v3, %v2377_v2  ;;  %v2349_v27 = vadd.f32 %v12411_v60, %v12450_v40  ;;  %v12043_v40 = vld [vmem:[%s12328_s7 + $0x38] sm:$0xff]   ;;  %v2383_v43 = vmax.f32 %v2351_v35, 0.0 }
 0x1ff   : > { %v12452_v41 = vpop.f32.mrf.mxu0 }
 0x200   : > { %v2381_v33 = vmax.f32 %v2349_v27, 0.0  ;;  %v2352_v38 = vadd.f32 %v12452_v41, %v12411_v60 }
 0x201   : > { %v2266_v45 = vpop.f32.mrf.mxu0 }
 0x202   : > { %11085 = vmatmul.mubr.msk.bf16.vlgmr.msra.gmra.mxu1 %vm1215_vm1, %v12457_v46  ;;  %v2350_v28 = vadd.f32 %v12411_v60, %v2266_v45  ;;  %v2384_v37 = vmax.f32 %v2352_v38, 0.0 }
 0x203   : > { %11089 = vmatpush3.bf16.msra.mxu1 %v2401_v44  ;;  %v11054_v47 = vpop.f32.mrf.mxu0  ;;  %11090 = vmatprep.mubr.msk.bf16.mxu1 %vm12101_vm0, %v14083_v0 }
 0x204   : > { %v2355_v48 = vadd.f32 %v11054_v47, %v12411_v60  ;;  %11094 = vmatprep.subr.bf16.mxu1 %v14083_v0  ;;  %v2382_v34 = vmax.f32 %v2350_v28, 0.0  ;;  %v2406_v44 = vpack.c.bf16 %v2384_v37, %v2383_v43  ;;  %v12536_v47 = vld [vmem:[%s12328_s7] sm:$0xff]  }
 0x205   : > { %v12465_v51 = vpop.f32.mrf.mxu0 }
 0x206   : > { %v2387_v53 = vmax.f32 %v2355_v48, 0.0  ;;  %v2405_v39 = vpack.c.bf16 %v2382_v34, %v2381_v33  ;;  %v2353_v41 = vadd.f32 %v12411_v60, %v12465_v51 }
 0x207   : > { %v11055_v52 = vpop.f32.mrf.mxu0 }
 0x208   : > { %v2356_v54 = vadd.f32 %v11055_v52, %v12411_v60  ;;  %v2385_v48 = vmax.f32 %v2353_v41, 0.0 }
 0x209   : > { %v12470_v58 = vpop.f32.mrf.mxu0 }
 0x20a   : > { %v2388_v59 = vmax.f32 %v2356_v54, 0.0  ;;  %11091 = vmatmul.mubr.msk.bf16.vlgmr.msra.gmra.mxu1 %vm1215_vm1, %v12473_v61  ;;  %v2354_v45 = vadd.f32 %v12411_v60, %v12470_v58  ;;  %v12549_v54 = vld [vmem:[%s12328_s7 + $0x8] sm:$0xff]  }
 0x20b   : > { %11095 = vmatpush3.bf16.msra.mxu1 %v2402_v55  ;;  %11096 = vmatprep.mubr.msk.bf16.mxu1 %vm12101_vm0, %v14083_v0  ;;  %v11058_v62 = vpop.f32.mrf.mxu0 }
 0x20c   : > { %v2408_v63 = vpack.c.bf16 %v2388_v59, %v2387_v53  ;;  %11100 = vmatprep.subr.bf16.mxu1 %v14083_v0  ;;  %v2359_v1 = vadd.f32 %v11058_v62, %v12411_v60  ;;  %v2386_v49 = vmax.f32 %v2354_v45, 0.0  ;;  %v14085_v53 = vmov 0  }
 0x20d   : > { %v12481_v4 = vpop.f32.mrf.mxu0  ;;  %11222 = vset.pattern.permute.xlu0 %v14085_v53  ;;  %11223 = vset.pattern.permute.xlu1 %v14085_v53 }
 0x20e   : > { %11131 = vmatpush3.bf16.msra.mxu0 %v2408_v63  ;;  %v2391_v6 = vmax.f32 %v2359_v1, 0.0  ;;  %v2357_v50 = vadd.f32 %v12411_v60, %v12481_v4  ;;  %v2407_v52 = vpack.c.bf16 %v2386_v49, %v2385_v48  ;;  %v12560_v63 = vld [vmem:[%s12328_s7 + $0x10] sm:$0xff]  }
 0x20f   : > { %v11059_v5 = vpop.f32.mrf.mxu0  ;;  %11142 = vmatprep.subr.bf16.mxu0 %v14083_v0  ;;  %v11266_v4 = vld [vmem:[%s12156_s14 + $0x74] ss:$8 sps:$4 sm:$0xff]  }
 0x210   : > { %v2360_v7 = vadd.f32 %v11059_v5, %v12411_v60  ;;  %v2389_v55 = vmax.f32 %v2357_v50, 0.0  ;;  %v11264_v5 = vld [vmem:[%s12156_s14 + $0x70] ss:$8 sps:$4 sm:$0xff]  }
 0x211   : > { %v2298_v11 = vpop.f32.mrf.mxu0  ;;  %11133 = vmatmul.mubr.msk.bf16.vlgmr.msra.gmra.mxu0 %vm1215_vm1, %v12039_v12  ;;  %v11273_v12 = vld [vmem:[%s12156_s14 + $0x40] ss:$8 sps:$4 sm:$0xff]  }
 0x212   : > { %11097 = vmatmul.mubr.msk.bf16.vlgmr.msra.gmra.mxu1 %vm1215_vm1, %v12490_v13  ;;  %v2392_v14 = vmax.f32 %v2360_v7, 0.0  ;;  %11144 = vmatprep.mubr.msk.bf16.mxu0 %vm12101_vm0, %v14083_v0  ;;  %v2358_v51 = vadd.f32 %v12411_v60, %v2298_v11  ;;  %v12578_v7 = vld [vmem:[%s12328_s7 + $0x30] sm:$0xff]   ;;  %v11275_v11 = vld [vmem:[%s12156_s14 + $0x44] ss:$8 sps:$4 sm:$0xff]  }
 0x213   : > { %11101 = vmatpush3.bf16.msra.mxu1 %v2403_v10  ;;  %11102 = vmatprep.mubr.msk.bf16.mxu1 %vm12101_vm0, %v14083_v0  ;;  %v11062_v16 = vpop.f32.mrf.mxu0  ;;  %v11270_v10 = vld [vmem:[%s12156_s14 + $0x50] ss:$8 sps:$4 sm:$0xff]  }
 0x214   : > { %11106 = vmatprep.subr.bf16.mxu1 %v14083_v0  ;;  %v2410_v17 = vpack.c.bf16 %v2392_v14, %v2391_v6  ;;  %v2363_v18 = vadd.f32 %v11062_v16, %v12411_v60  ;;  %v2390_v56 = vmax.f32 %v2358_v51, 0.0  ;;  %v11269_v6 = vld [vmem:[%s12156_s14 + $0x64] ss:$8 sps:$4 sm:$0xff]   ;;  %v11278_v14 = vld [vmem:[%s12156_s14 + $0x34] ss:$8 sps:$4 sm:$0xff]  }
 0x215   : > { %v2311_v21 = vpop.f32.mrf.mxu0  ;;  %v11276_v16 = vld [vmem:[%s12156_s14 + $0x30] ss:$8 sps:$4 sm:$0xff]  }
 0x216   : > { %11143 = vmatpush3.bf16.msra.mxu0 %v2410_v17  ;;  %v2395_v23 = vmax.f32 %v2363_v18, 0.0  ;;  %v2409_v58 = vpack.c.bf16 %v2390_v56, %v2389_v55  ;;  %v2361_v59 = vadd.f32 %v12411_v60, %v2311_v21  ;;  %v11281_v17 = vld [vmem:[%s12156_s14 + $0x24] ss:$8 sps:$4 sm:$0xff]   ;;  %v11279_v18 = vld [vmem:[%s12156_s14 + $0x20] ss:$8 sps:$4 sm:$0xff]  }
 0x217   : > { %v11063_v22 = vpop.f32.mrf.mxu0  ;;  %11154 = vmatprep.subr.bf16.mxu0 %v14083_v0  ;;  %v11287_v21 = vld [vmem:[%s12156_s14 + $0x4] ss:$8 sps:$4 sm:$0xff]  }
 0x218   : > { %v2364_v24 = vadd.f32 %v11063_v22, %v12411_v60  ;;  %v2393_v1 = vmax.f32 %v2361_v59, 0.0  ;;  %v11285_v22 = vld [vmem:[%s12156_s14] ss:$8 sps:$4 sm:$0xff]  }
 0x219   : > { %11145 = vmatmul.mubr.msk.bf16.vlgmr.msra.gmra.mxu0 %vm1215_vm1, %v12041_v29  ;;  %v2314_v57 = vpop.f32.mrf.mxu0 }
 0x21a   : > { %11103 = vmatmul.mubr.msk.bf16.vlgmr.msra.gmra.mxu1 %vm1215_vm1, %v12508_v30  ;;  %v2396_v31 = vmax.f32 %v2364_v24, 0.0  ;;  %11156 = vmatprep.mubr.msk.bf16.mxu0 %vm12101_vm0, %v14083_v0  ;;  %v2362_v62 = vadd.f32 %v12411_v60, %v2314_v57  ;;  %v12569_v60 = vld [vmem:[%s12328_s7 + $0x20] sm:$0xff]  }
 0x21b   : > { %11107 = vmatpush3.bf16.msra.mxu1 %v2404_v25  ;;  %11108 = vmatprep.mubr.msk.bf16.mxu1 %vm12101_vm0, %v14083_v0 }
 0x21c   : > { %11112 = vmatprep.subr.bf16.mxu1 %v14083_v0  ;;  %v2412_v32 = vpack.c.bf16 %v2396_v31, %v2395_v23  ;;  %v2394_v2 = vmax.f32 %v2362_v62, 0.0 }
 0x21e   : > { %11155 = vmatpush3.bf16.msra.mxu0 %v2412_v32  ;;  %v2411_v3 = vpack.c.bf16 %v2394_v2, %v2393_v1 }
 0x221   : > { %11157 = vmatmul.mubr.msk.bf16.vlgmr.msra.gmra.mxu0 %vm1215_vm1, %v12043_v40 }
 0x222   : > { %11109 = vmatmul.mubr.msk.bf16.vlgmr.msra.gmra.mxu1 %vm1215_vm1, %v12524_v42  ;;  %3578 = vmatprep.mubr.bf16.mxu0 %v14085_v53 }
 0x223   : > { %11113 = vmatpush3.bf16.msra.mxu1 %v2405_v39  ;;  %11114 = vmatprep.mubr.msk.bf16.mxu1 %vm12101_vm0, %v14083_v0 }
 0x224   : > { %11118 = vmatprep.subr.bf16.mxu1 %v14083_v0 }
 0x22a   : > { %11115 = vmatmul.mubr.msk.bf16.vlgmr.msra.gmra.mxu1 %vm1215_vm1, %v12536_v47 }
 0x22b   : > { %11119 = vmatpush3.bf16.msra.mxu1 %v2406_v44  ;;  %11120 = vmatprep.mubr.msk.bf16.mxu1 %vm12101_vm0, %v14083_v0 }
 0x22c   : > { %11124 = vmatprep.subr.bf16.mxu1 %v14083_v0 }
 0x232   : > { %11121 = vmatmul.mubr.msk.bf16.vlgmr.msra.gmra.mxu1 %vm1215_vm1, %v12549_v54 }
 0x233   : > { %11125 = vmatpush3.bf16.msra.mxu1 %v2407_v52  ;;  %11126 = vmatprep.mubr.msk.bf16.mxu1 %vm12101_vm0, %v14083_v0 }
 0x234   : > { %11136 = vmatprep.subr.bf16.mxu1 %v14083_v0 }
 0x23a   : > { %11127 = vmatmul.mubr.msk.bf16.vlgmr.msra.gmra.mxu1 %vm1215_vm1, %v12560_v63 }
 0x23b   : > { %11137 = vmatpush3.bf16.msra.mxu1 %v2409_v58  ;;  %11138 = vmatprep.mubr.msk.bf16.mxu1 %vm12101_vm0, %v14083_v0 }
 0x23c   : > { %11148 = vmatprep.subr.bf16.mxu1 %v14083_v0 }
 0x242   : > { %11139 = vmatmul.mubr.msk.bf16.vlgmr.msra.gmra.mxu1 %vm1215_vm1, %v12569_v60 }
 0x243   : > { %11149 = vmatpush3.bf16.msra.mxu1 %v2411_v3  ;;  %11150 = vmatprep.mubr.msk.bf16.mxu1 %vm12101_vm0, %v14083_v0 }
 0x244   : > { %3181 = vmatprep.subr.bf16.mxu1 %v11266_v4 }
 0x24a   : > { %11151 = vmatmul.mubr.msk.bf16.vlgmr.msra.gmra.mxu1 %vm1215_vm1, %v12578_v7 }
 0x24b   : > { %3182 = vmatpush1.bf16.msra.mxu1 %v11264_v5  ;;  %3213 = vmatprep.mubr.bf16.mxu1 %v14085_v53 }
 0x24c   : > { %3183 = vmatprep.subr.bf16.mxu1 %v11269_v6 }
 0x24f   : > { %3184 = vmatpush1.bf16.msra.mxu1 %v11267_v8 }
 0x250   : > { %3185 = vmatprep.subr.bf16.mxu1 %v11272_v9 }
 0x253   : > { %3186 = vmatpush1.bf16.msra.mxu1 %v11270_v10 }
 0x254   : > { %3187 = vmatprep.subr.bf16.mxu1 %v11275_v11 }
 0x257   : > { %3188 = vmatpush1.bf16.msra.mxu1 %v11273_v12 }
 0x258   : > { %3189 = vmatprep.subr.bf16.mxu1 %v11278_v14 }
 0x25b   : > { %3190 = vmatpush1.bf16.msra.mxu1 %v11276_v16 }
 0x25c   : > { %3191 = vmatprep.subr.bf16.mxu1 %v11281_v17 }
 0x25f   : > { %3192 = vmatpush1.bf16.msra.mxu1 %v11279_v18 }
 0x260   : > { %3193 = vmatprep.subr.bf16.mxu1 %v11284_v19 }
 0x263   : > { %3194 = vmatpush1.bf16.msra.mxu1 %v11282_v20 }
 0x264   : > { %3195 = vmatprep.subr.bf16.mxu1 %v11287_v21 }
 0x267   : > { %3196 = vmatpush1.bf16.msra.mxu1 %v11285_v22 }
 0x2aa   : > { %v2447_v23 = vpop.f32.mrf.mxu1 }
 0x2ac   : > { %v11068_v24 = vpop.f32.mrf.mxu1 }
 0x2ae   : > { %v2450_v25 = vpop.f32.mrf.mxu1 }
 0x2af   : > { %v3069_v27 = vpack.c.bf16 %v2450_v25, %v2447_v23 }
 0x2b0   : > { %v11069_v28 = vpop.f32.mrf.mxu1 }
 0x2b1   : > { %3214 = vmatmul.mubr.bf16.vlgmr.msra.gmra.mxu1 %v3069_v27 }
 0x2b2   : > { %v2488_v29 = vpop.f32.mrf.mxu1  ;;  %3223 = vmatprep.mubr.bf16.mxu1 %v14085_v53 }
 0x2b4   : > { %v11074_v31 = vpop.f32.mrf.mxu1 }
 0x2b6   : > { %v2491_v32 = vpop.f32.mrf.mxu1 }
 0x2b7   : > { %v3070_v33 = vpack.c.bf16 %v2491_v32, %v2488_v29 }
 0x2b8   : > { %v11075_v34 = vpop.f32.mrf.mxu1 }
 0x2b9   : > { %3224 = vmatmul.mubr.bf16.gmra.mxu1 %v3070_v33 }
 0x2ba   : > { %v2529_v35 = vpop.f32.mrf.mxu1  ;;  %3233 = vmatprep.mubr.bf16.mxu1 %v14085_v53 }
 0x2bc   : > { %v11080_v38 = vpop.f32.mrf.mxu1 }
 0x2be   : > { %v2532_v39 = vpop.f32.mrf.mxu1 }
 0x2bf   : > { %v3071_v40 = vpack.c.bf16 %v2532_v39, %v2529_v35 }
 0x2c0   : > { %v11081_v43 = vpop.f32.mrf.mxu1 }
 0x2c1   : > { %3234 = vmatmul.mubr.bf16.gmra.mxu1 %v3071_v40 }
 0x2c2   : > { %v2570_v37 = vpop.f32.mrf.mxu1  ;;  %3243 = vmatprep.mubr.bf16.mxu1 %v14085_v53 }
 0x2c4   : > { %v11086_v44 = vpop.f32.mrf.mxu1 }
 0x2c6   : > { %v2573_v41 = vpop.f32.mrf.mxu1 }
 0x2c7   : > { %v3072_v45 = vpack.c.bf16 %v2573_v41, %v2570_v37 }
 0x2c8   : > { %v11087_v48 = vpop.f32.mrf.mxu1 }
 0x2c9   : > { %3244 = vmatmul.mubr.bf16.gmra.mxu1 %v3072_v45 }
 0x2ca   : > { %v2611_v49 = vpop.f32.mrf.mxu1  ;;  %3253 = vmatprep.mubr.bf16.mxu1 %v14085_v53 }
 0x2cc   : > { %v11092_v50 = vpop.f32.mrf.mxu1 }
 0x2ce   : > { %v2614_v51 = vpop.f32.mrf.mxu1 }
 0x2cf   : > { %v3073_v52 = vpack.c.bf16 %v2614_v51, %v2611_v49 }
 0x2d0   : > { %v11093_v55 = vpop.f32.mrf.mxu1 }
 0x2d1   : > { %3254 = vmatmul.mubr.bf16.gmra.mxu1 %v3073_v52  ;;  %v2898_v56 = vpop.f32.mrf.mxu0 }
 0x2d2   : > { %v2652_v57 = vpop.f32.mrf.mxu1  ;;  %3263 = vmatprep.mubr.bf16.mxu1 %v14085_v53 }
 0x2d3   : > { %v11134_v58 = vpop.f32.mrf.mxu0 }
 0x2d4   : > { %v11098_v59 = vpop.f32.mrf.mxu1 }
 0x2d5   : > { %v2901_v62 = vpop.f32.mrf.mxu0 }
 0x2d6   : > { %v2655_v1 = vpop.f32.mrf.mxu1  ;;  %v3080_v51 = vpack.c.bf16 %v2901_v62, %v2898_v56  ;;  %v11288_v62 = vld [vmem:[%s12166_s24 + $0xa8] ss:$12 sps:$4 sm:$0xff]  }
 0x2d7   : > { %v3074_v2 = vpack.c.bf16 %v2655_v1, %v2652_v57  ;;  %v11135_v3 = vpop.f32.mrf.mxu0 }
 0x2d8   : > { %v11099_v4 = vpop.f32.mrf.mxu1  ;;  %v11290_v3 = vld [vmem:[%s12166_s24 + $0xac] ss:$12 sps:$4 sm:$0xff]  }
 0x2d9   : > { %3264 = vmatmul.mubr.bf16.gmra.mxu1 %v3074_v2  ;;  %v2980_v5 = vpop.f32.mrf.mxu0  ;;  %4586 = vmatprep.subr.bf16.mxu1 %v11290_v3  ;;  %v11291_v4 = vld [vmem:[%s12166_s24 + $0x90] ss:$12 sps:$4 sm:$0xff]   ;;  %v11309_v3 = vld [vmem:[%s12166_s24] ss:$12 sps:$4 sm:$0xff]  }
 0x2da   : > { %v2693_v6 = vpop.f32.mrf.mxu1  ;;  %3273 = vmatprep.mubr.bf16.mxu1 %v14085_v53  ;;  %4587 = vmatpush1.bf16.msra.mxu1 %v11288_v62 }
 0x2db   : > { %v11146_v8 = vpop.f32.mrf.mxu0 }
 0x2dc   : > { %v11104_v9 = vpop.f32.mrf.mxu1 }
 0x2dd   : > { %v2983_v10 = vpop.f32.mrf.mxu0  ;;  %v11294_v9 = vld [vmem:[%s12166_s24 + $0x78] ss:$12 sps:$4 sm:$0xff]  }
 0x2de   : > { %v2696_v11 = vpop.f32.mrf.mxu1  ;;  %v3082_v2 = vpack.c.bf16 %v2983_v10, %v2980_v5  ;;  %v3376_v5 = vlaneseq  ;;  %v11296_v10 = vld [vmem:[%s12166_s24 + $0x7c] ss:$12 sps:$4 sm:$0xff]  }
 0x2df   : > { %v3075_v12 = vpack.c.bf16 %v2696_v11, %v2693_v6  ;;  %v11147_v14 = vpop.f32.mrf.mxu0  ;;  %v11293_v6 = vld [vmem:[%s12166_s24 + $0x94] ss:$12 sps:$4 sm:$0xff]  }
 0x2e0   : > { %v11105_v16 = vpop.f32.mrf.mxu1  ;;  %4588 = vmatprep.subr.bf16.mxu1 %v11293_v6  ;;  %v12615_v8 = vshrl.u32 %v3376_v5, 7  ;;  %v3374_v14 = vld [vmem:[%s12161_s19] sm:$0x3]  ;;  %v11314_v6 = vld [vmem:[%s12166_s24 + $0x16c] ss:$12 sps:$4 sm:$0xff]  }
 0x2e1   : > { %3274 = vmatmul.mubr.bf16.gmra.mxu1 %v3075_v12  ;;  %v3062_v17 = vpop.f32.mrf.mxu0 }
 0x2e2   : > { %v2734_v18 = vpop.f32.mrf.mxu1  ;;  %3283 = vmatprep.mubr.bf16.mxu1 %v14085_v53  ;;  %4589 = vmatpush1.bf16.msra.mxu1 %v11291_v4  ;;  %14116 = vst [vmem:[#allocation16_spill] sm:$0xff] %v12615_v8  ;;  %v12620_v11 = vsub.s32 1, %v12615_v8  ;;  %v12623_v12 = vsub.s32 0, %v12615_v8 }
 0x2e3   : > { %v11158_v19 = vpop.f32.mrf.mxu0  ;;  %4590 = vmatprep.subr.bf16.mxu1 %v11296_v10 }
 0x2e4   : > { %v11110_v20 = vpop.f32.mrf.mxu1  ;;  %14117 = vst [vmem:[#allocation17_spill] sm:$0xff] %v12620_v11  ;;  %14118 = vst [vmem:[#allocation18_spill] sm:$0xff] %v12623_v12 }
 0x2e5   : > { %v3065_v21 = vpop.f32.mrf.mxu0  ;;  %v11297_v20 = vld [vmem:[%s12166_s24 + $0x60] ss:$12 sps:$4 sm:$0xff]  }
 0x2e6   : > { %v2737_v22 = vpop.f32.mrf.mxu1  ;;  %v3084_v23 = vpack.c.bf16 %v3065_v21, %v3062_v17  ;;  %4591 = vmatpush1.bf16.msra.mxu1 %v11294_v9  ;;  %v12627_v17 = vrot.slane %v3374_v14, %v12620_v11  ;;  %v11299_v21 = vld [vmem:[%s12166_s24 + $0x64] ss:$12 sps:$4 sm:$0xff]  }
 0x2e7   : > { %v3076_v24 = vpack.c.bf16 %v2737_v22, %v2734_v18  ;;  %v11159_v25 = vpop.f32.mrf.mxu0  ;;  %v12630_v18 = vrot.slane %v3374_v14, %v12623_v12  ;;  %4592 = vmatprep.subr.bf16.mxu1 %v11299_v21  ;;  %v11317_v21 = vld [vmem:[%s12166_s24 + $0x154] ss:$12 sps:$4 sm:$0xff]  }
 0x2e8   : > { %v11111_v27 = vpop.f32.mrf.mxu1 }
 0x2e9   : > { %3284 = vmatmul.mubr.bf16.gmra.mxu1 %v3076_v24 }
 0x2ea   : > { %v2775_v28 = vpop.f32.mrf.mxu1  ;;  %3293 = vmatprep.mubr.bf16.mxu1 %v14085_v53  ;;  %4593 = vmatpush1.bf16.msra.mxu1 %v11297_v20 }
 0x2ec   : > { %v11116_v29 = vpop.f32.mrf.mxu1 }
 0x2ed   : > { %v11302_v29 = vld [vmem:[%s12166_s24 + $0x4c] ss:$12 sps:$4 sm:$0xff]  }
 0x2ee   : > { %v2778_v31 = vpop.f32.mrf.mxu1  ;;  %4594 = vmatprep.subr.bf16.mxu1 %v11302_v29  ;;  %v11315_v29 = vld [vmem:[%s12166_s24 + $0x150] ss:$12 sps:$4 sm:$0xff]  }
 0x2ef   : > { %v3077_v32 = vpack.c.bf16 %v2778_v31, %v2775_v28  ;;  %v11300_v28 = vld [vmem:[%s12166_s24 + $0x48] ss:$12 sps:$4 sm:$0xff]  }
 0x2f0   : > { %v11117_v33 = vpop.f32.mrf.mxu1  ;;  %4595 = vmatpush1.bf16.msra.mxu1 %v11300_v28 }
 0x2f1   : > { %3294 = vmatmul.mubr.bf16.gmra.mxu1 %v3077_v32 }
 0x2f2   : > { %v2816_v34 = vpop.f32.mrf.mxu1  ;;  %3303 = vmatprep.mubr.bf16.mxu1 %v14085_v53 }
 0x2f4   : > { %v11122_v35 = vpop.f32.mrf.mxu1 }
 0x2f6   : > { %v2819_v38 = vpop.f32.mrf.mxu1 }
 0x2f7   : > { %v3078_v39 = vpack.c.bf16 %v2819_v38, %v2816_v34  ;;  %v11305_v38 = vld [vmem:[%s12166_s24 + $0x34] ss:$12 sps:$4 sm:$0xff]  }
 0x2f8   : > { %v11123_v40 = vpop.f32.mrf.mxu1  ;;  %4596 = vmatprep.subr.bf16.mxu1 %v11305_v38 }
 0x2f9   : > { %3304 = vmatmul.mubr.bf16.gmra.mxu1 %v3078_v39 }
 0x2fa   : > { %v2857_v43 = vpop.f32.mrf.mxu1  ;;  %3313 = vmatprep.mubr.bf16.mxu1 %v14085_v53 }
 0x2fc   : > { %v11128_v37 = vpop.f32.mrf.mxu1 }
 0x2fe   : > { %v2860_v44 = vpop.f32.mrf.mxu1 }
 0x2ff   : > { %v3079_v41 = vpack.c.bf16 %v2860_v44, %v2857_v43  ;;  %v11303_v43 = vld [vmem:[%s12166_s24 + $0x30] ss:$12 sps:$4 sm:$0xff]  }
 0x300   : > { %v11129_v45 = vpop.f32.mrf.mxu1  ;;  %v11308_v44 = vld [vmem:[%s12166_s24 + $0x1c] ss:$12 sps:$4 sm:$0xff]   ;;  %4597 = vmatpush1.bf16.msra.mxu1 %v11303_v43 }
 0x301   : > { %3314 = vmatmul.mubr.bf16.gmra.mxu1 %v3079_v41  ;;  %4598 = vmatprep.subr.bf16.mxu1 %v11308_v44 }
 0x302   : > { %3323 = vmatprep.mubr.bf16.mxu1 %v14085_v53  ;;  %v2939_v48 = vpop.f32.mrf.mxu1 }
 0x304   : > { %v11140_v49 = vpop.f32.mrf.mxu1 }
 0x306   : > { %v2942_v50 = vpop.f32.mrf.mxu1 }
 0x307   : > { %v3081_v59 = vpack.c.bf16 %v2942_v50, %v2939_v48 }
 0x308   : > { %v11141_v52 = vpop.f32.mrf.mxu1 }
 0x309   : > { %3324 = vmatmul.mubr.bf16.gmra.mxu1 %v3080_v51  ;;  %v11306_v52 = vld [vmem:[%s12166_s24 + $0x18] ss:$12 sps:$4 sm:$0xff]  }
 0x30a   : > { %3333 = vmatprep.mubr.bf16.mxu1 %v14085_v53  ;;  %v3021_v55 = vpop.f32.mrf.mxu1  ;;  %4599 = vmatpush1.bf16.msra.mxu1 %v11306_v52 }
 0x30c   : > { %v11152_v57 = vpop.f32.mrf.mxu1 }
 0x30d   : > { %v11311_v57 = vld [vmem:[%s12166_s24 + $0x4] ss:$12 sps:$4 sm:$0xff]  }
 0x30e   : > { %v3024_v58 = vpop.f32.mrf.mxu1  ;;  %4600 = vmatprep.subr.bf16.mxu1 %v11311_v57 }
 0x30f   : > { %v3083_v56 = vpack.c.bf16 %v3024_v58, %v3021_v55  ;;  %4601 = vmatpush1.bf16.msra.mxu1 %v11309_v3  ;;  %v11339_v3 = vld [vmem:[%s12166_s24 + $0xf4] ss:$12 sps:$4 sm:$0xff]  }
 0x310   : > { %v11153_v1 = vpop.f32.mrf.mxu1  ;;  %4602 = vmatprep.subr.bf16.mxu1 %v11314_v6 }
 0x311   : > { %3334 = vmatmul.mubr.bf16.gmra.mxu1 %v3081_v59 }
 0x312   : > { %3343 = vmatprep.mubr.bf16.mxu1 %v14085_v53 }
 0x319   : > { %3344 = vmatmul.mubr.bf16.gmra.mxu1 %v3082_v2 }
 0x31a   : > { %3353 = vmatprep.mubr.bf16.mxu1 %v14085_v53 }
 0x321   : > { %3354 = vmatmul.mubr.bf16.gmra.mxu1 %v3083_v56 }
 0x322   : > { %3363 = vmatprep.mubr.bf16.mxu1 %v14085_v53 }
 0x329   : > { %3364 = vmatmul.mubr.bf16.gmra.mxu1 %v3084_v23 }
 0x371   : > { %v3215_v16 = vpop.f32.mrf.mxu1 }
 0x372   : > { %v3386_v25 = vadd.f32 %v12630_v18, %v3215_v16 }
 0x373   : > { %v3217_v19 = vpop.f32.mrf.mxu1 }
 0x374   : > { %v3387_v23 = vadd.f32 %v12627_v17, %v3217_v19  ;;  %v3450_v39 = vmax.f32 %v3386_v25, 0.0  ;;  %v11312_v19 = vld [vmem:[%s12166_s24 + $0x168] ss:$12 sps:$4 sm:$0xff]  }
 0x375   : > { %v3219_v22 = vpop.f32.mrf.mxu1  ;;  %4603 = vmatpush2.bf16.msra.mxu1 %v11312_v19 }
 0x376   : > { %v3388_v24 = vadd.f32 %v12630_v18, %v3219_v22  ;;  %v3451_v34 = vmax.f32 %v3387_v23, 0.0  ;;  %4604 = vmatprep.subr.bf16.mxu1 %v11317_v21 }
 0x377   : > { %v3221_v27 = vpop.f32.mrf.mxu1 }
 0x378   : > { %v3389_v31 = vadd.f32 %v12627_v17, %v3221_v27  ;;  %v3452_v32 = vmax.f32 %v3388_v24, 0.0 }
 0x379   : > { %v3225_v33 = vpop.f32.mrf.mxu1  ;;  %4605 = vmatpush2.bf16.msra.mxu1 %v11315_v29 }
 0x37a   : > { %v3453_v35 = vmax.f32 %v3389_v31, 0.0  ;;  %v3514_v41 = vpack.c.bf16 %v3452_v32, %v3450_v39  ;;  %v3390_v50 = vadd.f32 %v12630_v18, %v3225_v33  ;;  %v11320_v32 = vld [vmem:[%s12166_s24 + $0x13c] ss:$12 sps:$4 sm:$0xff]  }
 0x37b   : > { %v3227_v40 = vpop.f32.mrf.mxu1  ;;  %4606 = vmatprep.subr.bf16.mxu1 %v11320_v32 }
 0x37c   : > { %v3515_v37 = vpack.c.bf16 %v3453_v35, %v3451_v34  ;;  %v3391_v48 = vadd.f32 %v12627_v17, %v3227_v40  ;;  %v3454_v56 = vmax.f32 %v3390_v50, 0.0  ;;  %v11318_v40 = vld [vmem:[%s12166_s24 + $0x138] ss:$12 sps:$4 sm:$0xff]  }
 0x37d   : > { %v3229_v45 = vpop.f32.mrf.mxu1  ;;  %4607 = vmatpush2.bf16.msra.mxu1 %v11318_v40 }
 0x37e   : > { %v3392_v49 = vadd.f32 %v12630_v18, %v3229_v45  ;;  %3560 = vmatprep.subr.bf16.mxu0 %v3515_v37  ;;  %v3455_v1 = vmax.f32 %v3391_v48, 0.0  ;;  %v11325_v37 = vld [vmem:[%s12166_s24 + $0x124] ss:$12 sps:$4 sm:$0xff]  }
 0x37f   : > { %v3231_v51 = vpop.f32.mrf.mxu1  ;;  %3561 = vmatpush1.bf16.msra.mxu0 %v3514_v41  ;;  %4608 = vmatprep.subr.bf16.mxu1 %v11325_v37 }
 0x380   : > { %v3393_v55 = vadd.f32 %v12627_v17, %v3231_v51  ;;  %v3456_v58 = vmax.f32 %v3392_v49, 0.0  ;;  %v11323_v51 = vld [vmem:[%s12166_s24 + $0x120] ss:$12 sps:$4 sm:$0xff]  }
 0x381   : > { %v3235_v59 = vpop.f32.mrf.mxu1  ;;  %4609 = vmatpush2.bf16.msra.mxu1 %v11323_v51 }
 0x382   : > { %v3457_v2 = vmax.f32 %v3393_v55, 0.0  ;;  %10096 = vmatmul.mubr.msk.bf16.vlgmr.msra.gmra.mxu0 %vm1215_vm1, %v12420_v15  ;;  %v3516_v5 = vpack.c.bf16 %v3456_v58, %v3454_v56  ;;  %v3394_v15 = vadd.f32 %v12630_v18, %v3235_v59  ;;  %v11332_v55 = vld [vmem:[%s12166_s24 + $0x10c] ss:$12 sps:$4 sm:$0xff]   ;;  %v11330_v56 = vld [vmem:[%s12166_s24 + $0x108] ss:$12 sps:$4 sm:$0xff]  }
 0x383   : > { %v3237_v62 = vpop.f32.mrf.mxu1  ;;  %3621 = vmatprep.mubr.bf16.mxu0 %v14085_v53  ;;  %4610 = vmatprep.subr.bf16.mxu1 %v11332_v55 }
 0x384   : > { %v3517_v4 = vpack.c.bf16 %v3457_v2, %v3455_v1  ;;  %v3395_v10 = vadd.f32 %v12627_v17, %v3237_v62  ;;  %v3458_v27 = vmax.f32 %v3394_v15, 0.0  ;;  %v11337_v15 = vld [vmem:[%s12166_s24 + $0xf0] ss:$12 sps:$4 sm:$0xff]  }
 0x385   : > { %v3239_v9 = vpop.f32.mrf.mxu1  ;;  %4611 = vmatpush2.bf16.msra.mxu1 %v11330_v56 }
 0x386   : > { %v3396_v14 = vadd.f32 %v12630_v18, %v3239_v9  ;;  %3603 = vmatprep.subr.bf16.mxu0 %v3517_v4  ;;  %v3459_v24 = vmax.f32 %v3395_v10, 0.0  ;;  %4612 = vmatprep.subr.bf16.mxu1 %v11339_v3 }
 0x387   : > { %v3241_v16 = vpop.f32.mrf.mxu1  ;;  %3604 = vmatpush1.bf16.msra.mxu0 %v3516_v5 }
 0x388   : > { %v3397_v20 = vadd.f32 %v12627_v17, %v3241_v16  ;;  %v3460_v22 = vmax.f32 %v3396_v14, 0.0 }
 0x389   : > { %v3245_v23 = vpop.f32.mrf.mxu1  ;;  %4613 = vmatpush2.bf16.msra.mxu1 %v11337_v15 }
 0x38a   : > { %v3461_v25 = vmax.f32 %v3397_v20, 0.0  ;;  %10097 = vmatmul.mubr.msk.bf16.vlgmr.msra.gmra.mxu0 %vm1215_vm1, %v12431_v26  ;;  %v3518_v33 = vpack.c.bf16 %v3460_v22, %v3458_v27  ;;  %v3398_v26 = vadd.f32 %v12630_v18, %v3245_v23 }
 0x38b   : > { %v3247_v28 = vpop.f32.mrf.mxu1  ;;  %3664 = vmatprep.mubr.bf16.mxu0 %v14085_v53 }
 0x38c   : > { %v3519_v31 = vpack.c.bf16 %v3461_v25, %v3459_v24  ;;  %v3399_v35 = vadd.f32 %v12627_v17, %v3247_v28  ;;  %v3462_v49 = vmax.f32 %v3398_v26, 0.0 }
 0x38d   : > { %v3249_v34 = vpop.f32.mrf.mxu1 }
 0x38e   : > { %v3400_v38 = vadd.f32 %v12630_v18, %v3249_v34  ;;  %3646 = vmatprep.subr.bf16.mxu0 %v3519_v31  ;;  %v3463_v45 = vmax.f32 %v3399_v35, 0.0 }
 0x38f   : > { %v3251_v39 = vpop.f32.mrf.mxu1  ;;  %3647 = vmatpush1.bf16.msra.mxu0 %v3518_v33 }
 0x390   : > { %v3401_v43 = vadd.f32 %v12627_v17, %v3251_v39  ;;  %v3464_v44 = vmax.f32 %v3400_v38, 0.0 }
 0x391   : > { %v3255_v41 = vpop.f32.mrf.mxu1 }
 0x392   : > { %v3465_v48 = vmax.f32 %v3401_v43, 0.0  ;;  %10098 = vmatmul.mubr.msk.bf16.vlgmr.msra.gmra.mxu0 %vm1215_vm1, %v12441_v36  ;;  %v3520_v57 = vpack.c.bf16 %v3464_v44, %v3462_v49  ;;  %v3402_v36 = vadd.f32 %v12630_v18, %v3255_v41 }
 0x393   : > { %v3257_v50 = vpop.f32.mrf.mxu1  ;;  %3707 = vmatprep.mubr.bf16.mxu0 %v14085_v53 }
 0x394   : > { %v3521_v52 = vpack.c.bf16 %v3465_v48, %v3463_v45  ;;  %v3403_v59 = vadd.f32 %v12627_v17, %v3257_v50  ;;  %v3466_v10 = vmax.f32 %v3402_v36, 0.0 }
 0x395   : > { %v3259_v58 = vpop.f32.mrf.mxu1 }
 0x396   : > { %v3404_v1 = vadd.f32 %v12630_v18, %v3259_v58  ;;  %3689 = vmatprep.subr.bf16.mxu0 %v3521_v52  ;;  %v3467_v5 = vmax.f32 %v3403_v59, 0.0 }
 0x397   : > { %v3261_v2 = vpop.f32.mrf.mxu1  ;;  %3690 = vmatpush1.bf16.msra.mxu0 %v3520_v57 }
 0x398   : > { %v3405_v62 = vadd.f32 %v12627_v17, %v3261_v2  ;;  %v3468_v4 = vmax.f32 %v3404_v1, 0.0 }
 0x399   : > { %v3265_v6 = vpop.f32.mrf.mxu1 }
 0x39a   : > { %v3469_v9 = vmax.f32 %v3405_v62, 0.0  ;;  %10099 = vmatmul.mubr.msk.bf16.vlgmr.msra.gmra.mxu0 %vm1215_vm1, %v12457_v46  ;;  %v3522_v19 = vpack.c.bf16 %v3468_v4, %v3466_v10  ;;  %v3406_v23 = vadd.f32 %v12630_v18, %v3265_v6 }
 0x39b   : > { %v3267_v14 = vpop.f32.mrf.mxu1  ;;  %3750 = vmatprep.mubr.bf16.mxu0 %v14085_v53 }
 0x39c   : > { %v3523_v16 = vpack.c.bf16 %v3469_v9, %v3467_v5  ;;  %v3407_v21 = vadd.f32 %v12627_v17, %v3267_v14  ;;  %v3470_v31 = vmax.f32 %v3406_v23, 0.0 }
 0x39d   : > { %v3269_v20 = vpop.f32.mrf.mxu1 }
 0x39e   : > { %v3408_v22 = vadd.f32 %v12630_v18, %v3269_v20  ;;  %3732 = vmatprep.subr.bf16.mxu0 %v3523_v16  ;;  %v3471_v28 = vmax.f32 %v3407_v21, 0.0 }
 0x39f   : > { %v3271_v24 = vpop.f32.mrf.mxu1  ;;  %3733 = vmatpush1.bf16.msra.mxu0 %v3522_v19 }
 0x3a0   : > { %v3409_v46 = vadd.f32 %v12627_v17, %v3271_v24  ;;  %v3472_v25 = vmax.f32 %v3408_v22, 0.0 }
 0x3a1   : > { %v3275_v27 = vpop.f32.mrf.mxu1 }
 0x3a2   : > { %v3473_v29 = vmax.f32 %v3409_v46, 0.0  ;;  %10100 = vmatmul.mubr.msk.bf16.vlgmr.msra.gmra.mxu0 %vm1215_vm1, %v12473_v61  ;;  %v3524_v34 = vpack.c.bf16 %v3472_v25, %v3470_v31  ;;  %v3410_v39 = vadd.f32 %v12630_v18, %v3275_v27 }
 0x3a3   : > { %v3277_v32 = vpop.f32.mrf.mxu1  ;;  %3793 = vmatprep.mubr.bf16.mxu0 %v14085_v53 }
 0x3a4   : > { %v3525_v33 = vpack.c.bf16 %v3473_v29, %v3471_v28  ;;  %v3411_v38 = vadd.f32 %v12627_v17, %v3277_v32  ;;  %v3474_v45 = vmax.f32 %v3410_v39, 0.0 }
 0x3a5   : > { %v3279_v35 = vpop.f32.mrf.mxu1 }
 0x3a6   : > { %v3412_v26 = vadd.f32 %v12630_v18, %v3279_v35  ;;  %3775 = vmatprep.subr.bf16.mxu0 %v3525_v33  ;;  %v3475_v44 = vmax.f32 %v3411_v38, 0.0 }
 0x3a7   : > { %v3281_v40 = vpop.f32.mrf.mxu1  ;;  %3776 = vmatpush1.bf16.msra.mxu0 %v3524_v34 }
 0x3a8   : > { %v3413_v43 = vadd.f32 %v12627_v17, %v3281_v40  ;;  %v3476_v37 = vmax.f32 %v3412_v26, 0.0  ;;  %v11344_v26 = vld [vmem:[%s12166_s24 + $0xdc] ss:$12 sps:$4 sm:$0xff]   ;;  %v11342_v40 = vld [vmem:[%s12166_s24 + $0xd8] ss:$12 sps:$4 sm:$0xff]  }
 0x3a9   : > { %v3285_v61 = vpop.f32.mrf.mxu1  ;;  %4614 = vmatprep.subr.bf16.mxu1 %v11344_v26 }
 0x3aa   : > { %v3477_v41 = vmax.f32 %v3413_v43, 0.0  ;;  %10101 = vmatmul.mubr.msk.bf16.vlgmr.msra.gmra.mxu0 %vm1215_vm1, %v12490_v13  ;;  %v3526_v50 = vpack.c.bf16 %v3476_v37, %v3474_v45  ;;  %v3414_v57 = vadd.f32 %v12630_v18, %v3285_v61  ;;  %4615 = vmatpush2.bf16.msra.mxu1 %v11342_v40  ;;  %v11349_v45 = vld [vmem:[%s12166_s24 + $0xc4] ss:$12 sps:$4 sm:$0xff]  }
 0x3ab   : > { %v3287_v48 = vpop.f32.mrf.mxu1  ;;  %3836 = vmatprep.mubr.bf16.mxu0 %v14085_v53  ;;  %4616 = vmatprep.subr.bf16.mxu1 %v11349_v45 }
 0x3ac   : > { %v3527_v49 = vpack.c.bf16 %v3477_v41, %v3475_v44  ;;  %v3415_v52 = vadd.f32 %v12627_v17, %v3287_v48  ;;  %v3478_v56 = vmax.f32 %v3414_v57, 0.0 }
 0x3ad   : > { %v3289_v51 = vpop.f32.mrf.mxu1 }
 0x3ae   : > { %v3416_v55 = vadd.f32 %v12630_v18, %v3289_v51  ;;  %3818 = vmatprep.subr.bf16.mxu0 %v3527_v49  ;;  %v3479_v36 = vmax.f32 %v3415_v52, 0.0  ;;  %v11347_v49 = vld [vmem:[%s12166_s24 + $0xc0] ss:$12 sps:$4 sm:$0xff]  }
 0x3af   : > { %v3291_v58 = vpop.f32.mrf.mxu1  ;;  %3819 = vmatpush1.bf16.msra.mxu0 %v3526_v50  ;;  %4617 = vmatpush2.bf16.msra.mxu1 %v11347_v49 }
 0x3b0   : > { %v3417_v59 = vadd.f32 %v12627_v17, %v3291_v58  ;;  %v3480_v1 = vmax.f32 %v3416_v55, 0.0 }
 0x3b1   : > { %v3295_v13 = vpop.f32.mrf.mxu1 }
 0x3b2   : > { %v3481_v2 = vmax.f32 %v3417_v59, 0.0  ;;  %10102 = vmatmul.mubr.msk.bf16.vlgmr.msra.gmra.mxu0 %vm1215_vm1, %v12508_v30  ;;  %v3528_v4 = vpack.c.bf16 %v3480_v1, %v3478_v56  ;;  %v3418_v10 = vadd.f32 %v12630_v18, %v3295_v13 }
 0x3b3   : > { %v3297_v62 = vpop.f32.mrf.mxu1  ;;  %3879 = vmatprep.mubr.bf16.mxu0 %v14085_v53 }
 0x3b4   : > { %v3529_v3 = vpack.c.bf16 %v3481_v2, %v3479_v36  ;;  %v3419_v5 = vadd.f32 %v12627_v17, %v3297_v62  ;;  %v3482_v21 = vmax.f32 %v3418_v10, 0.0 }
 0x3b5   : > { %v3299_v6 = vpop.f32.mrf.mxu1 }
 0x3b6   : > { %v3420_v9 = vadd.f32 %v12630_v18, %v3299_v6  ;;  %3861 = vmatprep.subr.bf16.mxu0 %v3529_v3  ;;  %v3483_v19 = vmax.f32 %v3419_v5, 0.0 }
 0x3b7   : > { %v3301_v14 = vpop.f32.mrf.mxu1  ;;  %3862 = vmatpush1.bf16.msra.mxu0 %v3528_v4 }
 0x3b8   : > { %v3421_v15 = vadd.f32 %v12627_v17, %v3301_v14  ;;  %v3484_v16 = vmax.f32 %v3420_v9, 0.0 }
 0x3b9   : > { %v3305_v30 = vpop.f32.mrf.mxu1 }
 0x3ba   : > { %v3485_v20 = vmax.f32 %v3421_v15, 0.0  ;;  %10103 = vmatmul.mubr.msk.bf16.vlgmr.msra.gmra.mxu0 %vm1215_vm1, %v12524_v42  ;;  %v3530_v24 = vpack.c.bf16 %v3484_v16, %v3482_v21  ;;  %v3422_v28 = vadd.f32 %v12630_v18, %v3305_v30 }
 0x3bb   : > { %v3307_v22 = vpop.f32.mrf.mxu1  ;;  %3922 = vmatprep.mubr.bf16.mxu0 %v14085_v53 }
 0x3bc   : > { %v3531_v23 = vpack.c.bf16 %v3485_v20, %v3483_v19  ;;  %v3423_v25 = vadd.f32 %v12627_v17, %v3307_v22  ;;  %v3486_v35 = vmax.f32 %v3422_v28, 0.0 }
 0x3bd   : > { %v3309_v46 = vpop.f32.mrf.mxu1 }
 0x3be   : > { %v3424_v27 = vadd.f32 %v12630_v18, %v3309_v46  ;;  %3904 = vmatprep.subr.bf16.mxu0 %v3531_v23  ;;  %v3487_v33 = vmax.f32 %v3423_v25, 0.0  ;;  %v12050_v25 = vld [vmem:[%s12328_s7 + $0x18] sm:$0xff]  }
 0x3bf   : > { %v3311_v29 = vpop.f32.mrf.mxu1  ;;  %3905 = vmatpush1.bf16.msra.mxu0 %v3530_v24 }
 0x3c0   : > { %v3425_v42 = vadd.f32 %v12627_v17, %v3311_v29  ;;  %v3488_v31 = vmax.f32 %v3424_v27, 0.0 }
 0x3c1   : > { %v3315_v32 = vpop.f32.mrf.mxu1 }
 0x3c2   : > { %v3489_v34 = vmax.f32 %v3425_v42, 0.0  ;;  %10104 = vmatmul.mubr.msk.bf16.vlgmr.msra.gmra.mxu0 %vm1215_vm1, %v12536_v47  ;;  %v3532_v43 = vpack.c.bf16 %v3488_v31, %v3486_v35  ;;  %v3426_v47 = vadd.f32 %v12630_v18, %v3315_v32 }
 0x3c3   : > { %v3317_v38 = vpop.f32.mrf.mxu1  ;;  %3965 = vmatprep.mubr.bf16.mxu0 %v14085_v53 }
 0x3c4   : > { %v3533_v39 = vpack.c.bf16 %v3489_v34, %v3487_v33  ;;  %v3427_v61 = vadd.f32 %v12627_v17, %v3317_v38  ;;  %v3490_v57 = vmax.f32 %v3426_v47, 0.0 }
 0x3c5   : > { %v3319_v37 = vpop.f32.mrf.mxu1 }
 0x3c6   : > { %v3428_v44 = vadd.f32 %v12630_v18, %v3319_v37  ;;  %3947 = vmatprep.subr.bf16.mxu0 %v3533_v39  ;;  %v3491_v52 = vmax.f32 %v3427_v61, 0.0 }
 0x3c7   : > { %v3321_v41 = vpop.f32.mrf.mxu1  ;;  %3948 = vmatpush1.bf16.msra.mxu0 %v3532_v43 }
 0x3c8   : > { %v3429_v48 = vadd.f32 %v12627_v17, %v3321_v41  ;;  %v3492_v50 = vmax.f32 %v3428_v44, 0.0 }
 0x3c9   : > { %v3325_v51 = vpop.f32.mrf.mxu1 }
 0x3ca   : > { %v3493_v55 = vmax.f32 %v3429_v48, 0.0  ;;  %10105 = vmatmul.mubr.msk.bf16.vlgmr.msra.gmra.mxu0 %vm1215_vm1, %v12549_v54  ;;  %v3534_v1 = vpack.c.bf16 %v3492_v50, %v3490_v57  ;;  %v3430_v56 = vadd.f32 %v12630_v18, %v3325_v51 }
 0x3cb   : > { %v3327_v58 = vpop.f32.mrf.mxu1  ;;  %4008 = vmatprep.mubr.bf16.mxu0 %v14085_v53 }
 0x3cc   : > { %v3535_v59 = vpack.c.bf16 %v3493_v55, %v3491_v52  ;;  %v3431_v36 = vadd.f32 %v12627_v17, %v3327_v58  ;;  %v3494_v9 = vmax.f32 %v3430_v56, 0.0  ;;  %v12051_v58 = vld [vmem:[%s12328_s7 + $0x28] sm:$0xff]  }
 0x3cd   : > { %v3329_v13 = vpop.f32.mrf.mxu1 }
 0x3ce   : > { %v3432_v2 = vadd.f32 %v12630_v18, %v3329_v13  ;;  %3990 = vmatprep.subr.bf16.mxu0 %v3535_v59  ;;  %v3495_v6 = vmax.f32 %v3431_v36, 0.0 }
 0x3cf   : > { %v3331_v62 = vpop.f32.mrf.mxu1  ;;  %3991 = vmatpush1.bf16.msra.mxu0 %v3534_v1 }
 0x3d0   : > { %v3433_v3 = vadd.f32 %v12627_v17, %v3331_v62  ;;  %v3496_v54 = vmax.f32 %v3432_v2, 0.0 }
 0x3d1   : > { %v3335_v4 = vpop.f32.mrf.mxu1 }
 0x3d2   : > { %v3497_v5 = vmax.f32 %v3433_v3, 0.0  ;;  %10106 = vmatmul.mubr.msk.bf16.vlgmr.msra.gmra.mxu0 %vm1215_vm1, %v12560_v63  ;;  %v3536_v15 = vpack.c.bf16 %v3496_v54, %v3494_v9  ;;  %v3434_v20 = vadd.f32 %v12630_v18, %v3335_v4 }
 0x3d3   : > { %v3337_v10 = vpop.f32.mrf.mxu1  ;;  %4051 = vmatprep.mubr.bf16.mxu0 %v14085_v53 }
 0x3d4   : > { %v3537_v14 = vpack.c.bf16 %v3497_v5, %v3495_v6  ;;  %v3435_v30 = vadd.f32 %v12627_v17, %v3337_v10  ;;  %v3498_v27 = vmax.f32 %v3434_v20, 0.0  ;;  %v11329_v20 = vld [vmem:[%s12166_s24 + $0x80] ss:$12 sps:$4 sm:$0xff]  }
 0x3d5   : > { %v3339_v16 = vpop.f32.mrf.mxu1 }
 0x3d6   : > { %v3436_v19 = vadd.f32 %v12630_v18, %v3339_v16  ;;  %4033 = vmatprep.subr.bf16.mxu0 %v3537_v14  ;;  %v3499_v24 = vmax.f32 %v3435_v30, 0.0  ;;  %v11326_v16 = vld [vmem:[%s12166_s24 + $0x158] ss:$12 sps:$4 sm:$0xff]  }
 0x3d7   : > { %v3341_v21 = vpop.f32.mrf.mxu1  ;;  %4034 = vmatpush1.bf16.msra.mxu0 %v3536_v15  ;;  %v12052_v30 = vld [vmem:[%s12328_s7 + $0x38] sm:$0xff]   ;;  %s14151_s7 = sld [smem:[#allocation4_spill]] }
 0x3d8   : > { %v3437_v22 = vadd.f32 %v12627_v17, %v3341_v21  ;;  %v3500_v63 = vmax.f32 %v3436_v19, 0.0  ;;  %v11328_v19 = vld [vmem:[%s12166_s24 + $0x140] ss:$12 sps:$4 sm:$0xff]   ;;  %v11333_v21 = vld [vmem:[%s12166_s24 + $0x128] ss:$12 sps:$4 sm:$0xff]  }
 0x3d9   : > { %v3345_v23 = vpop.f32.mrf.mxu1 }
 0x3da   : > { %v3501_v46 = vmax.f32 %v3437_v22, 0.0  ;;  %10107 = vmatmul.mubr.msk.bf16.vlgmr.msra.gmra.mxu0 %vm1215_vm1, %v12050_v25  ;;  %v3538_v42 = vpack.c.bf16 %v3500_v63, %v3498_v27  ;;  %v3438_v34 = vadd.f32 %v12630_v18, %v3345_v23  ;;  %v11334_v22 = vld [vmem:[%s12166_s24 + $0x68] ss:$12 sps:$4 sm:$0xff]   ;;  %v11335_v63 = vld [vmem:[%s12166_s24 + $0x110] ss:$12 sps:$4 sm:$0xff]  }
 0x3db   : > { %v3347_v28 = vpop.f32.mrf.mxu1  ;;  %4094 = vmatprep.mubr.bf16.mxu0 %v14085_v53  ;;  %v11336_v23 = vld [vmem:[%s12166_s24 + $0x50] ss:$12 sps:$4 sm:$0xff]   ;;  %v11345_v25 = vld [vmem:[%s12166_s24 + $0xe0] ss:$12 sps:$4 sm:$0xff]  }
 0x3dc   : > { %v3539_v29 = vpack.c.bf16 %v3501_v46, %v3499_v24  ;;  %v3439_v32 = vadd.f32 %v12627_v17, %v3347_v28  ;;  %v3502_v37 = vmax.f32 %v3438_v34, 0.0  ;;  %v11340_v24 = vld [vmem:[%s12166_s24 + $0xf8] ss:$12 sps:$4 sm:$0xff]   ;;  %v11346_v27 = vld [vmem:[%s12166_s24 + $0x20] ss:$12 sps:$4 sm:$0xff]  }
 0x3dd   : > { %v3349_v31 = vpop.f32.mrf.mxu1  ;;  %v11341_v46 = vld [vmem:[%s12166_s24 + $0x38] ss:$12 sps:$4 sm:$0xff]   ;;  %v11350_v28 = vld [vmem:[%s12166_s24 + $0xc8] ss:$12 sps:$4 sm:$0xff]  }
 0x3de   : > { %v3440_v33 = vadd.f32 %v12630_v18, %v3349_v31  ;;  %4076 = vmatprep.subr.bf16.mxu0 %v3539_v29  ;;  %v3503_v40 = vmax.f32 %v3439_v32, 0.0  ;;  %v11351_v29 = vld [vmem:[%s12166_s24 + $0x8] ss:$12 sps:$4 sm:$0xff]   ;;  %v1188_v34 = vld [vmem:[%s12794_s15] sm:$0xff] }
 0x3df   : > { %v3351_v35 = vpop.f32.mrf.mxu1  ;;  %4077 = vmatpush1.bf16.msra.mxu0 %v3538_v42  ;;  %v1172_v42 = vld [vmem:[%s12787_s11] sm:$0xff]  ;;  %v1174_v31 = vld [vmem:[%s12787_s11 + $0x10] sm:$0xff]  ;;  %v1173_v32 = vld [vmem:[%s12787_s11 + $0x8] sm:$0xff] }
 0x3e0   : > { %v3441_v38 = vadd.f32 %v12627_v17, %v3351_v35  ;;  %v3504_v26 = vmax.f32 %v3440_v33, 0.0  ;;  %5151 = vperm.xlu0 %11222, %v1172_v42   ;;  %5161 = vperm.xlu1 %11223, %v1174_v31   ;;  %v1175_v33 = vld [vmem:[%s12787_s11 + $0x18] sm:$0xff]  ;;  %v1189_v35 = vld [vmem:[%s12794_s15 + $0x8] sm:$0xff] }
 0x3e1   : > { %v3355_v39 = vpop.f32.mrf.mxu1 }
 0x3e2   : > { %v3505_v43 = vmax.f32 %v3441_v38, 0.0  ;;  %10108 = vmatmul.mubr.msk.bf16.vlgmr.msra.gmra.mxu0 %vm1215_vm1, %v12569_v60  ;;  %v3540_v47 = vpack.c.bf16 %v3504_v26, %v3502_v37  ;;  %v3442_v49 = vadd.f32 %v12630_v18, %v3355_v39  ;;  %v1190_v38 = vld [vmem:[%s12794_s15 + $0x10] sm:$0xff]  ;;  %v1191_v26 = vld [vmem:[%s12794_s15 + $0x18] sm:$0xff]  ;;  %v1176_v39 = vld [vmem:[%s12787_s11 + $0x20] sm:$0xff] }
 0x3e3   : > { %v3357_v61 = vpop.f32.mrf.mxu1  ;;  %4137 = vmatprep.mubr.bf16.mxu0 %v14085_v53  ;;  %v1193_v37 = vld [vmem:[%s12794_s15 + $0x28] sm:$0xff] }
 0x3e4   : > { %v3541_v44 = vpack.c.bf16 %v3505_v43, %v3503_v40  ;;  %v3443_v45 = vadd.f32 %v12627_v17, %v3357_v61  ;;  %v3506_v59 = vmax.f32 %v3442_v49, 0.0  ;;  %5156 = vperm.xlu0 %11222, %v1173_v32   ;;  %5166 = vperm.xlu1 %11223, %v1175_v33   ;;  %v1177_v40 = vld [vmem:[%s12787_s11 + $0x28] sm:$0xff]  ;;  %v1192_v43 = vld [vmem:[%s12794_s15 + $0x20] sm:$0xff]  ;;  %v1178_v61 = vld [vmem:[%s12787_s11 + $0x30] sm:$0xff] }
 0x3e5   : > { %v3359_v41 = vpop.f32.mrf.mxu1  ;;  %v1196_v49 = vld [vmem:[%s12794_s15 + $0x40] sm:$0xff] }
 0x3e6   : > { %v3444_v48 = vadd.f32 %v12630_v18, %v3359_v41  ;;  %4119 = vmatprep.subr.bf16.mxu0 %v3541_v44  ;;  %v3507_v55 = vmax.f32 %v3443_v45, 0.0  ;;  %v1179_v44 = vld [vmem:[%s12787_s11 + $0x38] sm:$0xff]  ;;  %v1180_v45 = vld [vmem:[%s12787_s11 + $0x40] sm:$0xff] }
 0x3e7   : > { %v3361_v50 = vpop.f32.mrf.mxu1  ;;  %4120 = vmatpush1.bf16.msra.mxu0 %v3540_v47  ;;  %v1194_v47 = vld [vmem:[%s12794_s15 + $0x30] sm:$0xff]  ;;  %v1195_v41 = vld [vmem:[%s12794_s15 + $0x38] sm:$0xff] }
 0x3e8   : > { %v3445_v51 = vadd.f32 %v12627_v17, %v3361_v50  ;;  %v3508_v60 = vmax.f32 %v3444_v48, 0.0  ;;  %5231 = vperm.xlu0 %11222, %v1188_v34   ;;  %5236 = vperm.xlu1 %11223, %v1189_v35   ;;  %v1181_v48 = vld [vmem:[%s12787_s11 + $0x48] sm:$0xff] }
 0x3e9   : > { %v3365_v52 = vpop.f32.mrf.mxu1  ;;  %v1197_v50 = vld [vmem:[%s12794_s15 + $0x48] sm:$0xff] }
 0x3ea   : > { %v3509_v57 = vmax.f32 %v3445_v51, 0.0  ;;  %10109 = vmatmul.mubr.msk.bf16.vlgmr.msra.gmra.mxu0 %vm1215_vm1, %v12051_v58  ;;  %v3542_v36 = vpack.c.bf16 %v3508_v60, %v3506_v59  ;;  %v3446_v3 = vadd.f32 %v12630_v18, %v3365_v52  ;;  %v1182_v51 = vld [vmem:[%s12787_s11 + $0x50] sm:$0xff]  ;;  %v1183_v60 = vld [vmem:[%s12787_s11 + $0x58] sm:$0xff]  ;;  %v1184_v59 = vld [vmem:[%s12787_s11 + $0x60] sm:$0xff] }
 0x3eb   : > { %v3367_v1 = vpop.f32.mrf.mxu1  ;;  %4180 = vmatprep.mubr.bf16.mxu0 %v14085_v53  ;;  %v1198_v52 = vld [vmem:[%s12794_s15 + $0x50] sm:$0xff]  ;;  %v1199_v58 = vld [vmem:[%s12794_s15 + $0x58] sm:$0xff] }
 0x3ec   : > { %v3543_v13 = vpack.c.bf16 %v3509_v57, %v3507_v55  ;;  %v3447_v56 = vadd.f32 %v12627_v17, %v3367_v1  ;;  %v3510_v10 = vmax.f32 %v3446_v3, 0.0  ;;  %5241 = vperm.xlu0 %11222, %v1190_v38   ;;  %5246 = vperm.xlu1 %11223, %v1191_v26  }
 0x3ed   : > { %v3369_v2 = vpop.f32.mrf.mxu1 }
 0x3ee   : > { %v3448_v62 = vadd.f32 %v12630_v18, %v3369_v2  ;;  %4162 = vmatprep.subr.bf16.mxu0 %v3543_v13  ;;  %v3511_v5 = vmax.f32 %v3447_v56, 0.0  ;;  %v11321_v18 = vld [vmem:[%s12166_s24 + $0x170] ss:$12 sps:$4 sm:$0xff]   ;;  %v1185_v13 = vld [vmem:[%s12787_s11 + $0x68] sm:$0xff] }
 0x3ef   : > { %v3371_v54 = vpop.f32.mrf.mxu1  ;;  %4163 = vmatpush1.bf16.msra.mxu0 %v3542_v36  ;;  %v1200_v36 = vld [vmem:[%s12794_s15 + $0x60] sm:$0xff] }
 0x3f0   : > { %v3449_v4 = vadd.f32 %v12627_v17, %v3371_v54  ;;  %v3512_v6 = vmax.f32 %v3448_v62, 0.0  ;;  %v11322_v17 = vld [vmem:[%s12166_s24 + $0xb0] ss:$12 sps:$4 sm:$0xff]   ;;  %5171 = vperm.xlu0 %11222, %v1176_v39   ;;  %5176 = vperm.xlu1 %11223, %v1177_v40   ;;  %v1201_v54 = vld [vmem:[%s12794_s15 + $0x68] sm:$0xff] }
 0x3f2   : > { %v3513_v9 = vmax.f32 %v3449_v4, 0.0  ;;  %10110 = vmatmul.mubr.msk.bf16.vlgmr.msra.gmra.mxu0 %vm1215_vm1, %v12578_v7  ;;  %v3544_v15 = vpack.c.bf16 %v3512_v6, %v3510_v10  ;;  %v11327_v7 = vld [vmem:[%s12166_s24 + $0x98] ss:$12 sps:$4 sm:$0xff]   ;;  %v1186_v4 = vld [vmem:[%s12787_s11 + $0x70] sm:$0xff] }
 0x3f3   : > { %4223 = vmatprep.mubr.bf16.mxu0 %v14085_v53  ;;  %v1202_v10 = vld [vmem:[%s12794_s15 + $0x70] sm:$0xff] }
 0x3f4   : > { %v3545_v14 = vpack.c.bf16 %v3513_v9, %v3511_v5  ;;  %5251 = vperm.xlu0 %11222, %v1192_v43   ;;  %5256 = vperm.xlu1 %11223, %v1193_v37   ;;  %v1187_v9 = vld [vmem:[%s12787_s11 + $0x78] sm:$0xff]  ;;  %s14153_s11 = sld [smem:[#allocation9_spill]] }
 0x3f6   : > { %4205 = vmatprep.subr.bf16.mxu0 %v3545_v14 }
 0x3f7   : > { %4206 = vmatpush1.bf16.msra.mxu0 %v3544_v15 }
 0x3f8   : > { %10733 = vmatprep.subr.bf16.mxu0 %v11321_v18  ;;  %5181 = vperm.xlu0 %11222, %v1178_v61  }
 0x3f9   : > { %5186 = vperm.xlu1 %11223, %v1179_v44  }
 0x3fa   : > { %10111 = vmatmul.mubr.msk.bf16.vlgmr.msra.gmra.mxu0 %vm1215_vm1, %v12052_v30 }
 0x3fb   : > { %10734 = vmatpush3.bf16.msra.mxu0 %v11322_v17 }
 0x3fc   : > { %10735 = vmatprep.subr.bf16.mxu0 %v11326_v16  ;;  %5261 = vperm.xlu0 %11222, %v1194_v47   ;;  %v1203_v16 = vld [vmem:[%s12794_s15 + $0x78] sm:$0xff]  ;;  %s14155_s15 = sld [smem:[#allocation11_spill]] }
 0x3fd   : > { %5266 = vperm.xlu1 %11223, %v1195_v41  }
 0x3ff   : > { %10736 = vmatpush3.bf16.msra.mxu0 %v11327_v7 }
 0x400   : > { %10737 = vmatprep.subr.bf16.mxu0 %v11328_v19  ;;  %5191 = vperm.xlu0 %11222, %v1180_v45  }
 0x401   : > { %5196 = vperm.xlu1 %11223, %v1181_v48  }
 0x403   : > { %10738 = vmatpush3.bf16.msra.mxu0 %v11329_v20 }
 0x404   : > { %10739 = vmatprep.subr.bf16.mxu0 %v11333_v21  ;;  %5271 = vperm.xlu0 %11222, %v1196_v49  }
 0x405   : > { %5276 = vperm.xlu1 %11223, %v1197_v50  }
 0x407   : > { %10740 = vmatpush3.bf16.msra.mxu0 %v11334_v22 }
 0x408   : > { %10741 = vmatprep.subr.bf16.mxu0 %v11335_v63  ;;  %5201 = vperm.xlu0 %11222, %v1182_v51  }
 0x409   : > { %5206 = vperm.xlu1 %11223, %v1183_v60  }
 0x40b   : > { %10742 = vmatpush3.bf16.msra.mxu0 %v11336_v23 }
 0x40c   : > { %10743 = vmatprep.subr.bf16.mxu0 %v11340_v24  ;;  %5281 = vperm.xlu0 %11222, %v1198_v52  }
 0x40d   : > { %5286 = vperm.xlu1 %11223, %v1199_v58  }
 0x40f   : > { %10744 = vmatpush3.bf16.msra.mxu0 %v11341_v46 }
 0x410   : > { %10745 = vmatprep.subr.bf16.mxu0 %v11345_v25  ;;  %5211 = vperm.xlu0 %11222, %v1184_v59  }
 0x411   : > { %5216 = vperm.xlu1 %11223, %v1185_v13  }
 0x413   : > { %10746 = vmatpush3.bf16.msra.mxu0 %v11346_v27 }
 0x414   : > { %10747 = vmatprep.subr.bf16.mxu0 %v11350_v28  ;;  %5291 = vperm.xlu0 %11222, %v1200_v36  }
 0x415   : > { %5296 = vperm.xlu1 %11223, %v1201_v54  }
 0x417   : > { %10748 = vmatpush3.bf16.msra.mxu0 %v11351_v29 }
 0x418   : > { %5221 = vperm.xlu0 %11222, %v1186_v4  }
 0x419   : > { %5226 = vperm.xlu1 %11223, %v1187_v9  }
 0x41c   : > { %5301 = vperm.xlu0 %11222, %v1202_v10  }
 0x41d   : > { %5306 = vperm.xlu1 %11223, %v1203_v16  }
 0x442   : > { %v3580_v55 = vpop.f32.mrf.mxu0 }
 0x444   : > { %v3582_v57 = vpop.f32.mrf.mxu0 }
 0x446   : > { %v3584_v1 = vpop.f32.mrf.mxu0 }
 0x447   : > { %v4234_v62 = vpack.c.bf16 %v3584_v1, %v3580_v55 }
 0x448   : > { %v3586_v2 = vpop.f32.mrf.mxu0 }
 0x449   : > { %v4235_v56 = vpack.c.bf16 %v3586_v2, %v3582_v57 }
 0x44a   : > { %v3623_v3 = vpop.f32.mrf.mxu0 }
 0x44b   : > { %4618 = vmatprep.mubr.bf16.mxu1 %v4235_v56  ;;  %4811 = vmatprep.mubr.bf16.mxu0 %v4235_v56 }
 0x44c   : > { %v3625_v6 = vpop.f32.mrf.mxu0  ;;  %4619 = vmatmul.mubr.bf16.vlgmr.msra.gmra.mxu1 %v4234_v62  ;;  %4812 = vmatmul.mubr.bf16.vlgmr.msra.gmra.mxu0 %v4234_v62 }
 0x44e   : > { %v3627_v5 = vpop.f32.mrf.mxu0 }
 0x44f   : > { %v4236_v15 = vpack.c.bf16 %v3627_v5, %v3623_v3 }
 0x450   : > { %v3629_v14 = vpop.f32.mrf.mxu0 }
 0x451   : > { %v4237_v18 = vpack.c.bf16 %v3629_v14, %v3625_v6 }
 0x452   : > { %v3666_v17 = vpop.f32.mrf.mxu0 }
 0x453   : > { %4628 = vmatprep.mubr.bf16.mxu1 %v4237_v18  ;;  %4819 = vmatprep.mubr.bf16.mxu0 %v4237_v18 }
 0x454   : > { %v3668_v30 = vpop.f32.mrf.mxu0  ;;  %4629 = vmatmul.mubr.bf16.gmra.mxu1 %v4236_v15  ;;  %4820 = vmatmul.mubr.bf16.gmra.mxu0 %v4236_v15 }
 0x456   : > { %v3670_v7 = vpop.f32.mrf.mxu0 }
 0x457   : > { %v4238_v21 = vpack.c.bf16 %v3670_v7, %v3666_v17 }
 0x458   : > { %v3672_v19 = vpop.f32.mrf.mxu0 }
 0x459   : > { %v4239_v20 = vpack.c.bf16 %v3672_v19, %v3668_v30 }
 0x45a   : > { %v3709_v22 = vpop.f32.mrf.mxu0 }
 0x45b   : > { %4638 = vmatprep.mubr.bf16.mxu1 %v4239_v20  ;;  %4827 = vmatprep.mubr.bf16.mxu0 %v4239_v20 }
 0x45c   : > { %v3711_v63 = vpop.f32.mrf.mxu0  ;;  %4639 = vmatmul.mubr.bf16.gmra.mxu1 %v4238_v21  ;;  %4828 = vmatmul.mubr.bf16.gmra.mxu0 %v4238_v21 }
 0x45e   : > { %v3713_v23 = vpop.f32.mrf.mxu0 }
 0x45f   : > { %v4240_v25 = vpack.c.bf16 %v3713_v23, %v3709_v22 }
 0x460   : > { %v3715_v24 = vpop.f32.mrf.mxu0 }
 0x461   : > { %v4241_v46 = vpack.c.bf16 %v3715_v24, %v3711_v63 }
 0x462   : > { %v3752_v27 = vpop.f32.mrf.mxu0 }
 0x463   : > { %4648 = vmatprep.mubr.bf16.mxu1 %v4241_v46  ;;  %4835 = vmatprep.mubr.bf16.mxu0 %v4241_v46 }
 0x464   : > { %v3754_v28 = vpop.f32.mrf.mxu0  ;;  %4649 = vmatmul.mubr.bf16.gmra.mxu1 %v4240_v25  ;;  %4836 = vmatmul.mubr.bf16.gmra.mxu0 %v4240_v25 }
 0x466   : > { %v3756_v29 = vpop.f32.mrf.mxu0 }
 0x467   : > { %v4242_v32 = vpack.c.bf16 %v3756_v29, %v3752_v27 }
 0x468   : > { %v3758_v42 = vpop.f32.mrf.mxu0 }
 0x469   : > { %v4243_v31 = vpack.c.bf16 %v3758_v42, %v3754_v28 }
 0x46a   : > { %v3795_v33 = vpop.f32.mrf.mxu0 }
 0x46b   : > { %4658 = vmatprep.mubr.bf16.mxu1 %v4243_v31  ;;  %4843 = vmatprep.mubr.bf16.mxu0 %v4243_v31 }
 0x46c   : > { %v3797_v34 = vpop.f32.mrf.mxu0  ;;  %4659 = vmatmul.mubr.bf16.gmra.mxu1 %v4242_v32  ;;  %4844 = vmatmul.mubr.bf16.gmra.mxu0 %v4242_v32 }
 0x46e   : > { %v3799_v35 = vpop.f32.mrf.mxu0 }
 0x46f   : > { %v4244_v39 = vpack.c.bf16 %v3799_v35, %v3795_v33 }
 0x470   : > { %v3801_v38 = vpop.f32.mrf.mxu0 }
 0x471   : > { %v4245_v26 = vpack.c.bf16 %v3801_v38, %v3797_v34 }
 0x472   : > { %v3838_v40 = vpop.f32.mrf.mxu0 }
 0x473   : > { %4668 = vmatprep.mubr.bf16.mxu1 %v4245_v26  ;;  %4851 = vmatprep.mubr.bf16.mxu0 %v4245_v26 }
 0x474   : > { %v3840_v43 = vpop.f32.mrf.mxu0  ;;  %4669 = vmatmul.mubr.bf16.gmra.mxu1 %v4244_v39  ;;  %4852 = vmatmul.mubr.bf16.gmra.mxu0 %v4244_v39 }
 0x476   : > { %v3842_v37 = vpop.f32.mrf.mxu0 }
 0x477   : > { %v4246_v47 = vpack.c.bf16 %v3842_v37, %v3838_v40  ;;  %v11354_v37 = vld [vmem:[%s12176_s6 + $0x74] ss:$8 sps:$4 sm:$0xff]  }
 0x478   : > { %v3844_v61 = vpop.f32.mrf.mxu0  ;;  %6240 = vmatprep.subr.bf16.mxu1 %v11354_v37 }
 0x479   : > { %v4247_v44 = vpack.c.bf16 %v3844_v61, %v3840_v43  ;;  %v11352_v43 = vld [vmem:[%s12176_s6 + $0x70] ss:$8 sps:$4 sm:$0xff]  }
 0x47a   : > { %v3881_v41 = vpop.f32.mrf.mxu0  ;;  %6241 = vmatpush1.bf16.msra.mxu1 %v11352_v43  ;;  %v11355_v61 = vld [vmem:[%s12176_s6 + $0x170] ss:$8 sps:$4 sm:$0xff]  }
 0x47b   : > { %4678 = vmatprep.mubr.bf16.mxu1 %v4247_v44  ;;  %4859 = vmatprep.mubr.bf16.mxu0 %v4247_v44  ;;  %v11357_v44 = vld [vmem:[%s12176_s6 + $0x174] ss:$8 sps:$4 sm:$0xff]  }
 0x47c   : > { %v3883_v45 = vpop.f32.mrf.mxu0  ;;  %4679 = vmatmul.mubr.bf16.gmra.mxu1 %v4246_v47  ;;  %4860 = vmatmul.mubr.bf16.gmra.mxu0 %v4246_v47  ;;  %v11358_v47 = vld [vmem:[%s12176_s6 + $0x60] ss:$8 sps:$4 sm:$0xff]  }
 0x47d   : > { %6283 = vmatprep.subr.bf16.mxu0 %v11357_v44 }
 0x47e   : > { %v3885_v48 = vpop.f32.mrf.mxu0  ;;  %6284 = vmatpush1.bf16.msra.mxu0 %v11355_v61 }
 0x47f   : > { %v4248_v51 = vpack.c.bf16 %v3885_v48, %v3881_v41  ;;  %v11360_v41 = vld [vmem:[%s12176_s6 + $0x64] ss:$8 sps:$4 sm:$0xff]  }
 0x480   : > { %v3887_v49 = vpop.f32.mrf.mxu0  ;;  %6242 = vmatprep.subr.bf16.mxu1 %v11360_v41  ;;  %v6509_v48 = vld [vmem:[%s12837_s18 + $0x8] sm:$0xff] }
 0x481   : > { %v4249_v50 = vpack.c.bf16 %v3887_v49, %v3883_v45  ;;  %6243 = vmatpush1.bf16.msra.mxu1 %v11358_v47  ;;  %v6508_v45 = vld [vmem:[%s12837_s18] sm:$0xff]  ;;  %v6510_v49 = vld [vmem:[%s12837_s18 + $0x10] sm:$0xff] }
 0x482   : > { %v3924_v60 = vpop.f32.mrf.mxu0 }
 0x483   : > { %4688 = vmatprep.mubr.bf16.mxu1 %v4249_v50  ;;  %4867 = vmatprep.mubr.bf16.mxu0 %v4249_v50  ;;  %v6516_v50 = vmul.f32 %v6508_v45, %v6508_v45 }
 0x484   : > { %v3926_v52 = vpop.f32.mrf.mxu0  ;;  %4689 = vmatmul.mubr.bf16.gmra.mxu1 %v4248_v51  ;;  %4868 = vmatmul.mubr.bf16.gmra.mxu0 %v4248_v51  ;;  %v6517_v51 = vmul.f32 %v6509_v48, %v6509_v48 }
 0x486   : > { %v3928_v55 = vpop.f32.mrf.mxu0 }
 0x487   : > { %v4250_v59 = vpack.c.bf16 %v3928_v55, %v3924_v60  ;;  %v6518_v60 = vmul.f32 %v6510_v49, %v6510_v49  ;;  %v6524_v55 = vadd.f32 %v6517_v51, %v6516_v50 }
 0x488   : > { %v3930_v57 = vpop.f32.mrf.mxu0 }
 0x489   : > { %v4251_v58 = vpack.c.bf16 %v3930_v57, %v3926_v52  ;;  %v6511_v52 = vld [vmem:[%s12837_s18 + $0x18] sm:$0xff] }
 0x48a   : > { %v3967_v1 = vpop.f32.mrf.mxu0  ;;  %v6519_v57 = vmul.f32 %v6511_v52, %v6511_v52 }
 0x48b   : > { %4698 = vmatprep.mubr.bf16.mxu1 %v4251_v58  ;;  %4875 = vmatprep.mubr.bf16.mxu0 %v4251_v58  ;;  %v6512_v58 = vld [vmem:[%s12837_s18 + $0x20] sm:$0xff] }
 0x48c   : > { %v3969_v13 = vpop.f32.mrf.mxu0  ;;  %4699 = vmatmul.mubr.bf16.gmra.mxu1 %v4250_v59  ;;  %4876 = vmatmul.mubr.bf16.gmra.mxu0 %v4250_v59  ;;  %v6525_v59 = vadd.f32 %v6524_v55, %v6518_v60 }
 0x48e   : > { %v3971_v36 = vpop.f32.mrf.mxu0 }
 0x48f   : > { %v4252_v62 = vpack.c.bf16 %v3971_v36, %v3967_v1  ;;  %v11361_v1 = vld [vmem:[%s12176_s6 + $0x50] ss:$8 sps:$4 sm:$0xff]   ;;  %v6520_v36 = vmul.f32 %v6512_v58, %v6512_v58 }
 0x490   : > { %v3973_v2 = vpop.f32.mrf.mxu0 }
 0x491   : > { %v4253_v56 = vpack.c.bf16 %v3973_v2, %v3969_v13  ;;  %v11363_v13 = vld [vmem:[%s12176_s6 + $0x54] ss:$8 sps:$4 sm:$0xff]   ;;  %v6513_v2 = vld [vmem:[%s12837_s18 + $0x28] sm:$0xff] }
 0x492   : > { %v4010_v3 = vpop.f32.mrf.mxu0  ;;  %6244 = vmatprep.subr.bf16.mxu1 %v11363_v13 }
 0x493   : > { %4708 = vmatprep.mubr.bf16.mxu1 %v4253_v56  ;;  %4883 = vmatprep.mubr.bf16.mxu0 %v4253_v56  ;;  %v6526_v56 = vadd.f32 %v6525_v59, %v6519_v57 }
 0x494   : > { %v4012_v54 = vpop.f32.mrf.mxu0  ;;  %4709 = vmatmul.mubr.bf16.gmra.mxu1 %v4252_v62  ;;  %4884 = vmatmul.mubr.bf16.gmra.mxu0 %v4252_v62  ;;  %v6521_v62 = vmul.f32 %v6513_v2, %v6513_v2 }
 0x495   : > { %6245 = vmatpush1.bf16.msra.mxu1 %v11361_v1 }
 0x496   : > { %v4014_v4 = vpop.f32.mrf.mxu0 }
 0x497   : > { %v4254_v9 = vpack.c.bf16 %v4014_v4, %v4010_v3  ;;  %v6514_v3 = vld [vmem:[%s12837_s18 + $0x30] sm:$0xff] }
 0x498   : > { %v4016_v6 = vpop.f32.mrf.mxu0  ;;  %v6522_v4 = vmul.f32 %v6514_v3, %v6514_v3 }
 0x499   : > { %v4255_v5 = vpack.c.bf16 %v4016_v6, %v4012_v54  ;;  %v6527_v54 = vadd.f32 %v6526_v56, %v6520_v36  ;;  %v6515_v6 = vld [vmem:[%s12837_s18 + $0x38] sm:$0xff]  ;;  %v11376_v56 = vld [vmem:[%s12176_s6 + $0x20] ss:$8 sps:$4 sm:$0xff]  }
 0x49a   : > { %v4053_v10 = vpop.f32.mrf.mxu0 }
 0x49b   : > { %4718 = vmatprep.mubr.bf16.mxu1 %v4255_v5  ;;  %4891 = vmatprep.mubr.bf16.mxu0 %v4255_v5  ;;  %v6528_v5 = vadd.f32 %v6527_v54, %v6521_v62  ;;  %v11378_v62 = vld [vmem:[%s12176_s6 + $0x24] ss:$8 sps:$4 sm:$0xff]  }
 0x49c   : > { %v4055_v14 = vpop.f32.mrf.mxu0  ;;  %4719 = vmatmul.mubr.bf16.gmra.mxu1 %v4254_v9  ;;  %4892 = vmatmul.mubr.bf16.gmra.mxu0 %v4254_v9  ;;  %v6523_v9 = vmul.f32 %v6515_v6, %v6515_v6 }
 0x49e   : > { %v4057_v18 = vpop.f32.mrf.mxu0 }
 0x49f   : > { %v4256_v16 = vpack.c.bf16 %v4057_v18, %v4053_v10  ;;  %v6529_v10 = vadd.f32 %v6528_v5, %v6522_v4  ;;  %v11364_v18 = vld [vmem:[%s12176_s6 + $0x160] ss:$8 sps:$4 sm:$0xff]  }
 0x4a0   : > { %v4059_v15 = vpop.f32.mrf.mxu0 }
 0x4a1   : > { %v4257_v17 = vpack.c.bf16 %v4059_v15, %v4055_v14  ;;  %v6530_v14 = vadd.f32 %v6529_v10, %v6523_v9  ;;  %v11366_v15 = vld [vmem:[%s12176_s6 + $0x164] ss:$8 sps:$4 sm:$0xff]  }
 0x4a2   : > { %v4096_v30 = vpop.f32.mrf.mxu0  ;;  %6285 = vmatprep.subr.bf16.mxu0 %v11366_v15 }
 0x4a3   : > { %4728 = vmatprep.mubr.bf16.mxu1 %v4257_v17  ;;  %4899 = vmatprep.mubr.bf16.mxu0 %v4257_v17  ;;  %v11367_v17 = vld [vmem:[%s12176_s6 + $0x40] ss:$8 sps:$4 sm:$0xff]  }
 0x4a4   : > { %v4098_v7 = vpop.f32.mrf.mxu0  ;;  %4729 = vmatmul.mubr.bf16.gmra.mxu1 %v4256_v16  ;;  %4900 = vmatmul.mubr.bf16.gmra.mxu0 %v4256_v16  ;;  %v11369_v16 = vld [vmem:[%s12176_s6 + $0x44] ss:$8 sps:$4 sm:$0xff]  }
 0x4a5   : > { %6531 = vadd.xlane.f32.xlu0 %v6530_v14  ;;  %6286 = vmatpush1.bf16.msra.mxu0 %v11364_v18 }
 0x4a6   : > { %v4100_v19 = vpop.f32.mrf.mxu0  ;;  %6246 = vmatprep.subr.bf16.mxu1 %v11369_v16 }
 0x4a7   : > { %v4258_v22 = vpack.c.bf16 %v4100_v19, %v4096_v30  ;;  %6247 = vmatpush1.bf16.msra.mxu1 %v11367_v17  ;;  %v4940_v30 = vld [vmem:[%s12171_s30] sm:$0x7]  ;;  %v14087_v19 = vsub.s32 2, %v12615_v8 }
 0x4a8   : > { %v4102_v20 = vpop.f32.mrf.mxu0 }
 0x4a9   : > { %v4259_v21 = vpack.c.bf16 %v4102_v20, %v4098_v7  ;;  %v12855_v7 = vrot.slane %v4940_v30, %v12623_v12  ;;  %v11370_v20 = vld [vmem:[%s12176_s6 + $0x30] ss:$8 sps:$4 sm:$0xff]  }
 0x4aa   : > { %v4139_v63 = vpop.f32.mrf.mxu0 }
 0x4ab   : > { %4738 = vmatprep.mubr.bf16.mxu1 %v4259_v21  ;;  %4907 = vmatprep.mubr.bf16.mxu0 %v4259_v21  ;;  %v11372_v21 = vld [vmem:[%s12176_s6 + $0x34] ss:$8 sps:$4 sm:$0xff]  }
 0x4ac   : > { %v4141_v23 = vpop.f32.mrf.mxu0  ;;  %4739 = vmatmul.mubr.bf16.gmra.mxu1 %v4258_v22  ;;  %4908 = vmatmul.mubr.bf16.gmra.mxu0 %v4258_v22  ;;  %v11373_v22 = vld [vmem:[%s12176_s6 + $0x150] ss:$8 sps:$4 sm:$0xff]  }
 0x4ad   : > { %6248 = vmatprep.subr.bf16.mxu1 %v11372_v21 }
 0x4ae   : > { %v4143_v24 = vpop.f32.mrf.mxu0  ;;  %6249 = vmatpush1.bf16.msra.mxu1 %v11370_v20 }
 0x4af   : > { %v4260_v27 = vpack.c.bf16 %v4143_v24, %v4139_v63  ;;  %v12862_v63 = vrot.slane %v4940_v30, %v12620_v11  ;;  %v11375_v24 = vld [vmem:[%s12176_s6 + $0x154] ss:$8 sps:$4 sm:$0xff]   ;;  %6250 = vmatprep.subr.bf16.mxu1 %v11378_v62 }
 0x4b0   : > { %v4145_v46 = vpop.f32.mrf.mxu0  ;;  %6287 = vmatprep.subr.bf16.mxu0 %v11375_v24 }
 0x4b1   : > { %v4261_v25 = vpack.c.bf16 %v4145_v46, %v4141_v23  ;;  %v5152_v23 = vpop.permute.xlu0 %5151  ;;  %6288 = vmatpush1.bf16.msra.mxu0 %v11373_v22 }
 0x4b2   : > { %v4182_v28 = vpop.f32.mrf.mxu0  ;;  %6251 = vmatpush1.bf16.msra.mxu1 %v11376_v56 }
 0x4b3   : > { %4748 = vmatprep.mubr.bf16.mxu1 %v4261_v25  ;;  %4915 = vmatprep.mubr.bf16.mxu0 %v4261_v25 }
 0x4b4   : > { %v4184_v29 = vpop.f32.mrf.mxu0  ;;  %4749 = vmatmul.mubr.bf16.gmra.mxu1 %v4260_v27  ;;  %4916 = vmatmul.mubr.bf16.gmra.mxu0 %v4260_v27 }
 0x4b6   : > { %v4186_v42 = vpop.f32.mrf.mxu0 }
 0x4b7   : > { %v4262_v33 = vpack.c.bf16 %v4186_v42, %v4182_v28  ;;  %v12866_v28 = vpop.permute.xlu1 %5161 }
 0x4b8   : > { %v4188_v31 = vpop.f32.mrf.mxu0 }
 0x4b9   : > { %v4263_v32 = vpack.c.bf16 %v4188_v31, %v4184_v29  ;;  %v12870_v31 = vrot.slane %v4940_v30, %v14087_v19 }
 0x4ba   : > { %v4225_v34 = vpop.f32.mrf.mxu0 }
 0x4bb   : > { %4758 = vmatprep.mubr.bf16.mxu1 %v4263_v32  ;;  %4923 = vmatprep.mubr.bf16.mxu0 %v4263_v32  ;;  %v12876_v41 = vpop.permute.xlu1 %5166 }
 0x4bc   : > { %v4227_v35 = vpop.f32.mrf.mxu0  ;;  %4759 = vmatmul.mubr.bf16.gmra.mxu1 %v4262_v33  ;;  %4924 = vmatmul.mubr.bf16.gmra.mxu0 %v4262_v33 }
 0x4be   : > { %v4229_v38 = vpop.f32.mrf.mxu0 }
 0x4bf   : > { %v4264_v40 = vpack.c.bf16 %v4229_v38, %v4225_v34  ;;  %v12883_v14 = vpop.permute.xlu1 %5236 }
 0x4c0   : > { %v4231_v26 = vpop.f32.mrf.mxu0 }
 0x4c1   : > { %v4265_v39 = vpack.c.bf16 %v4231_v26, %v4227_v35 }
 0x4c3   : > { %4768 = vmatprep.mubr.bf16.mxu1 %v4265_v39  ;;  %4931 = vmatprep.mubr.bf16.mxu0 %v4265_v39  ;;  %v5157_v39 = vpop.permute.xlu0 %5156 }
 0x4c4   : > { %4769 = vmatmul.mubr.bf16.gmra.mxu1 %v4264_v40  ;;  %4932 = vmatmul.mubr.bf16.gmra.mxu0 %v4264_v40 }
 0x4c5   : > { %6315 = vmatprep.mubr.bf16.mxu0 %v14085_v53 }
 0x50c   : > { %v4620_v46 = vpop.f32.mrf.mxu1  ;;  %v10749_v25 = vpop.f32.mrf.mxu0 }
 0x50d   : > { %v4957_v27 = vadd.f32 %v12855_v7, %v4620_v46 }
 0x50e   : > { %v4622_v29 = vpop.f32.mrf.mxu1  ;;  %v10750_v42 = vpop.f32.mrf.mxu0 }
 0x50f   : > { %v4958_v32 = vadd.f32 %v12862_v63, %v4622_v29  ;;  %v10751_v33 = vadd.f32 %v10750_v42, %v10749_v25  ;;  %v5053_v38 = vmax.f32 %v4957_v27, 0.0  ;;  %v12888_v25 = vpop.permute.xlu0 %5231 }
 0x510   : > { %v4624_v34 = vpop.f32.mrf.mxu1  ;;  %v10752_v35 = vpop.f32.mrf.mxu0 }
 0x511   : > { %v4960_v26 = vadd.f32 %v12855_v7, %v4624_v34  ;;  %v4959_v40 = vadd.f32 %v10751_v33, %v12870_v31  ;;  %v5054_v61 = vmax.f32 %v4958_v32, 0.0  ;;  %v5309_v50 = vmul.f32 %v5152_v23, %v5053_v38 }
 0x512   : > { %v4626_v43 = vpop.f32.mrf.mxu1  ;;  %v10753_v37 = vpop.f32.mrf.mxu0 }
 0x513   : > { %v5056_v44 = vmax.f32 %v4960_v26, 0.0  ;;  %v4961_v47 = vadd.f32 %v12862_v63, %v4626_v43  ;;  %v10754_v45 = vadd.f32 %v10753_v37, %v10752_v35  ;;  %v5055_v55 = vmax.f32 %v4959_v40, 0.0 }
 0x514   : > { %v4630_v48 = vpop.f32.mrf.mxu1  ;;  %v10755_v49 = vpop.f32.mrf.mxu0  ;;  %v5310_v1 = vmul.f32 %v5152_v23, %v5054_v61 }
 0x515   : > { %v5057_v51 = vmax.f32 %v4961_v47, 0.0  ;;  %v5312_v60 = vmul.f32 %v5157_v39, %v5056_v44  ;;  %v4963_v52 = vadd.f32 %v12855_v7, %v4630_v48  ;;  %v4962_v57 = vadd.f32 %v10754_v45, %v12870_v31 }
 0x516   : > { %v4632_v58 = vpop.f32.mrf.mxu1  ;;  %v10756_v59 = vpop.f32.mrf.mxu0  ;;  %v5311_v18 = vmul.f32 %v5152_v23, %v5055_v55 }
 0x517   : > { %v5313_v13 = vmul.f32 %v5157_v39, %v5057_v51  ;;  %v5405_v36 = vmax.f32 %v5309_v50, %v5312_v60  ;;  %v4964_v2 = vadd.f32 %v12862_v63, %v4632_v58  ;;  %v5058_v3 = vmax.f32 %v4962_v57, 0.0 }
 0x518   : > { %v10757_v54 = vadd.f32 %v10756_v59, %v10755_v49  ;;  %v4634_v4 = vpop.f32.mrf.mxu1  ;;  %v10758_v6 = vpop.f32.mrf.mxu0  ;;  %v5059_v10 = vmax.f32 %v4963_v52, 0.0 }
 0x519   : > { %v5406_v5 = vrot.slane %v5405_v36, 4  ;;  %v5412_v9 = vmax.f32 %v5310_v1, %v5313_v13  ;;  %v5314_v15 = vmul.f32 %v5157_v39, %v5058_v3  ;;  %v4966_v16 = vadd.f32 %v12855_v7, %v4634_v4  ;;  %v12895_v49 = vpop.permute.xlu1 %5246 }
 0x51a   : > { %v4965_v17 = vadd.f32 %v10757_v54, %v12870_v31  ;;  %v4636_v30 = vpop.f32.mrf.mxu1  ;;  %v10759_v20 = vpop.f32.mrf.mxu0  ;;  %v5060_v24 = vmax.f32 %v4964_v2, 0.0  ;;  %v5315_v35 = vmul.f32 %v12866_v28, %v5059_v10 }
 0x51b   : > { %v5407_v21 = vmax.f32 %v5405_v36, %v5406_v5  ;;  %v5413_v22 = vrot.slane %v5412_v9, 4  ;;  %v4967_v46 = vadd.f32 %v12862_v63, %v4636_v30  ;;  %v5419_v27 = vmax.f32 %v5311_v18, %v5314_v15  ;;  %v12900_v36 = vpop.permute.xlu0 %5241  ;;  %v11379_v18 = vld [vmem:[%s12176_s6 + $0x10] ss:$8 sps:$4 sm:$0xff]   ;;  %v11381_v15 = vld [vmem:[%s12176_s6 + $0x14] ss:$8 sps:$4 sm:$0xff]  }
 0x51c   : > { %v5062_v29 = vmax.f32 %v4966_v16, 0.0  ;;  %v10760_v42 = vadd.f32 %v10759_v20, %v10758_v6  ;;  %v4640_v32 = vpop.f32.mrf.mxu1  ;;  %v10761_v23 = vpop.f32.mrf.mxu0  ;;  %v5061_v39 = vmax.f32 %v4965_v17, 0.0  ;;  %v5316_v45 = vmul.f32 %v12866_v28, %v5060_v24  ;;  %6252 = vmatprep.subr.bf16.mxu1 %v11381_v15  ;;  %v11387_v15 = vld [vmem:[%s12176_s6 + $0x4] ss:$8 sps:$4 sm:$0xff]  }
 0x51d   : > { %v5408_v33 = vrot.slane %v5407_v21, 2  ;;  %v5414_v34 = vmax.f32 %v5412_v9, %v5413_v22  ;;  %v5063_v38 = vmax.f32 %v4967_v46, 0.0  ;;  %v5420_v26 = vrot.slane %v5419_v27, 4  ;;  %v11384_v22 = vld [vmem:[%s12176_s6 + $0x144] ss:$8 sps:$4 sm:$0xff]   ;;  %6253 = vmatpush1.bf16.msra.mxu1 %v11379_v18 }
 0x51e   : > { %v5318_v40 = vmul.f32 %v12876_v41, %v5062_v29  ;;  %v4968_v43 = vadd.f32 %v10760_v42, %v12870_v31  ;;  %v4642_v37 = vpop.f32.mrf.mxu1  ;;  %v10762_v61 = vpop.f32.mrf.mxu0  ;;  %v12898_v52 = vadd.f32 %v12855_v7, %v4640_v32  ;;  %v5317_v56 = vmul.f32 %v12866_v28, %v5061_v39  ;;  %6289 = vmatprep.subr.bf16.mxu0 %v11384_v22 }
 0x51f   : > { %v5409_v44 = vmax.f32 %v5407_v21, %v5408_v33  ;;  %v5415_v47 = vrot.slane %v5414_v34, 2  ;;  %v5319_v48 = vmul.f32 %v12876_v41, %v5063_v38  ;;  %v5421_v50 = vmax.f32 %v5419_v27, %v5420_v26  ;;  %v5177_v42 = vpop.permute.xlu1 %5176  ;;  %6254 = vmatprep.subr.bf16.mxu1 %v11387_v15 }
 0x520   : > { %v5426_v51 = vmax.f32 %v5315_v35, %v5318_v40  ;;  %v5064_v60 = vmax.f32 %v4968_v43, 0.0  ;;  %v4644_v55 = vpop.f32.mrf.mxu1  ;;  %v10764_v57 = vpop.f32.mrf.mxu0  ;;  %v10763_v13 = vadd.f32 %v10762_v61, %v10761_v23  ;;  %v4970_v10 = vadd.f32 %v12862_v63, %v4642_v37 }
 0x521   : > { %v5410_v58 = vrot.slane %v5409_v44, 1  ;;  %v5416_v59 = vmax.f32 %v5414_v34, %v5415_v47  ;;  %v5433_v1 = vmax.f32 %v5316_v45, %v5319_v48  ;;  %v5422_v2 = vrot.slane %v5421_v50, 2  ;;  %v5172_v37 = vpop.permute.xlu0 %5171 }
 0x522   : > { %v5427_v62 = vrot.slane %v5426_v51, 4  ;;  %v5320_v3 = vmul.f32 %v12876_v41, %v5064_v60  ;;  %v4646_v54 = vpop.f32.mrf.mxu1  ;;  %v10765_v4 = vpop.f32.mrf.mxu0  ;;  %v4972_v28 = vadd.f32 %v12855_v7, %v4644_v55  ;;  %v11382_v41 = vld [vmem:[%s12176_s6 + $0x140] ss:$8 sps:$4 sm:$0xff]   ;;  %v5065_v27 = vmax.f32 %v12898_v52, 0.0 }
 0x523   : > { %v12904_v6 = vmax.f32 %v5409_v44, %v5410_v58  ;;  %v5417_v5 = vrot.slane %v5416_v59, 1  ;;  %v5434_v9 = vrot.slane %v5433_v1, 4  ;;  %v5423_v17 = vmax.f32 %v5421_v50, %v5422_v2  ;;  %6290 = vmatpush1.bf16.msra.mxu0 %v11382_v41  ;;  %v12935_v41 = vpop.permute.xlu1 %5256 }
 0x524   : > { %v5428_v16 = vmax.f32 %v5426_v51, %v5427_v62  ;;  %v5440_v30 = vmax.f32 %v5317_v56, %v5320_v3  ;;  %v4650_v20 = vpop.f32.mrf.mxu1  ;;  %v12910_v21 = vpop.f32.mrf.mxu0  ;;  %v4971_v29 = vadd.f32 %v10763_v13, %v12870_v31  ;;  %v5068_v34 = vmax.f32 %v4972_v28, 0.0  ;;  %14119 = vst [vmem:[#allocation19_spill] sm:$0xff] %v12935_v41 }
 0x525   : > { %v12914_v24 = vmax.f32 %v5416_v59, %v5417_v5  ;;  %v5435_v46 = vmax.f32 %v5433_v1, %v5434_v9  ;;  %v5424_v32 = vrot.slane %v5423_v17, 1  ;;  %v5741_v26 = vpack.c.bf16 %v12904_v6, %v12904_v6  ;;  %v12937_v22 = vpop.permute.xlu0 %5251 }
 0x526   : > { %v5429_v23 = vrot.slane %v5428_v16, 2  ;;  %v5441_v33 = vrot.slane %v5440_v30, 4  ;;  %v4652_v35 = vpop.f32.mrf.mxu1  ;;  %v12918_v38 = vpop.f32.mrf.mxu0  ;;  %v5066_v40 = vmax.f32 %v4970_v10, 0.0  ;;  %v4973_v43 = vadd.f32 %v12862_v63, %v4646_v54  ;;  %14120 = vst [vmem:[#allocation20_spill] sm:$0xff] %v12937_v22 }
 0x527   : > { %v5436_v39 = vrot.slane %v5435_v46, 2  ;;  %v5425_v61 = vmax.f32 %v5423_v17, %v5424_v32  ;;  %v10766_v45 = vadd.f32 %v10765_v4, %v10764_v57  ;;  %v5067_v60 = vmax.f32 %v4971_v29, 0.0 }
 0x528   : > { %v5430_v44 = vmax.f32 %v5428_v16, %v5429_v23  ;;  %v5442_v47 = vmax.f32 %v5440_v30, %v5441_v33  ;;  %v4654_v48 = vpop.f32.mrf.mxu1  ;;  %v12923_v50 = vpop.f32.mrf.mxu0  ;;  %v5069_v52 = vmax.f32 %v4973_v43, 0.0  ;;  %v5324_v55 = vmul.f32 %v5177_v42, %v5068_v34 }
 0x529   : > { %v5437_v51 = vmax.f32 %v5435_v46, %v5436_v39  ;;  %v5742_v58 = vpack.c.bf16 %v12914_v24, %v12914_v24  ;;  %v4974_v13 = vadd.f32 %v10766_v45, %v12870_v31  ;;  %v5321_v57 = vmul.f32 %v5172_v37, %v5065_v27  ;;  %v11385_v24 = vld [vmem:[%s12176_s6] ss:$8 sps:$4 sm:$0xff]  }
 0x52a   : > { %v5431_v59 = vrot.slane %v5430_v44, 1  ;;  %v5443_v1 = vrot.slane %v5442_v47, 2  ;;  %v4656_v2 = vpop.f32.mrf.mxu1  ;;  %v10771_v56 = vpop.f32.mrf.mxu0  ;;  %v5325_v3 = vmul.f32 %v5177_v42, %v5069_v52  ;;  %v5322_v54 = vmul.f32 %v5172_v37, %v5066_v40  ;;  %6255 = vmatpush1.bf16.msra.mxu1 %v11385_v24  ;;  %v11390_v24 = vld [vmem:[%s12176_s6 + $0xf4] ss:$8 sps:$4 sm:$0xff]  }
 0x52b   : > { %v5438_v62 = vrot.slane %v5437_v51, 1  ;;  %v5743_v4 = vpack.c.bf16 %v5425_v61, %v5425_v61  ;;  %v5070_v9 = vmax.f32 %v4974_v13, 0.0  ;;  %v5323_v16 = vmul.f32 %v5172_v37, %v5067_v60  ;;  %6256 = vmatprep.subr.bf16.mxu1 %v11390_v24 }
 0x52c   : > { %v5432_v6 = vmax.f32 %v5430_v44, %v5431_v59  ;;  %v5444_v5 = vmax.f32 %v5442_v47, %v5443_v1  ;;  %v12928_v10 = vpop.f32.mrf.mxu1  ;;  %v12930_v18 = vpop.f32.mrf.mxu0  ;;  %v5447_v30 = vmax.f32 %v5321_v57, %v5324_v55  ;;  %v12933_v28 = vmax.f32 %v5322_v54, %v5325_v3 }
 0x52d   : > { %v5439_v17 = vmax.f32 %v5437_v51, %v5438_v62  ;;  %v5326_v29 = vmul.f32 %v5177_v42, %v5070_v9  ;;  %v4975_v32 = vadd.f32 %v12855_v7, %v4650_v20  ;;  %v5897_v34 = vunpack.c.l.b16 %v5741_v26  ;;  %v5187_v54 = vpop.permute.xlu1 %5186 }
 0x52e   : > { %v5744_v46 = vpack.c.bf16 %v5432_v6, %v5432_v6  ;;  %v5445_v27 = vrot.slane %v5444_v5, 1  ;;  %v12941_v23 = vpop.f32.mrf.mxu1  ;;  %v12943_v33 = vpop.f32.mrf.mxu0  ;;  %v5448_v40 = vrot.slane %v5447_v30, 4  ;;  %v4976_v43 = vadd.f32 %v12862_v63, %v4652_v35 }
 0x52f   : > { %v5745_v39 = vpack.c.bf16 %v5439_v17, %v5439_v17  ;;  %v5898_v37 = vunpack.c.l.b16 %v5742_v58  ;;  %v5461_v47 = vmax.f32 %v5323_v16, %v5326_v29  ;;  %v5899_v20 = vunpack.c.l.b16 %v5743_v4  ;;  %v5182_v4 = vpop.permute.xlu0 %5181 }
 0x530   : > { %v5900_v61 = vunpack.c.l.b16 %v5744_v46  ;;  %v5446_v44 = vmax.f32 %v5444_v5, %v5445_v27  ;;  %v12946_v45 = vpop.f32.mrf.mxu1  ;;  %v12948_v42 = vpop.f32.mrf.mxu0  ;;  %v5449_v60 = vmax.f32 %v5447_v30, %v5448_v40  ;;  %v5071_v52 = vmax.f32 %v4975_v32, 0.0 }
 0x531   : > { %v5901_v51 = vunpack.c.l.b16 %v5745_v39  ;;  %v5462_v59 = vrot.slane %v5461_v47, 4  ;;  %v10769_v35 = vadd.f32 %v12918_v38, %v12910_v21  ;;  %v5072_v3 = vmax.f32 %v4976_v43, 0.0 }
 0x532   : > { %v12951_v55 = vsel %vm5945_vm2, %v5900_v61, %v5897_v34  ;;  %v5746_v26 = vpack.c.bf16 %v5446_v44, %v5446_v44  ;;  %v12955_v58 = vpop.f32.mrf.mxu1  ;;  %v12957_v1 = vpop.f32.mrf.mxu0  ;;  %v5450_v62 = vrot.slane %v5449_v60, 2  ;;  %v4978_v57 = vadd.f32 %v12855_v7, %v4654_v48  ;;  %v11388_v34 = vld [vmem:[%s12176_s6 + $0xf0] ss:$8 sps:$4 sm:$0xff]  }
 0x533   : > { %v12960_v13 = vsel %vm5945_vm2, %v5901_v51, %v5898_v37  ;;  %v5463_v5 = vmax.f32 %v5461_v47, %v5462_v59  ;;  %v4977_v9 = vadd.f32 %v10769_v35, %v12870_v31  ;;  %v4979_v21 = vadd.f32 %v12862_v63, %v4656_v2  ;;  %6257 = vmatpush2.bf16.msra.mxu1 %v11388_v34  ;;  %v12987_v59 = vpop.permute.xlu0 %5261 }
 0x534   : > { %14121 = vst [vmem:[#allocation21_spill] sm:$0xff] %v12960_v13  ;;  %v5902_v6 = vunpack.c.l.b16 %v5746_v26  ;;  %v12965_v38 = vpop.f32.mrf.mxu1  ;;  %v12967_v15 = vpop.f32.mrf.mxu0  ;;  %v5451_v17 = vmax.f32 %v5449_v60, %v5450_v62  ;;  %v5074_v16 = vmax.f32 %v4978_v57, 0.0  ;;  %v10772_v30 = vadd.f32 %v10771_v56, %v12923_v50  ;;  %14123 = vst [vmem:[#allocation23_spill] sm:$0xff] %v12987_v59  ;;  %v11403_v13 = vld [vmem:[%s12176_s6 + $0xc0] ss:$8 sps:$4 sm:$0xff]  }
 0x535   : > { %v5464_v46 = vrot.slane %v5463_v5, 2  ;;  %v5075_v27 = vmax.f32 %v4979_v21, 0.0  ;;  %v5073_v39 = vmax.f32 %v4977_v9, 0.0  ;;  %v5327_v50 = vmul.f32 %v5182_v4, %v5071_v52  ;;  %v12985_v26 = vpop.permute.xlu1 %5266  ;;  %v11393_v9 = vld [vmem:[%s12176_s6 + $0x134] ss:$8 sps:$4 sm:$0xff]  }
 0x536   : > { %v12972_v48 = vsel %vm5945_vm2, %v5902_v6, %v5899_v20  ;;  %v12974_v29 = vpop.f32.mrf.mxu1  ;;  %v12976_v32 = vpop.f32.mrf.mxu0  ;;  %v5452_v2 = vrot.slane %v5451_v17, 1  ;;  %v4980_v40 = vadd.f32 %v10772_v30, %v12870_v31  ;;  %v5330_v43 = vmul.f32 %v5187_v54, %v5074_v16  ;;  %14122 = vst [vmem:[#allocation22_spill] sm:$0xff] %v12985_v26  ;;  %6291 = vmatprep.subr.bf16.mxu0 %v11393_v9  ;;  %v11406_v26 = vld [vmem:[%s12176_s6 + $0xb0] ss:$8 sps:$4 sm:$0xff]   ;;  %v11412_v59 = vld [vmem:[%s12176_s6 + $0xa0] ss:$8 sps:$4 sm:$0xff]  }
 0x537   : > { %v5465_v37 = vmax.f32 %v5463_v5, %v5464_v46  ;;  %v5331_v61 = vmul.f32 %v5187_v54, %v5075_v27  ;;  %v5328_v56 = vmul.f32 %v5182_v4, %v5072_v3  ;;  %v5455_v51 = vrot.slane %v12933_v28, 4  ;;  %v11391_v5 = vld [vmem:[%s12176_s6 + $0x130] ss:$8 sps:$4 sm:$0xff]  }
 0x538   : > { %v12980_v44 = vpop.f32.mrf.mxu1  ;;  %v12982_v47 = vpop.f32.mrf.mxu0  ;;  %v5453_v20 = vmax.f32 %v5451_v17, %v5452_v2  ;;  %v5076_v60 = vmax.f32 %v4980_v40, 0.0  ;;  %v5468_v62 = vmax.f32 %v5327_v50, %v5330_v43  ;;  %v4981_v52 = vadd.f32 %v12855_v7, %v12928_v10  ;;  %6292 = vmatpush1.bf16.msra.mxu0 %v11391_v5  ;;  %v11396_v43 = vld [vmem:[%s12176_s6 + $0xe4] ss:$8 sps:$4 sm:$0xff]   ;;  %v11394_v50 = vld [vmem:[%s12176_s6 + $0xe0] ss:$8 sps:$4 sm:$0xff]  }
 0x539   : > { %v5466_v35 = vrot.slane %v5465_v37, 1  ;;  %v12989_v57 = vmax.f32 %v5328_v56, %v5331_v61  ;;  %v5329_v16 = vmul.f32 %v5182_v4, %v5073_v39  ;;  %v4982_v46 = vadd.f32 %v12862_v63, %v12941_v23  ;;  %6258 = vmatprep.subr.bf16.mxu1 %v11396_v43 }
 0x53a   : > { %v12993_v3 = vpop.f32.mrf.mxu1  ;;  %v12995_v6 = vpop.f32.mrf.mxu0  ;;  %v5747_v21 = vpack.c.bf16 %v5453_v20, %v5453_v20  ;;  %v5332_v17 = vmul.f32 %v5187_v54, %v5076_v60  ;;  %v5469_v24 = vrot.slane %v5468_v62, 4  ;;  %v5456_v34 = vmax.f32 %v12933_v28, %v5455_v51  ;;  %6259 = vmatpush2.bf16.msra.mxu1 %v11394_v50 }
 0x53b   : > { %v5467_v30 = vmax.f32 %v5465_v37, %v5466_v35  ;;  %v5077_v39 = vmax.f32 %v4981_v52, 0.0  ;;  %v10775_v37 = vadd.f32 %v12943_v33, %v12930_v18  ;;  %v4984_v20 = vadd.f32 %v12855_v7, %v12946_v45  ;;  %v5197_v60 = vpop.permute.xlu1 %5196  ;;  %v5192_v35 = vpop.permute.xlu0 %5191 }
 0x53c   : > { %v13001_v27 = vpop.f32.mrf.mxu1  ;;  %v13003_v10 = vpop.f32.mrf.mxu0  ;;  %v5903_v2 = vunpack.c.l.b16 %v5747_v21  ;;  %v5482_v40 = vmax.f32 %v5329_v16, %v5332_v17  ;;  %v5470_v4 = vmax.f32 %v5468_v62, %v5469_v24  ;;  %v4985_v51 = vadd.f32 %v12862_v63, %v12955_v58 }
 0x53d   : > { %v5749_v54 = vpack.c.bf16 %v5467_v30, %v5467_v30  ;;  %v5078_v62 = vmax.f32 %v4982_v46, 0.0  ;;  %v4983_v52 = vadd.f32 %v10775_v37, %v12870_v31  ;;  %v5080_v21 = vmax.f32 %v4984_v20, 0.0 }
 0x53e   : > { %v13009_v61 = vpop.f32.mrf.mxu1  ;;  %v13011_v23 = vpop.f32.mrf.mxu0  ;;  %v13016_v56 = vsel %vm5947_vm3, %v5903_v2, %v12951_v55  ;;  %v5483_v28 = vrot.slane %v5482_v40, 4  ;;  %v5471_v33 = vrot.slane %v5470_v4, 2  ;;  %v5081_v17 = vmax.f32 %v4985_v51, 0.0 }
 0x53f   : > { %v5905_v18 = vunpack.c.l.b16 %v5749_v54  ;;  %v10778_v45 = vadd.f32 %v12957_v1, %v12948_v42  ;;  %v5476_v30 = vrot.slane %v12989_v57, 4  ;;  %v5079_v24 = vmax.f32 %v4983_v52, 0.0 }
 0x540   : > { %v13023_v5 = vpop.f32.mrf.mxu1  ;;  %v13025_v9 = vpop.f32.mrf.mxu0  ;;  %v5484_v55 = vmax.f32 %v5482_v40, %v5483_v28  ;;  %v5472_v16 = vmax.f32 %v5470_v4, %v5471_v33  ;;  %v5336_v54 = vmul.f32 %v5197_v60, %v5080_v21  ;;  %v5337_v37 = vmul.f32 %v5197_v60, %v5081_v17 }
 0x541   : > { %v13031_v58 = vsel %vm5947_vm3, %v5905_v18, %v12972_v48  ;;  %v4986_v40 = vadd.f32 %v10778_v45, %v12870_v31  ;;  %v5457_v50 = vrot.slane %v5456_v34, 2  ;;  %v5333_v1 = vmul.f32 %v5192_v35, %v5077_v39  ;;  %v13043_v18 = vpop.permute.xlu1 %5276  ;;  %v13045_v33 = vpop.permute.xlu0 %5271 }
 0x542   : > { %v13034_v46 = vpop.f32.mrf.mxu1  ;;  %v13036_v2 = vpop.f32.mrf.mxu0  ;;  %v5485_v43 = vrot.slane %v5484_v55, 2  ;;  %v5473_v42 = vrot.slane %v5472_v16, 1  ;;  %v5334_v28 = vmul.f32 %v5192_v35, %v5078_v62  ;;  %14124 = vst [vmem:[#allocation24_spill] sm:$0xff] %v13043_v18  ;;  %14125 = vst [vmem:[#allocation25_spill] sm:$0xff] %v13045_v33  ;;  %v13048_v21 = vmax.f32 %v12989_v57, %v5476_v30  ;;  %v11399_v62 = vld [vmem:[%s12176_s6 + $0xd4] ss:$8 sps:$4 sm:$0xff]  }
 0x543   : > { %v5082_v51 = vmax.f32 %v4986_v40, 0.0  ;;  %v5489_v17 = vmax.f32 %v5333_v1, %v5336_v54  ;;  %v5335_v8 = vmul.f32 %v5192_v35, %v5079_v24  ;;  %v13058_v40 = vmax.f32 %v5456_v34, %v5457_v50  ;;  %6260 = vmatprep.subr.bf16.mxu1 %v11399_v62  ;;  %v11402_v18 = vld [vmem:[%s12176_s6 + $0x124] ss:$8 sps:$4 sm:$0xff]   ;;  %v11408_v33 = vld [vmem:[%s12176_s6 + $0xb4] ss:$8 sps:$4 sm:$0xff]  }
 0x544   : > { %v13039_v48 = vpop.f32.mrf.mxu1  ;;  %v13041_v4 = vpop.f32.mrf.mxu0  ;;  %v5486_v20 = vmax.f32 %v5484_v55, %v5485_v43  ;;  %v5474_v52 = vmax.f32 %v5472_v16, %v5473_v42  ;;  %v5496_v45 = vmax.f32 %v5334_v28, %v5337_v37  ;;  %v4987_v55 = vadd.f32 %v12855_v7, %v12965_v38  ;;  %v11397_v43 = vld [vmem:[%s12176_s6 + $0xd0] ss:$8 sps:$4 sm:$0xff]   ;;  %6293 = vmatprep.subr.bf16.mxu0 %v11402_v18 }
 0x545   : > { %v5338_v19 = vmul.f32 %v5197_v60, %v5082_v51  ;;  %v5490_v57 = vrot.slane %v5489_v17, 4  ;;  %v4988_v60 = vadd.f32 %v12862_v63, %v12974_v29  ;;  %v10781_v35 = vadd.f32 %v12976_v32, %v12967_v15  ;;  %6261 = vmatpush2.bf16.msra.mxu1 %v11397_v43  ;;  %v5202_v29 = vpop.permute.xlu0 %5201 }
 0x546   : > { %v13050_v0 = vpop.f32.mrf.mxu1  ;;  %v13052_v39 = vpop.f32.mrf.mxu0  ;;  %v5487_v53 = vrot.slane %v5486_v20, 1  ;;  %v5750_v16 = vpack.c.bf16 %v5474_v52, %v5474_v52  ;;  %v5478_v38 = vrot.slane %v13048_v21, 2  ;;  %v5497_v50 = vrot.slane %v5496_v45, 4 }
 0x547   : > { %v5503_v42 = vmax.f32 %v5335_v8, %v5338_v19  ;;  %v5491_v24 = vmax.f32 %v5489_v17, %v5490_v57  ;;  %v4990_v8 = vadd.f32 %v12855_v7, %v12980_v44  ;;  %v5207_v19 = vpop.permute.xlu1 %5206  ;;  %v4991_v17 = vadd.f32 %v12862_v63, %v12993_v3 }
 0x548   : > { %v13060_v30 = vpop.f32.mrf.mxu1  ;;  %v13062_v54 = vpop.f32.mrf.mxu0  ;;  %v5488_v37 = vmax.f32 %v5486_v20, %v5487_v53  ;;  %v5906_v34 = vunpack.c.l.b16 %v5750_v16  ;;  %v5083_v53 = vmax.f32 %v4987_v55, 0.0  ;;  %v4989_v20 = vadd.f32 %v10781_v35, %v12870_v31 }
 0x549   : > { %v5504_v52 = vrot.slane %v5503_v42, 4  ;;  %v5492_v32 = vrot.slane %v5491_v24, 2  ;;  %v5084_v16 = vmax.f32 %v4988_v60, 0.0  ;;  %v5086_v57 = vmax.f32 %v4990_v8, 0.0 }
 0x54a   : > { %v13069_v1 = vpop.f32.mrf.mxu1  ;;  %v13071_v28 = vpop.f32.mrf.mxu0  ;;  %v5752_v51 = vpack.c.bf16 %v5488_v37, %v5488_v37  ;;  %v13077_v15 = vsel %vm5949_vm4, %v5906_v34, %v13016_v56  ;;  %v11405_v37 = vld [vmem:[%s12176_s6 + $0xc4] ss:$8 sps:$4 sm:$0xff]   ;;  %v13087_v56 = vmax.f32 %v5496_v45, %v5497_v50  ;;  %v5087_v34 = vmax.f32 %v4991_v17, 0.0 }
 0x54b   : > { %v5505_v44 = vmax.f32 %v5503_v42, %v5504_v52  ;;  %v5493_v12 = vmax.f32 %v5491_v24, %v5492_v32  ;;  %v10784_v35 = vadd.f32 %v12995_v6, %v12982_v47  ;;  %v5342_v60 = vmul.f32 %v5207_v19, %v5086_v57  ;;  %6262 = vmatprep.subr.bf16.mxu1 %v11405_v37 }
 0x54c   : > { %v13082_v62 = vpop.f32.mrf.mxu1  ;;  %v13084_v43 = vpop.f32.mrf.mxu0  ;;  %v5908_v55 = vunpack.c.l.b16 %v5752_v51  ;;  %v5339_v45 = vmul.f32 %v5202_v29, %v5083_v53  ;;  %v5085_v50 = vmax.f32 %v4989_v20, 0.0  ;;  %v5343_v6 = vmul.f32 %v5207_v19, %v5087_v34  ;;  %6263 = vmatpush2.bf16.msra.mxu1 %v11403_v13 }
 0x54d   : > { %v5506_v42 = vrot.slane %v5505_v44, 2  ;;  %v5494_v24 = vrot.slane %v5493_v12, 1  ;;  %v4992_v47 = vadd.f32 %v10784_v35, %v12870_v31  ;;  %v13111_v20 = vadd.f32 %v12855_v7, %v13001_v27  ;;  %v13113_v34 = vpop.permute.xlu1 %5286  ;;  %v13115_v35 = vpop.permute.xlu0 %5281  ;;  %6264 = vmatprep.subr.bf16.mxu1 %v11408_v33 }
 0x54e   : > { %v13091_v11 = vpop.f32.mrf.mxu1  ;;  %v13093_v3 = vpop.f32.mrf.mxu0  ;;  %v13098_v51 = vsel %vm5949_vm4, %v5908_v55, %v13031_v58  ;;  %v5340_v58 = vmul.f32 %v5202_v29, %v5084_v16  ;;  %v5510_v17 = vmax.f32 %v5339_v45, %v5342_v60  ;;  %v11400_v55 = vld [vmem:[%s12176_s6 + $0x120] ss:$8 sps:$4 sm:$0xff]   ;;  %14126 = vst [vmem:[#allocation26_spill] sm:$0xff] %v13113_v34  ;;  %14127 = vst [vmem:[#allocation27_spill] sm:$0xff] %v13115_v35  ;;  %v5499_v27 = vrot.slane %v13087_v56, 2 }
 0x54f   : > { %v5507_v32 = vmax.f32 %v5505_v44, %v5506_v42  ;;  %v5495_v57 = vmax.f32 %v5493_v12, %v5494_v24  ;;  %v5088_v37 = vmax.f32 %v4992_v47, 0.0  ;;  %v13119_v13 = vmax.f32 %v13048_v21, %v5478_v38  ;;  %6294 = vmatpush1.bf16.msra.mxu0 %v11400_v55 }
 0x550   : > { %v13101_v52 = vpop.f32.mrf.mxu1  ;;  %v13103_v8 = vpop.f32.mrf.mxu0  ;;  %v5511_v16 = vrot.slane %v5510_v17, 4  ;;  %v5517_v42 = vmax.f32 %v5340_v58, %v5343_v6  ;;  %v5341_v47 = vmul.f32 %v5202_v29, %v5085_v50  ;;  %6265 = vmatpush2.bf16.msra.mxu1 %v11406_v26  ;;  %v4994_v6 = vadd.f32 %v12862_v63, %v13009_v61  ;;  %v11414_v58 = vld [vmem:[%s12176_s6 + $0xa4] ss:$8 sps:$4 sm:$0xff]  }
 0x551   : > { %v5508_v44 = vrot.slane %v5507_v32, 1  ;;  %v5753_v45 = vpack.c.bf16 %v5495_v57, %v5495_v57  ;;  %v5344_v24 = vmul.f32 %v5207_v19, %v5088_v37  ;;  %v5089_v18 = vmax.f32 %v13111_v20, 0.0  ;;  %6266 = vmatprep.subr.bf16.mxu1 %v11414_v58  ;;  %v5212_v55 = vpop.permute.xlu0 %5211 }
 0x552   : > { %v13121_v60 = vpop.f32.mrf.mxu1  ;;  %v13123_v12 = vpop.f32.mrf.mxu0  ;;  %v5512_v38 = vmax.f32 %v5510_v17, %v5511_v16  ;;  %v5518_v53 = vrot.slane %v5517_v42, 4  ;;  %v10787_v33 = vadd.f32 %v13011_v23, %v13003_v10  ;;  %v4996_v26 = vadd.f32 %v12855_v7, %v13023_v5  ;;  %v11417_v16 = vld [vmem:[%s12176_s6 + $0x94] ss:$8 sps:$4 sm:$0xff]  }
 0x553   : > { %v5509_v21 = vmax.f32 %v5507_v32, %v5508_v44  ;;  %v5909_v34 = vunpack.c.l.b16 %v5753_v45  ;;  %v5524_v35 = vmax.f32 %v5341_v47, %v5344_v24  ;;  %v4997_v17 = vadd.f32 %v12862_v63, %v13034_v46  ;;  %v5217_v5 = vpop.permute.xlu1 %5216  ;;  %v11411_v24 = vld [vmem:[%s12176_s6 + $0x114] ss:$8 sps:$4 sm:$0xff]   ;;  %v11415_v47 = vld [vmem:[%s12176_s6 + $0x90] ss:$8 sps:$4 sm:$0xff]  }
 0x554   : > { %v5513_v19 = vrot.slane %v5512_v38, 2  ;;  %v5519_v29 = vmax.f32 %v5517_v42, %v5518_v53  ;;  %v13135_v50 = vpop.f32.mrf.mxu1  ;;  %v13137_v32 = vpop.f32.mrf.mxu0  ;;  %v4995_v23 = vadd.f32 %v10787_v33, %v12870_v31  ;;  %6267 = vmatpush2.bf16.msra.mxu1 %v11412_v59  ;;  %v5090_v20 = vmax.f32 %v4994_v6, 0.0  ;;  %v11409_v33 = vld [vmem:[%s12176_s6 + $0x110] ss:$8 sps:$4 sm:$0xff]   ;;  %6295 = vmatprep.subr.bf16.mxu0 %v11411_v24  ;;  %v11418_v24 = vld [vmem:[%s12176_s6 + $0x80] ss:$8 sps:$4 sm:$0xff]  }
 0x555   : > { %v5755_v57 = vpack.c.bf16 %v5509_v21, %v5509_v21  ;;  %v13141_v61 = vsel %vm5951_vm5, %v5909_v34, %v13077_v15  ;;  %v5525_v10 = vrot.slane %v5524_v35, 4  ;;  %v5092_v44 = vmax.f32 %v4996_v26, 0.0  ;;  %6268 = vmatprep.subr.bf16.mxu1 %v11417_v16  ;;  %6296 = vmatpush1.bf16.msra.mxu0 %v11409_v33 }
 0x556   : > { %v5514_v37 = vmax.f32 %v5512_v38, %v5513_v19  ;;  %v5520_v15 = vrot.slane %v5519_v29, 2  ;;  %v5093_v42 = vmax.f32 %v4997_v17, 0.0  ;;  %v10790_v45 = vadd.f32 %v13036_v2, %v13025_v9  ;;  %v13155_v38 = vpop.f32.mrf.mxu1  ;;  %v13157_v6 = vpop.f32.mrf.mxu0  ;;  %v11420_v17 = vld [vmem:[%s12176_s6 + $0x84] ss:$8 sps:$4 sm:$0xff]  }
 0x557   : > { %v5911_v53 = vunpack.c.l.b16 %v5755_v57  ;;  %v5526_v34 = vmax.f32 %v5524_v35, %v5525_v10  ;;  %v5091_v59 = vmax.f32 %v4995_v23, 0.0  ;;  %v5348_v58 = vmul.f32 %v5217_v5, %v5092_v44 }
 0x558   : > { %v5515_v21 = vrot.slane %v5514_v37, 1  ;;  %v4998_v57 = vadd.f32 %v10790_v45, %v12870_v31  ;;  %v5349_v9 = vmul.f32 %v5217_v5, %v5093_v42  ;;  %v5345_v2 = vmul.f32 %v5212_v55, %v5089_v18  ;;  %6269 = vmatpush2.bf16.msra.mxu1 %v11415_v47  ;;  %v13169_v42 = vpop.permute.xlu1 %5296  ;;  %v13171_v45 = vpop.permute.xlu0 %5291  ;;  %v11421_v47 = vld [vmem:[%s12176_s6 + $0x100] ss:$8 sps:$4 sm:$0xff]  }
 0x559   : > { %v13153_v46 = vsel %vm5951_vm5, %v5911_v53, %v13098_v51  ;;  %v5527_v35 = vrot.slane %v5526_v34, 2  ;;  %v14128_v51 = vrot.slane %v13058_v40, 1  ;;  %v5480_v26 = vrot.slane %v13119_v13, 1  ;;  %6270 = vmatprep.subr.bf16.mxu1 %v11420_v17 }
 0x55a   : > { %v5516_v10 = vmax.f32 %v5514_v37, %v5515_v21  ;;  %v5346_v23 = vmul.f32 %v5212_v55, %v5090_v20  ;;  %v5500_v53 = vmax.f32 %v13087_v56, %v5499_v27  ;;  %v5094_v16 = vmax.f32 %v4998_v57, 0.0  ;;  %v13175_v37 = vpop.f32.mrf.mxu1  ;;  %v13177_v20 = vpop.f32.mrf.mxu0  ;;  %v11423_v21 = vld [vmem:[%s12176_s6 + $0x104] ss:$8 sps:$4 sm:$0xff]  }
 0x55b   : > { %v13164_v19 = vmax.f32 %v13058_v40, %v14128_v51  ;;  %v5528_v44 = vmax.f32 %v5526_v34, %v5527_v35  ;;  %v5531_v18 = vmax.f32 %v5345_v2, %v5348_v58  ;;  %v5521_v40 = vmax.f32 %v5519_v29, %v5520_v15  ;;  %6297 = vmatprep.subr.bf16.mxu0 %v11423_v21 }
 0x55c   : > { %v5756_v51 = vpack.c.bf16 %v5516_v10, %v5516_v10  ;;  %v5347_v41 = vmul.f32 %v5212_v55, %v5091_v59  ;;  %v5538_v22 = vmax.f32 %v5346_v23, %v5349_v9  ;;  %v5350_v27 = vmul.f32 %v5217_v5, %v5094_v16  ;;  %6271 = vmatpush2.bf16.msra.mxu1 %v11418_v24  ;;  %v11426_v10 = vld [vmem:[%s14129_s0 + $0xe4] ss:$16 sps:$4 sm:$0xff]  }
 0x55d   : > { %v5529_v56 = vrot.slane %v5528_v44, 1  ;;  %v5532_v34 = vrot.slane %v5531_v18, 4  ;;  %v4999_v58 = vadd.f32 %v12855_v7, %v13039_v48  ;;  %v13183_v33 = vmax.f32 %v13119_v13, %v5480_v26  ;;  %6298 = vmatpush1.bf16.msra.mxu0 %v11421_v47  ;;  %v13195_v26 = vpop.f32.mrf.mxu1 }
 0x55e   : > { %v5912_v29 = vunpack.c.l.b16 %v5756_v51  ;;  %v5539_v55 = vrot.slane %v5538_v22, 4  ;;  %v5000_v15 = vadd.f32 %v12862_v63, %v13050_v0  ;;  %v5545_v57 = vmax.f32 %v5347_v41, %v5350_v27  ;;  %v13197_v0 = vpop.f32.mrf.mxu0  ;;  %8109 = vmatprep.subr.bf16.mxu0 %v11426_v10 }
 0x55f   : > { %v5530_v59 = vmax.f32 %v5528_v44, %v5529_v56  ;;  %v5533_v35 = vmax.f32 %v5531_v18, %v5532_v34  ;;  %v10793_v5 = vadd.f32 %v13052_v39, %v13041_v4  ;;  %v5501_v9 = vrot.slane %v5500_v53, 1  ;;  %v5227_v39 = vpop.permute.xlu1 %5226 }
 0x560   : > { %v5522_v48 = vrot.slane %v5521_v40, 1  ;;  %v13191_v13 = vsel %vm5953_vm6, %v5912_v29, %v13141_v61  ;;  %v5002_v2 = vadd.f32 %v12855_v7, %v13060_v30  ;;  %v5546_v41 = vrot.slane %v5545_v57, 4  ;;  %v5222_v30 = vpop.permute.xlu0 %5221  ;;  %v13206_v29 = vpop.f32.mrf.mxu1 }
 0x561   : > { %v5758_v23 = vpack.c.bf16 %v5530_v59, %v5530_v59  ;;  %v5095_v17 = vmax.f32 %v4999_v58, 0.0  ;;  %v5001_v4 = vadd.f32 %v10793_v5, %v12870_v31  ;;  %v5096_v44 = vmax.f32 %v5000_v15, 0.0  ;;  %v13208_v15 = vpop.f32.mrf.mxu0 }
 0x562   : > { %v5098_v16 = vmax.f32 %v5002_v2, 0.0  ;;  %v5003_v61 = vadd.f32 %v12862_v63, %v13069_v1  ;;  %v10796_v18 = vadd.f32 %v13071_v28, %v13062_v54  ;;  %v5534_v47 = vrot.slane %v5533_v35, 2 }
 0x563   : > { %v5914_v24 = vunpack.c.l.b16 %v5758_v23  ;;  %v5540_v51 = vmax.f32 %v5538_v22, %v5539_v55  ;;  %v5547_v21 = vmax.f32 %v5545_v57, %v5546_v41  ;;  %v5097_v56 = vmax.f32 %v5001_v4, 0.0 }
 0x564   : > { %v5099_v27 = vmax.f32 %v5003_v61, 0.0  ;;  %v5004_v34 = vadd.f32 %v10796_v18, %v12870_v31  ;;  %v5354_v58 = vmul.f32 %v5227_v39, %v5098_v16  ;;  %v5502_v59 = vmax.f32 %v5500_v53, %v5501_v9 }
 0x565   : > { %v5523_v1 = vmax.f32 %v5521_v40, %v5522_v48  ;;  %v13212_v54 = vsel %vm5953_vm6, %v5914_v24, %v13153_v46  ;;  %v5351_v28 = vmul.f32 %v5222_v30, %v5095_v17  ;;  %v5748_v22 = vpack.c.bf16 %v13164_v19, %v13164_v19  ;;  %v13218_v48 = vpop.f32.mrf.mxu1  ;;  %v13220_v46 = vpop.f32.mrf.mxu0 }
 0x566   : > { %v5100_v55 = vmax.f32 %v5004_v34, 0.0  ;;  %v5355_v57 = vmul.f32 %v5227_v39, %v5099_v27  ;;  %v5352_v5 = vmul.f32 %v5222_v30, %v5096_v44  ;;  %v5751_v2 = vpack.c.bf16 %v13183_v33, %v13183_v33 }
 0x567   : > { %v5535_v10 = vmax.f32 %v5533_v35, %v5534_v47  ;;  %v5541_v23 = vrot.slane %v5540_v51, 2  ;;  %v5552_v41 = vmax.f32 %v5351_v28, %v5354_v58  ;;  %v5548_v4 = vrot.slane %v5547_v21, 2  ;;  %v13234_v27 = vpop.f32.mrf.mxu0 }
 0x568   : > { %v5356_v53 = vmul.f32 %v5227_v39, %v5100_v55  ;;  %v5353_v40 = vmul.f32 %v5222_v30, %v5097_v56  ;;  %v5559_v9 = vmax.f32 %v5352_v5, %v5355_v57  ;;  %v5754_v17 = vpack.c.bf16 %v5502_v59, %v5502_v59  ;;  %v13232_v56 = vpop.f32.mrf.mxu1 }
 0x569   : > { %v5757_v16 = vpack.c.bf16 %v5523_v1, %v5523_v1  ;;  %v5005_v19 = vadd.f32 %v12855_v7, %v13082_v62  ;;  %v5006_v33 = vadd.f32 %v12862_v63, %v13091_v11  ;;  %v13226_v35 = vunpack.c.l.b16 %v5748_v22 }
 0x56a   : > { %v5566_v44 = vmax.f32 %v5353_v40, %v5356_v53  ;;  %v5536_v61 = vrot.slane %v5535_v10, 1  ;;  %v5542_v18 = vmax.f32 %v5540_v51, %v5541_v23  ;;  %v13228_v39 = vunpack.c.l.b16 %v5751_v2  ;;  %v13247_v23 = vpop.f32.mrf.mxu1 }
 0x56b   : > { %v5549_v30 = vmax.f32 %v5547_v21, %v5548_v4  ;;  %v5553_v24 = vrot.slane %v5552_v41, 4  ;;  %v10799_v47 = vadd.f32 %v13093_v3, %v13084_v43  ;;  %v13236_v62 = vunpack.c.l.b16 %v5754_v17 }
 0x56c   : > { %v13238_v34 = vunpack.c.l.b16 %v5757_v16  ;;  %v5101_v11 = vmax.f32 %v5005_v19, 0.0  ;;  %v5008_v58 = vadd.f32 %v12855_v7, %v13101_v52  ;;  %v5560_v51 = vrot.slane %v5559_v9, 4  ;;  %v13249_v52 = vpop.f32.mrf.mxu0 }
 0x56d   : > { %v5102_v59 = vmax.f32 %v5006_v33, 0.0  ;;  %v5007_v21 = vadd.f32 %v10799_v47, %v12870_v31  ;;  %v5009_v1 = vadd.f32 %v12862_v63, %v13121_v60  ;;  %v5537_v43 = vmax.f32 %v5535_v10, %v5536_v61 }
 0x56e   : > { %v5543_v3 = vrot.slane %v5542_v18, 1  ;;  %v5104_v28 = vmax.f32 %v5008_v58, 0.0  ;;  %v10802_v22 = vadd.f32 %v13123_v12, %v13103_v8  ;;  %v5550_v55 = vrot.slane %v5549_v30, 1  ;;  %v13262_v58 = vpop.f32.mrf.mxu1 }
 0x56f   : > { %v5554_v57 = vmax.f32 %v5552_v41, %v5553_v24  ;;  %v5567_v5 = vrot.slane %v5566_v44, 4  ;;  %v5105_v2 = vmax.f32 %v5009_v1, 0.0  ;;  %v5357_v4 = vmul.f32 %v12888_v25, %v5101_v11 }
 0x570   : > { %v5103_v53 = vmax.f32 %v5007_v21, 0.0  ;;  %v5360_v40 = vmul.f32 %v12883_v14, %v5104_v28  ;;  %v5010_v60 = vadd.f32 %v10802_v22, %v12870_v31  ;;  %v5561_v10 = vmax.f32 %v5559_v9, %v5560_v51  ;;  %v13264_v9 = vpop.f32.mrf.mxu0 }
 0x571   : > { %v5358_v17 = vmul.f32 %v12888_v25, %v5102_v59  ;;  %v5361_v8 = vmul.f32 %v12883_v14, %v5105_v2  ;;  %v5011_v12 = vadd.f32 %v12855_v7, %v13135_v50  ;;  %v13258_v41 = vmax.f32 %v5542_v18, %v5543_v3 }
 0x572   : > { %v5759_v16 = vpack.c.bf16 %v5537_v43, %v5537_v43  ;;  %v5573_v19 = vmax.f32 %v5357_v4, %v5360_v40  ;;  %v5106_v33 = vmax.f32 %v5010_v60, 0.0  ;;  %v5551_v61 = vmax.f32 %v5549_v30, %v5550_v55  ;;  %v13277_v55 = vpop.f32.mrf.mxu1 }
 0x573   : > { %v5568_v24 = vmax.f32 %v5566_v44, %v5567_v5  ;;  %v5580_v47 = vmax.f32 %v5358_v17, %v5361_v8  ;;  %v10805_v11 = vadd.f32 %v13157_v6, %v13137_v32  ;;  %v5359_v51 = vmul.f32 %v12888_v25, %v5103_v53 }
 0x574   : > { %v5574_v59 = vrot.slane %v5573_v19, 4  ;;  %v5362_v50 = vmul.f32 %v12883_v14, %v5106_v33  ;;  %v5012_v18 = vadd.f32 %v12862_v63, %v13155_v38  ;;  %v5555_v21 = vrot.slane %v5554_v57, 2  ;;  %v13279_v38 = vpop.f32.mrf.mxu0 }
 0x575   : > { %v5562_v1 = vrot.slane %v5561_v10, 2  ;;  %v5581_v30 = vrot.slane %v5580_v47, 4  ;;  %v5107_v44 = vmax.f32 %v5011_v12, 0.0  ;;  %v5014_v3 = vadd.f32 %v12855_v7, %v13175_v37 }
 0x576   : > { %v5575_v32 = vmax.f32 %v5573_v19, %v5574_v59  ;;  %v5587_v6 = vmax.f32 %v5359_v51, %v5362_v50  ;;  %v13274_v28 = vunpack.c.l.b16 %v5759_v16  ;;  %v5569_v25 = vrot.slane %v5568_v24, 2  ;;  %v13290_v51 = vpop.f32.mrf.mxu1 }
 0x577   : > { %v5582_v22 = vmax.f32 %v5580_v47, %v5581_v30  ;;  %v5013_v14 = vadd.f32 %v10805_v11, %v12870_v31  ;;  %v5761_v5 = vpack.c.bf16 %v5551_v61, %v5551_v61  ;;  %v5108_v2 = vmax.f32 %v5012_v18, 0.0 }
 0x578   : > { %v5110_v4 = vmax.f32 %v5014_v3, 0.0  ;;  %v5015_v53 = vadd.f32 %v12862_v63, %v13195_v26  ;;  %v5556_v40 = vmax.f32 %v5554_v57, %v5555_v21  ;;  %v13283_v60 = vmax.f32 %v5561_v10, %v5562_v1  ;;  %v13292_v26 = vpop.f32.mrf.mxu0 }
 0x579   : > { %v5363_v37 = vmul.f32 %v12900_v36, %v5107_v44  ;;  %v10808_v17 = vadd.f32 %v13197_v0, %v13177_v20  ;;  %v5576_v8 = vrot.slane %v5575_v32, 2  ;;  %v5588_v12 = vrot.slane %v5587_v6, 4 }
 0x57a   : > { %v5366_v16 = vmul.f32 %v12895_v49, %v5110_v4  ;;  %v5111_v19 = vmax.f32 %v5015_v53, 0.0  ;;  %v5570_v33 = vmax.f32 %v5568_v24, %v5569_v25  ;;  %v5583_v61 = vrot.slane %v5582_v22, 2  ;;  %v13303_v4 = vpop.f32.mrf.mxu1  ;;  %v13305_v53 = vpop.f32.mrf.mxu0 }
 0x57b   : > { %v5109_v47 = vmax.f32 %v5013_v14, 0.0  ;;  %v5016_v11 = vadd.f32 %v10808_v17, %v12870_v31  ;;  %v5364_v57 = vmul.f32 %v12900_v36, %v5108_v2  ;;  %v5017_v20 = vadd.f32 %v12855_v7, %v13206_v29 }
 0x57c   : > { %v5594_v10 = vmax.f32 %v5363_v37, %v5366_v16  ;;  %v5367_v59 = vmul.f32 %v12895_v49, %v5111_v19  ;;  %v13298_v0 = vunpack.c.l.b16 %v5761_v5  ;;  %v5557_v50 = vrot.slane %v5556_v40, 1 }
 0x57d   : > { %v5112_v18 = vmax.f32 %v5016_v11, 0.0  ;;  %v5577_v21 = vmax.f32 %v5575_v32, %v5576_v8  ;;  %v5589_v1 = vmax.f32 %v5587_v6, %v5588_v12  ;;  %v5571_v3 = vrot.slane %v5570_v33, 1 }
 0x57e   : > { %v5595_v30 = vrot.slane %v5594_v10, 4  ;;  %v5601_v44 = vmax.f32 %v5364_v57, %v5367_v59  ;;  %v5584_v25 = vmax.f32 %v5582_v22, %v5583_v61  ;;  %v5365_v14 = vmul.f32 %v12900_v36, %v5109_v47  ;;  %v13314_v57 = vpop.f32.mrf.mxu1 }
 0x57f   : > { %v5368_v2 = vmul.f32 %v12895_v49, %v5112_v18  ;;  %v5113_v37 = vmax.f32 %v5017_v20, 0.0  ;;  %v5018_v17 = vadd.f32 %v12862_v63, %v13218_v48  ;;  %v5558_v32 = vmax.f32 %v5556_v40, %v5557_v50  ;;  %v13316_v48 = vpop.f32.mrf.mxu0  ;;  %v14131_v50 = vld [vmem:[#allocation19_spill] sm:$0xff] }
 0x580   : > { %v5596_v29 = vmax.f32 %v5594_v10, %v5595_v30  ;;  %v5602_v5 = vrot.slane %v5601_v44, 4  ;;  %v10811_v8 = vadd.f32 %v13220_v46, %v13208_v15  ;;  %v5020_v36 = vadd.f32 %v12855_v7, %v13232_v56  ;;  %v14130_v10 = vld [vmem:[#allocation20_spill] sm:$0xff] }
 0x581   : > { %v5608_v6 = vmax.f32 %v5365_v14, %v5368_v2  ;;  %v5578_v22 = vrot.slane %v5577_v21, 1  ;;  %v5590_v49 = vrot.slane %v5589_v1, 2  ;;  %v5572_v19 = vmax.f32 %v5570_v33, %v5571_v3 }
 0x582   : > { %v5597_v12 = vrot.slane %v5596_v29, 2  ;;  %v5603_v16 = vmax.f32 %v5601_v44, %v5602_v5  ;;  %v5019_v47 = vadd.f32 %v10811_v8, %v12870_v31  ;;  %v5116_v11 = vmax.f32 %v5020_v36, 0.0  ;;  %v13327_v36 = vpop.f32.mrf.mxu0 }
 0x583   : > { %v5609_v61 = vrot.slane %v5608_v6, 4  ;;  %v5585_v40 = vrot.slane %v5584_v25, 1  ;;  %v5369_v59 = vmul.f32 %v14130_v10, %v5113_v37  ;;  %v5114_v15 = vmax.f32 %v5018_v17, 0.0  ;;  %v13325_v17 = vpop.f32.mrf.mxu1 }
 0x584   : > { %v5021_v46 = vadd.f32 %v12862_v63, %v13247_v23  ;;  %v5598_v56 = vmax.f32 %v5596_v29, %v5597_v12  ;;  %v5604_v20 = vrot.slane %v5603_v16, 2  ;;  %v5372_v18 = vmul.f32 %v14131_v50, %v5116_v11 }
 0x585   : > { %v10814_v33 = vadd.f32 %v13249_v52, %v13234_v27  ;;  %v5579_v30 = vmax.f32 %v5577_v21, %v5578_v22  ;;  %v5591_v44 = vmax.f32 %v5589_v1, %v5590_v49  ;;  %v5610_v3 = vmax.f32 %v5608_v6, %v5609_v61 }
 0x586   : > { %v5117_v14 = vmax.f32 %v5021_v46, 0.0  ;;  %v5762_v2 = vpack.c.bf16 %v5558_v32, %v5558_v32  ;;  %v5115_v5 = vmax.f32 %v5019_v47, 0.0  ;;  %v5615_v8 = vmax.f32 %v5369_v59, %v5372_v18 }
 0x587   : > { %v5022_v37 = vadd.f32 %v10814_v33, %v12870_v31  ;;  %v5764_v23 = vpack.c.bf16 %v5572_v19, %v5572_v19  ;;  %v5586_v29 = vmax.f32 %v5584_v25, %v5585_v40  ;;  %v5370_v12 = vmul.f32 %v14130_v10, %v5114_v15  ;;  %v13335_v19 = vpop.f32.mrf.mxu1  ;;  %v13337_v40 = vpop.f32.mrf.mxu0 }
 0x588   : > { %v5373_v11 = vmul.f32 %v14131_v50, %v5117_v14  ;;  %v5599_v27 = vrot.slane %v5598_v56, 1  ;;  %v5605_v52 = vmax.f32 %v5603_v16, %v5604_v20  ;;  %v5616_v21 = vrot.slane %v5615_v8, 4 }
 0x589   : > { %v5118_v1 = vmax.f32 %v5022_v37, 0.0  ;;  %v5765_v6 = vpack.c.bf16 %v5579_v30, %v5579_v30  ;;  %v5592_v32 = vrot.slane %v5591_v44, 1  ;;  %v5611_v22 = vrot.slane %v5610_v3, 2 }
 0x58a   : > { %v5622_v49 = vmax.f32 %v5370_v12, %v5373_v11  ;;  %v5371_v61 = vmul.f32 %v14130_v10, %v5115_v5  ;;  %v5617_v47 = vmax.f32 %v5615_v8, %v5616_v21  ;;  %v5023_v25 = vadd.f32 %v12855_v7, %v13262_v58  ;;  %v10825_v12 = vpop.f32.mrf.mxu0 }
 0x58b   : > { %v5374_v59 = vmul.f32 %v14131_v50, %v5118_v1  ;;  %v13339_v15 = vunpack.c.l.b16 %v5762_v2  ;;  %v13341_v16 = vunpack.c.l.b16 %v5764_v23  ;;  %v5766_v46 = vpack.c.bf16 %v5586_v29, %v5586_v29  ;;  %v4746_v29 = vpop.f32.mrf.mxu1 }
 0x58c   : > { %v5024_v20 = vadd.f32 %v12862_v63, %v13277_v55  ;;  %v5600_v18 = vmax.f32 %v5598_v56, %v5599_v27  ;;  %v5606_v10 = vrot.slane %v5605_v52, 1  ;;  %v5623_v33 = vrot.slane %v5622_v49, 4 }
 0x58d   : > { %14132 = vst [vmem:[#allocation20_spill] sm:$0xff] %v13341_v16  ;;  %v5629_v30 = vmax.f32 %v5371_v61, %v5374_v59  ;;  %v5921_v50 = vunpack.c.l.b16 %v5765_v6  ;;  %v5612_v14 = vmax.f32 %v5610_v3, %v5611_v22  ;;  %v5618_v5 = vrot.slane %v5617_v47, 2  ;;  %v14133_v61 = vld [vmem:[#allocation23_spill] sm:$0xff] }
 0x58e   : > { %v10817_v58 = vadd.f32 %v13279_v38, %v13264_v9  ;;  %v5593_v8 = vmax.f32 %v5591_v44, %v5592_v32  ;;  %v5119_v2 = vmax.f32 %v5023_v25, 0.0  ;;  %v5026_v23 = vadd.f32 %v12855_v7, %v13290_v51  ;;  %v14134_v25 = vld [vmem:[#allocation22_spill] sm:$0xff] }
 0x58f   : > { %v5630_v37 = vrot.slane %v5629_v30, 4  ;;  %v13349_v11 = vunpack.c.l.b16 %v5766_v46  ;;  %v5120_v55 = vmax.f32 %v5024_v20, 0.0  ;;  %v5027_v3 = vadd.f32 %v12862_v63, %v13303_v4  ;;  %v13358_v20 = vpop.f32.mrf.mxu1 }
 0x590   : > { %v5025_v56 = vadd.f32 %v10817_v58, %v12870_v31  ;;  %v5768_v27 = vpack.c.bf16 %v5600_v18, %v5600_v18  ;;  %v5607_v21 = vmax.f32 %v5605_v52, %v5606_v10  ;;  %v5624_v1 = vmax.f32 %v5622_v49, %v5623_v33  ;;  %v13360_v58 = vpop.f32.mrf.mxu0 }
 0x591   : > { %v5122_v9 = vmax.f32 %v5026_v23, 0.0  ;;  %v5613_v38 = vrot.slane %v5612_v14, 1  ;;  %v5619_v44 = vmax.f32 %v5617_v47, %v5618_v5  ;;  %v5123_v6 = vmax.f32 %v5027_v3, 0.0 }
 0x592   : > { %v10820_v51 = vadd.f32 %v13305_v53, %v13292_v26  ;;  %v5767_v32 = vpack.c.bf16 %v5593_v8, %v5593_v8  ;;  %v5631_v22 = vmax.f32 %v5629_v30, %v5630_v37  ;;  %v5375_v59 = vmul.f32 %v14133_v61, %v5119_v2  ;;  %v13369_v3 = vpop.f32.mrf.mxu0 }
 0x593   : > { %v5378_v46 = vmul.f32 %v14134_v25, %v5122_v9  ;;  %v5376_v4 = vmul.f32 %v14133_v61, %v5120_v55  ;;  %v5121_v52 = vmax.f32 %v5025_v56, 0.0  ;;  %v5379_v49 = vmul.f32 %v14134_v25, %v5123_v6  ;;  %v4752_v56 = vpop.f32.mrf.mxu1 }
 0x594   : > { %v5028_v47 = vadd.f32 %v10820_v51, %v12870_v31  ;;  %v5924_v18 = vunpack.c.l.b16 %v5768_v27  ;;  %v5769_v10 = vpack.c.bf16 %v5607_v21, %v5607_v21  ;;  %v5625_v26 = vrot.slane %v5624_v1, 2 }
 0x595   : > { %v5636_v53 = vmax.f32 %v5375_v59, %v5378_v46  ;;  %v5614_v33 = vmax.f32 %v5612_v14, %v5613_v38  ;;  %v5620_v30 = vrot.slane %v5619_v44, 1  ;;  %v5643_v5 = vmax.f32 %v5376_v4, %v5379_v49 }
 0x596   : > { %v5124_v8 = vmax.f32 %v5028_v47, 0.0  ;;  %v13365_v37 = vunpack.c.l.b16 %v5767_v32  ;;  %v5632_v2 = vrot.slane %v5631_v22, 2  ;;  %v5029_v55 = vadd.f32 %v12855_v7, %v13314_v57 }
 0x597   : > { %v5637_v23 = vrot.slane %v5636_v53, 4  ;;  %v5377_v9 = vmul.f32 %v14133_v61, %v5121_v52  ;;  %v5644_v27 = vrot.slane %v5643_v5, 4  ;;  %v5030_v14 = vadd.f32 %v12862_v63, %v13325_v17  ;;  %v4754_v52 = vpop.f32.mrf.mxu1  ;;  %v10830_v17 = vpop.f32.mrf.mxu0 }
 0x598   : > { %v5380_v21 = vmul.f32 %v14134_v25, %v5124_v8  ;;  %v13376_v38 = vsel %vm5945_vm2, %v5924_v18, %v5921_v50  ;;  %v5925_v6 = vunpack.c.l.b16 %v5769_v10  ;;  %v5626_v51 = vmax.f32 %v5624_v1, %v5625_v26 }
 0x599   : > { %v5638_v32 = vmax.f32 %v5636_v53, %v5637_v23  ;;  %v5770_v59 = vpack.c.bf16 %v5614_v33, %v5614_v33  ;;  %v5621_v46 = vmax.f32 %v5619_v44, %v5620_v30  ;;  %v5645_v57 = vmax.f32 %v5643_v5, %v5644_v27  ;;  %v14136_v23 = vld [vmem:[#allocation24_spill] sm:$0xff] }
 0x59a   : > { %v5650_v4 = vmax.f32 %v5377_v9, %v5380_v21  ;;  %v5633_v49 = vmax.f32 %v5631_v22, %v5632_v2  ;;  %v5125_v47 = vmax.f32 %v5029_v55, 0.0  ;;  %v10823_v61 = vadd.f32 %v13327_v36, %v13316_v48  ;;  %v4756_v9 = vpop.f32.mrf.mxu1 }
 0x59b   : > { %v5032_v25 = vadd.f32 %v12855_v7, %v13335_v19  ;;  %v5126_v50 = vmax.f32 %v5030_v14, 0.0  ;;  %v5033_v18 = vadd.f32 %v12862_v63, %v4746_v29  ;;  %v10826_v1 = vadd.f32 %v10825_v12, %v13337_v40  ;;  %v14135_v19 = vld [vmem:[#allocation25_spill] sm:$0xff]  ;;  %v10831_v29 = vpop.f32.mrf.mxu0 }
 0x59c   : > { %v5651_v8 = vrot.slane %v5650_v4, 4  ;;  %v5627_v10 = vrot.slane %v5626_v51, 1  ;;  %v5639_v44 = vrot.slane %v5638_v32, 2  ;;  %v5031_v26 = vadd.f32 %v10823_v61, %v12870_v31  ;;  %v4760_v16 = vpop.f32.mrf.mxu1 }
 0x59d   : > { %v5128_v22 = vmax.f32 %v5032_v25, 0.0  ;;  %v5646_v53 = vrot.slane %v5645_v57, 2  ;;  %v5129_v30 = vmax.f32 %v5033_v18, 0.0  ;;  %v5034_v48 = vadd.f32 %v10826_v1, %v12870_v31 }
 0x59e   : > { %v5652_v33 = vmax.f32 %v5650_v4, %v5651_v8  ;;  %v5634_v36 = vrot.slane %v5633_v49, 1  ;;  %v5381_v5 = vmul.f32 %v14135_v19, %v5125_v47  ;;  %v5127_v2 = vmax.f32 %v5031_v26, 0.0 }
 0x59f   : > { %v5384_v55 = vmul.f32 %v14136_v23, %v5128_v22  ;;  %v5382_v40 = vmul.f32 %v14135_v19, %v5126_v50  ;;  %v5385_v12 = vmul.f32 %v14136_v23, %v5129_v30  ;;  %v5130_v21 = vmax.f32 %v5034_v48, 0.0  ;;  %v13394_v50 = vpop.f32.mrf.mxu0 }
 0x5a0   : > { %v5653_v27 = vrot.slane %v5652_v33, 2  ;;  %v5926_v14 = vunpack.c.l.b16 %v5770_v59  ;;  %v5771_v61 = vpack.c.bf16 %v5621_v46, %v5621_v46  ;;  %v5640_v4 = vmax.f32 %v5638_v32, %v5639_v44 }
 0x5a1   : > { %v5657_v25 = vmax.f32 %v5381_v5, %v5384_v55  ;;  %v5647_v8 = vmax.f32 %v5645_v57, %v5646_v53  ;;  %v5383_v18 = vmul.f32 %v14135_v19, %v5127_v2  ;;  %v5664_v1 = vmax.f32 %v5382_v40, %v5385_v12  ;;  %v4762_v5 = vpop.f32.mrf.mxu1 }
 0x5a2   : > { %v5386_v47 = vmul.f32 %v14136_v23, %v5130_v21  ;;  %v13392_v26 = vmax.f32 %v5626_v51, %v5627_v10  ;;  %v5635_v22 = vmax.f32 %v5633_v49, %v5634_v36  ;;  %v5654_v43 = vmax.f32 %v5652_v33, %v5653_v27 }
 0x5a3   : > { %v5658_v24 = vrot.slane %v5657_v25, 4  ;;  %v5665_v30 = vrot.slane %v5664_v1, 4  ;;  %v5035_v32 = vadd.f32 %v12855_v7, %v13358_v20  ;;  %v5036_v59 = vadd.f32 %v12862_v63, %v4752_v56 }
 0x5a4   : > { %v5671_v48 = vmax.f32 %v5383_v18, %v5386_v47  ;;  %v13401_v46 = vsel %vm5945_vm2, %v5925_v6, %v13349_v11  ;;  %v5987_v51 = vsel %vm5945_vm2, %v5926_v14, %v13365_v37  ;;  %v5927_v57 = vunpack.c.l.b16 %v5771_v61  ;;  %v10834_v11 = vpop.f32.mrf.mxu0 }
 0x5a5   : > { %v5659_v49 = vmax.f32 %v5657_v25, %v5658_v24  ;;  %v5641_v10 = vrot.slane %v5640_v4, 1  ;;  %v5648_v44 = vrot.slane %v5647_v8, 1  ;;  %v5666_v53 = vmax.f32 %v5664_v1, %v5665_v30  ;;  %v4764_v1 = vpop.f32.mrf.mxu1 }
 0x5a6   : > { %v5672_v33 = vrot.slane %v5671_v48, 4  ;;  %v5772_v36 = vpack.c.bf16 %v13392_v26, %v13392_v26  ;;  %v5655_v19 = vrot.slane %v5654_v43, 1  ;;  %v10829_v56 = vadd.f32 %v13369_v3, %v13360_v58  ;;  %v10836_v47 = vpop.f32.mrf.mxu0 }
 0x5a7   : > { %v5660_v20 = vrot.slane %v5659_v49, 2  ;;  %v5773_v6 = vpack.c.bf16 %v5635_v22, %v5635_v22  ;;  %v5131_v2 = vmax.f32 %v5035_v32, 0.0  ;;  %v5132_v23 = vmax.f32 %v5036_v59, 0.0  ;;  %v14137_v22 = vld [vmem:[#allocation27_spill] sm:$0xff]  ;;  %v14138_v32 = vld [vmem:[#allocation26_spill] sm:$0xff] }
 0x5a8   : > { %v5038_v37 = vadd.f32 %v12855_v7, %v4754_v52  ;;  %v5667_v24 = vrot.slane %v5666_v53, 2  ;;  %v5037_v55 = vadd.f32 %v10829_v56, %v12870_v31  ;;  %v5039_v27 = vadd.f32 %v12862_v63, %v4756_v9 }
 0x5a9   : > { %v10832_v40 = vadd.f32 %v10831_v29, %v10830_v17  ;;  %v5642_v12 = vmax.f32 %v5640_v4, %v5641_v10  ;;  %v5649_v21 = vmax.f32 %v5647_v8, %v5648_v44  ;;  %v5673_v14 = vmax.f32 %v5671_v48, %v5672_v33 }
 0x5aa   : > { %v5134_v61 = vmax.f32 %v5038_v37, 0.0  ;;  %v5656_v25 = vmax.f32 %v5654_v43, %v5655_v19  ;;  %v5661_v18 = vmax.f32 %v5659_v49, %v5660_v20  ;;  %v5135_v58 = vmax.f32 %v5039_v27, 0.0  ;;  %v4766_v19 = vpop.f32.mrf.mxu1  ;;  %v10837_v20 = vpop.f32.mrf.mxu0 }
 0x5ab   : > { %v5040_v3 = vadd.f32 %v10832_v40, %v12870_v31  ;;  %v5929_v26 = vunpack.c.l.b16 %v5773_v6  ;;  %v5387_v52 = vmul.f32 %v14137_v22, %v5131_v2  ;;  %v5133_v30 = vmax.f32 %v5037_v55, 0.0 }
 0x5ac   : > { %v5390_v59 = vmul.f32 %v14138_v32, %v5134_v61  ;;  %v5668_v56 = vmax.f32 %v5666_v53, %v5667_v24  ;;  %v5388_v17 = vmul.f32 %v14137_v22, %v5132_v23  ;;  %v5391_v9 = vmul.f32 %v14138_v32, %v5135_v58 }
 0x5ad   : > { %v5136_v29 = vmax.f32 %v5040_v3, 0.0  ;;  %v5774_v4 = vpack.c.bf16 %v5642_v12, %v5642_v12  ;;  %v5775_v43 = vpack.c.bf16 %v5649_v21, %v5649_v21  ;;  %v5674_v8 = vrot.slane %v5673_v14, 2  ;;  %v4770_v3 = vpop.f32.mrf.mxu1 }
 0x5ae   : > { %v5678_v48 = vmax.f32 %v5387_v52, %v5390_v59  ;;  %v5776_v49 = vpack.c.bf16 %v5656_v25, %v5656_v25  ;;  %v5662_v10 = vrot.slane %v5661_v18, 1  ;;  %v5685_v44 = vmax.f32 %v5388_v17, %v5391_v9 }
 0x5af   : > { %v5392_v33 = vmul.f32 %v14138_v32, %v5136_v29  ;;  %v5974_v6 = vsel %vm5947_vm3, %v5927_v57, %v13376_v38  ;;  %v5389_v53 = vmul.f32 %v14137_v22, %v5133_v30  ;;  %v5041_v23 = vadd.f32 %v12855_v7, %v4760_v16  ;;  %v10839_v22 = vpop.f32.mrf.mxu0 }
 0x5b0   : > { %v5679_v2 = vrot.slane %v5678_v48, 4  ;;  %v13422_v37 = vunpack.c.l.b16 %v5772_v36  ;;  %v5669_v24 = vrot.slane %v5668_v56, 1  ;;  %v5686_v55 = vrot.slane %v5685_v44, 4 }
 0x5b1   : > { %v5042_v27 = vadd.f32 %v12862_v63, %v4762_v5  ;;  %v5988_v40 = vsel %vm5947_vm3, %v5929_v26, %v5987_v51  ;;  %v5930_v12 = vunpack.c.l.b16 %v5774_v4  ;;  %v5675_v21 = vmax.f32 %v5673_v14, %v5674_v8  ;;  %v4772_v8 = vpop.f32.mrf.mxu1 }
 0x5b2   : > { %v5692_v61 = vmax.f32 %v5389_v53, %v5392_v33  ;;  %v13426_v25 = vunpack.c.l.b16 %v5775_v43  ;;  %v5932_v58 = vunpack.c.l.b16 %v5776_v49  ;;  %v5663_v38 = vmax.f32 %v5661_v18, %v5662_v10 }
 0x5b3   : > { %v5680_v57 = vmax.f32 %v5678_v48, %v5679_v2  ;;  %v5687_v52 = vmax.f32 %v5685_v44, %v5686_v55  ;;  %v5137_v16 = vmax.f32 %v5041_v23, 0.0  ;;  %v10835_v36 = vadd.f32 %v10834_v11, %v13394_v50  ;;  %v10840_v48 = vpop.f32.mrf.mxu0 }
 0x5b4   : > { %v5044_v30 = vadd.f32 %v12855_v7, %v4764_v1  ;;  %v5670_v32 = vmax.f32 %v5668_v56, %v5669_v24  ;;  %v5138_v5 = vmax.f32 %v5042_v27, 0.0  ;;  %v5045_v51 = vadd.f32 %v12862_v63, %v4766_v19  ;;  %v4774_v27 = vpop.f32.mrf.mxu1 }
 0x5b5   : > { %v10838_v26 = vadd.f32 %v10837_v20, %v10836_v47  ;;  %v5676_v14 = vrot.slane %v5675_v21, 1  ;;  %v5693_v59 = vrot.slane %v5692_v61, 4  ;;  %v5043_v17 = vadd.f32 %v10835_v36, %v12870_v31 }
 0x5b6   : > { %v5140_v9 = vmax.f32 %v5044_v30, 0.0  ;;  %v5777_v18 = vpack.c.bf16 %v5663_v38, %v5663_v38  ;;  %v5681_v29 = vrot.slane %v5680_v57, 2  ;;  %v5141_v4 = vmax.f32 %v5045_v51, 0.0  ;;  %v10842_v38 = vpop.f32.mrf.mxu0 }
 0x5b7   : > { %v5046_v43 = vadd.f32 %v10838_v26, %v12870_v31  ;;  %v5688_v50 = vrot.slane %v5687_v52, 2  ;;  %v5393_v11 = vmul.f32 %v13171_v45, %v5137_v16  ;;  %v5139_v1 = vmax.f32 %v5043_v17, 0.0 }
 0x5b8   : > { %v5396_v56 = vmul.f32 %v13169_v42, %v5140_v9  ;;  %v5778_v49 = vpack.c.bf16 %v5670_v32, %v5670_v32  ;;  %v5394_v47 = vmul.f32 %v13171_v45, %v5138_v5  ;;  %v5397_v10 = vmul.f32 %v13169_v42, %v5141_v4 }
 0x5b9   : > { %v5142_v44 = vmax.f32 %v5046_v43, 0.0  ;;  %v5975_v33 = vsel %vm5949_vm4, %v5930_v12, %v5974_v6  ;;  %v5677_v19 = vmax.f32 %v5675_v21, %v5676_v14  ;;  %v5694_v20 = vmax.f32 %v5692_v61, %v5693_v59 }
 0x5ba   : > { %v5699_v53 = vmax.f32 %v5393_v11, %v5396_v56  ;;  %v5682_v2 = vmax.f32 %v5680_v57, %v5681_v29  ;;  %v5395_v23 = vmul.f32 %v13171_v45, %v5139_v1  ;;  %v5706_v24 = vmax.f32 %v5394_v47, %v5397_v10  ;;  %v5307_v47 = vpop.permute.xlu1 %5306  ;;  %v5302_v10 = vpop.permute.xlu0 %5301 }
 0x5bb   : > { %v5398_v55 = vmul.f32 %v13169_v42, %v5142_v44  ;;  %v13441_v16 = vsel %vm5949_vm4, %v5932_v58, %v5988_v40  ;;  %v5933_v36 = vunpack.c.l.b16 %v5777_v18  ;;  %v5689_v30 = vmax.f32 %v5687_v52, %v5688_v50  ;;  %v4776_v40 = vpop.f32.mrf.mxu1  ;;  %v10843_v58 = vpop.f32.mrf.mxu0 }
 0x5bc   : > { %v5700_v32 = vrot.slane %v5699_v53, 4  ;;  %v13443_v5 = vunpack.c.l.b16 %v5778_v49  ;;  %v5707_v6 = vrot.slane %v5706_v24, 4  ;;  %v5047_v21 = vadd.f32 %v12855_v7, %v4770_v3 }
 0x5bd   : > { %v5713_v12 = vmax.f32 %v5395_v23, %v5398_v55  ;;  %v5779_v61 = vpack.c.bf16 %v5677_v19, %v5677_v19  ;;  %v5048_v45 = vadd.f32 %v12862_v63, %v4772_v8  ;;  %v10841_v51 = vadd.f32 %v10840_v48, %v10839_v22 }
 0x5be   : > { %v5701_v57 = vmax.f32 %v5699_v53, %v5700_v32  ;;  %v5683_v42 = vrot.slane %v5682_v2, 1  ;;  %v5695_v26 = vrot.slane %v5694_v20, 2  ;;  %v5708_v14 = vmax.f32 %v5706_v24, %v5707_v6 }
 0x5bf   : > { %v5714_v59 = vrot.slane %v5713_v12, 4  ;;  %v13448_v52 = vsel %vm5951_vm5, %v5933_v36, %v5975_v33  ;;  %v5690_v17 = vrot.slane %v5689_v30, 1  ;;  %v5049_v18 = vadd.f32 %v10841_v51, %v12870_v31 }
 0x5c0   : > { %v5702_v9 = vrot.slane %v5701_v57, 2  ;;  %v5709_v29 = vrot.slane %v5708_v14, 2  ;;  %v5143_v4 = vmax.f32 %v5047_v21, 0.0  ;;  %v5050_v43 = vadd.f32 %v12855_v7, %v4774_v27 }
 0x5c1   : > { %v5715_v3 = vmax.f32 %v5713_v12, %v5714_v59  ;;  %v5144_v22 = vmax.f32 %v5048_v45, 0.0  ;;  %v5051_v48 = vadd.f32 %v12862_v63, %v4776_v40  ;;  %v10844_v50 = vadd.f32 %v10843_v58, %v10842_v38 }
 0x5c2   : > { %v5703_v8 = vmax.f32 %v5701_v57, %v5702_v9  ;;  %v13453_v11 = vmax.f32 %v5682_v2, %v5683_v42  ;;  %v5696_v1 = vmax.f32 %v5694_v20, %v5695_v26  ;;  %v5146_v49 = vmax.f32 %v5050_v43, 0.0  ;;  %v14141_v9 = vld [vmem:[#allocation21_spill] sm:$0xff] }
 0x5c3   : > { %v5716_v56 = vrot.slane %v5715_v3, 2  ;;  %v13455_v44 = vmax.f32 %v5689_v30, %v5690_v17  ;;  %v5145_v33 = vmax.f32 %v5049_v18, 0.0  ;;  %v5147_v19 = vmax.f32 %v5051_v48, 0.0 }
 0x5c4   : > { %v5052_v53 = vadd.f32 %v10844_v50, %v12870_v31  ;;  %v5710_v23 = vmax.f32 %v5708_v14, %v5709_v29  ;;  %v5399_v7 = vmul.f32 %v5302_v10, %v5143_v4  ;;  %v5402_v24 = vmul.f32 %v5307_v47, %v5146_v49 }
 0x5c5   : > { %v14139_v55 = vrot.slane %v13283_v60, 1  ;;  %v5704_v2 = vrot.slane %v5703_v8, 1  ;;  %v5400_v27 = vmul.f32 %v5302_v10, %v5144_v22  ;;  %v5403_v20 = vmul.f32 %v5307_v47, %v5147_v19 }
 0x5c6   : > { %v5148_v38 = vmax.f32 %v5052_v53, 0.0  ;;  %v13461_v36 = vunpack.c.l.b16 %v5779_v61  ;;  %v5697_v32 = vrot.slane %v5696_v1, 1  ;;  %v5717_v30 = vmax.f32 %v5715_v3, %v5716_v56 }
 0x5c7   : > { %v5565_v63 = vmax.f32 %v13283_v60, %v14139_v55  ;;  %v5720_v6 = vmax.f32 %v5399_v7, %v5402_v24  ;;  %v5401_v12 = vmul.f32 %v5302_v10, %v5145_v33  ;;  %v5727_v21 = vmax.f32 %v5400_v27, %v5403_v20 }
 0x5c8   : > { %v5404_v57 = vmul.f32 %v5307_v47, %v5148_v38  ;;  %v5780_v45 = vpack.c.bf16 %v13453_v11, %v13453_v11  ;;  %v5781_v51 = vpack.c.bf16 %v13455_v44, %v13455_v44  ;;  %v5711_v60 = vrot.slane %v5710_v23, 1 }
 0x5c9   : > { %v5763_v31 = vpack.c.bf16 %v5565_v63, %v5565_v63  ;;  %v5721_v42 = vrot.slane %v5720_v6, 4  ;;  %v5705_v26 = vmax.f32 %v5703_v8, %v5704_v2  ;;  %v5728_v14 = vrot.slane %v5727_v21, 4  ;;  %v14142_v63 = vld [vmem:[#allocation20_spill] sm:$0xff] }
 0x5ca   : > { %v5734_v59 = vmax.f32 %v5401_v12, %v5404_v57  ;;  %v14140_v61 = vpack.c.bf16 %v13258_v41, %v13258_v41  ;;  %v5718_v58 = vrot.slane %v5717_v30, 1  ;;  %v5960_v18 = vsel %vm5947_vm3, %v13226_v35, %v14141_v9 }
 0x5cb   : > { %v5722_v17 = vmax.f32 %v5720_v6, %v5721_v42  ;;  %v5729_v29 = vmax.f32 %v5727_v21, %v5728_v14  ;;  %v5919_v4 = vunpack.c.l.b16 %v5763_v31  ;;  %v5961_v43 = vsel %vm5949_vm4, %v13228_v39, %v5960_v18 }
 0x5cc   : > { %v5916_v40 = vunpack.c.l.b16 %v14140_v61  ;;  %v5735_v3 = vrot.slane %v5734_v59, 4  ;;  %v5698_v8 = vmax.f32 %v5696_v1, %v5697_v32  ;;  %v5712_v22 = vmax.f32 %v5710_v23, %v5711_v60 }
 0x5cd   : > { %v5723_v48 = vrot.slane %v5722_v17, 2  ;;  %v5962_v41 = vsel %vm5951_vm5, %v13236_v62, %v5961_v43  ;;  %v5730_v50 = vrot.slane %v5729_v29, 2  ;;  %v5719_v49 = vmax.f32 %v5717_v30, %v5718_v58  ;;  %v6532_v62 = vpop.xlane.xlu0 %6531 }
 0x5ce   : > { %v5736_v11 = vmax.f32 %v5734_v59, %v5735_v3  ;;  %v5963_v56 = vsel %vm5953_vm6, %v13238_v34, %v5962_v41  ;;  %v5956_v39 = vsel %vm5955_vm7, %v13274_v28, %v13191_v13  ;;  %v5783_v1 = vpack.c.bf16 %v5705_v26, %v5705_v26  ;;  %v11427_v3 = vld [vmem:[%s14129_s0 + $0xc0] ss:$16 sps:$4 sm:$0xff]   ;;  %v11435_v41 = vld [vmem:[%s14129_s0 + $0x84] ss:$16 sps:$4 sm:$0xff]  }
 0x5cf   : > { %v5724_v35 = vmax.f32 %v5722_v17, %v5723_v48  ;;  %v5964_v47 = vsel %vm5955_vm7, %v5916_v40, %v5963_v56  ;;  %v5731_v10 = vmax.f32 %v5729_v29, %v5730_v50  ;;  %v5784_v19 = vpack.c.bf16 %v5712_v22, %v5712_v22  ;;  %v11429_v29 = vld [vmem:[%s14129_s0 + $0xc4] ss:$16 sps:$4 sm:$0xff]   ;;  %v11430_v48 = vld [vmem:[%s14129_s0 + $0xa0] ss:$16 sps:$4 sm:$0xff]  }
 0x5d0   : > { %v5737_v44 = vrot.slane %v5736_v11, 2  ;;  %v5965_v33 = vsel %vm5957_vm8, %v5919_v4, %v5964_v47  ;;  %v5958_v23 = vsel %vm5957_vm8, %v13339_v15, %v5956_v39  ;;  %v5971_v34 = vsel %vm5955_vm7, %v13298_v0, %v13212_v54  ;;  %v11432_v4 = vld [vmem:[%s14129_s0 + $0xa4] ss:$16 sps:$4 sm:$0xff]   ;;  %v11439_v47 = vld [vmem:[%s14129_s0 + $0x40] ss:$16 sps:$4 sm:$0xff]  }
 0x5d1   : > { %v5725_v53 = vrot.slane %v5724_v35, 1  ;;  %v5782_v7 = vpack.c.bf16 %v5698_v8, %v5698_v8  ;;  %v5732_v24 = vrot.slane %v5731_v10, 1  ;;  %v5972_v13 = vsel %vm5957_vm8, %v14142_v63, %v5971_v34  ;;  %v12053_v8 = vld [vmem:[%s12837_s18 + $0x8] sm:$0xff]  ;;  %v11438_v56 = vld [vmem:[%s14129_s0 + $0x64] ss:$16 sps:$4 sm:$0xff]  }
 0x5d2   : > { %v5738_v55 = vmax.f32 %v5736_v11, %v5737_v44  ;;  %v5936_v28 = vunpack.c.l.b16 %v5780_v45  ;;  %v5785_v2 = vpack.c.bf16 %v5719_v49, %v5719_v49  ;;  %v6533_v20 = vmax.f32 %v6532_v62, 1e-24  ;;  %v11433_v11 = vld [vmem:[%s14129_s0 + $0x80] ss:$16 sps:$4 sm:$0xff]   ;;  %v11444_v39 = vld [vmem:[%s14129_s0 + $0x24] ss:$16 sps:$4 sm:$0xff]  }
 0x5d3   : > { %v5726_v27 = vmax.f32 %v5724_v35, %v5725_v53  ;;  %v5937_v38 = vunpack.c.l.b16 %v5781_v51  ;;  %v5939_v32 = vunpack.c.l.b16 %v5783_v1  ;;  %v5733_v6 = vmax.f32 %v5731_v10, %v5732_v24  ;;  %v11436_v49 = vld [vmem:[%s14129_s0 + $0x60] ss:$16 sps:$4 sm:$0xff]   ;;  %v11441_v35 = vld [vmem:[%s14129_s0 + $0x44] ss:$16 sps:$4 sm:$0xff]  }
 0x5d4   : > { %v5739_v30 = vrot.slane %v5738_v55, 1  ;;  %v5940_v15 = vunpack.c.l.b16 %v5784_v19  ;;  %v5981_v54 = vsel %vm5947_vm3, %v13422_v37, %v13401_v46  ;;  %12032 = vrsqrt.f32 %v6533_v20  ;;  %v11442_v1 = vld [vmem:[%s14129_s0 + $0x20] ss:$16 sps:$4 sm:$0xff]   ;;  %v11447_v10 = vld [vmem:[%s14129_s0 + $0x4] ss:$16 sps:$4 sm:$0xff]   ;;  %v11545_v19 = vld [vmem:[%s14143_s26 + $0x38] sm:$0xff]  }
 0x5d5   : > { %v5786_v12 = vpack.c.bf16 %v5726_v27, %v5726_v27  ;;  %v5938_v0 = vunpack.c.l.b16 %v5782_v7  ;;  %v5787_v57 = vpack.c.bf16 %v5733_v6, %v5733_v6  ;;  %v5982_v31 = vsel %vm5949_vm4, %v13426_v25, %v5981_v54  ;;  %v11445_v44 = vld [vmem:[%s14129_s0] ss:$16 sps:$4 sm:$0xff]   ;;  %v11450_v62 = vld [vmem:[%s14129_s0 + $0x1e4] ss:$16 sps:$4 sm:$0xff]  }
 0x5d6   : > { %v5740_v21 = vmax.f32 %v5738_v55, %v5739_v30  ;;  %v5977_v45 = vsel %vm5953_vm6, %v5936_v28, %v13448_v52  ;;  %v5941_v51 = vunpack.c.l.b16 %v5785_v2  ;;  %v5983_v42 = vsel %vm5951_vm5, %v13443_v5, %v5982_v31  ;;  %v11448_v53 = vld [vmem:[%s14129_s0 + $0x1e0] ss:$16 sps:$4 sm:$0xff]   ;;  %v11453_v34 = vld [vmem:[%s14129_s0 + $0x1c4] ss:$16 sps:$4 sm:$0xff]   ;;  %v11551_v55 = vld [vmem:[%s14143_s26 + $0x68] sm:$0xff]  }
 0x5d7   : > { %v5942_v60 = vunpack.c.l.b16 %v5786_v12  ;;  %v5943_v14 = vunpack.c.l.b16 %v5787_v57  ;;  %v5984_v46 = vsel %vm5953_vm6, %v5937_v38, %v5983_v42  ;;  %v5978_v37 = vsel %vm5955_vm7, %v5939_v32, %v5977_v45  ;;  %v11550_v7 = vld [vmem:[%s14143_s26 + $0x30] sm:$0xff]   ;;  %v11556_v2 = vld [vmem:[%s14143_s26 + $0x60] sm:$0xff]   ;;  %v11561_v32 = vld [vmem:[%s14143_s26 + $0x58] sm:$0xff]  }
 0x5d8   : > { %v5788_v26 = vpack.c.bf16 %v5740_v21, %v5740_v21  ;;  %v5990_v25 = vsel %vm5951_vm5, %v13461_v36, %v13441_v16  ;;  %v5985_v59 = vsel %vm5955_vm7, %v5940_v15, %v5984_v46  ;;  %v11424_v16 = vld [vmem:[%s14129_s0 + $0xe0] ss:$16 sps:$4 sm:$0xff]   ;;  %v11456_v63 = vld [vmem:[%s14129_s0 + $0x1a4] ss:$16 sps:$4 sm:$0xff]  }
 0x5d9   : > { %v5979_v52 = vsel %vm5957_vm8, %v5942_v60, %v5978_v37  ;;  %v5991_v61 = vsel %vm5953_vm6, %v5938_v0, %v5990_v25  ;;  %v5986_v40 = vsel %vm5957_vm8, %v5943_v14, %v5985_v59  ;;  %v11451_v24 = vld [vmem:[%s14129_s0 + $0x1c0] ss:$16 sps:$4 sm:$0xff]   ;;  %v11459_v27 = vld [vmem:[%s14129_s0 + $0x184] ss:$16 sps:$4 sm:$0xff]   ;;  %v11565_v25 = vld [vmem:[%s14143_s26 + $0x18] sm:$0xff]  }
 0x5da   : > { %v5944_v5 = vunpack.c.l.b16 %v5788_v26  ;;  %v5995_v58 = vpack.c.b16 %v5986_v40, %v5965_v33  ;;  %v5992_v17 = vsel %vm5955_vm7, %v5941_v51, %v5991_v61  ;;  %v5994_v9 = vpack.c.b16 %v5979_v52, %v5958_v23  ;;  %v11541_v33 = vld [vmem:[%s14143_s26 + $0x78] sm:$0xff]   ;;  %v11546_v23 = vld [vmem:[%s14143_s26 + $0x70] sm:$0xff]   ;;  %v11560_v20 = vld [vmem:[%s14143_s26 + $0x20] sm:$0xff]  }
 0x5db   : > { %10845 = vmatprep.subr.bf16.mxu1 %v11541_v33  ;;  %v11454_v28 = vld [vmem:[%s14129_s0 + $0x1a0] ss:$16 sps:$4 sm:$0xff]   ;;  %v11462_v30 = vld [vmem:[%s14129_s0 + $0x164] ss:$16 sps:$4 sm:$0xff]   ;;  %v12055_v51 = vld [vmem:[%s12837_s18 + $0x28] sm:$0xff] }
 0x5dc   : > { %v5993_v18 = vsel %vm5957_vm8, %v5944_v5, %v5992_v17  ;;  %6272 = vmatprep.mubr.bf16.mxu1 %v5995_v58  ;;  %v11457_v38 = vld [vmem:[%s14129_s0 + $0x180] ss:$16 sps:$4 sm:$0xff]   ;;  %v11465_v12 = vld [vmem:[%s14129_s0 + $0x144] ss:$16 sps:$4 sm:$0xff]  }
 0x5dd   : > { %v5996_v36 = vpack.c.b16 %v5993_v18, %v5972_v13  ;;  %6273 = vmatmul.mubr.bf16.vlgmr.msra.gmra.mxu1 %v5994_v9  ;;  %v11555_v13 = vld [vmem:[%s14143_s26 + $0x28] sm:$0xff]   ;;  %v11460_v6 = vld [vmem:[%s14129_s0 + $0x160] ss:$16 sps:$4 sm:$0xff]   ;;  %v11468_v54 = vld [vmem:[%s14129_s0 + $0x124] ss:$16 sps:$4 sm:$0xff]  }
 0x5de   : > { %10846 = vmatpush3.bf16.msra.mxu1 %v11545_v19  ;;  %v11463_v15 = vld [vmem:[%s14129_s0 + $0x140] ss:$16 sps:$4 sm:$0xff]   ;;  %v11471_v21 = vld [vmem:[%s14129_s0 + $0x104] ss:$16 sps:$4 sm:$0xff]   ;;  %v11571_v18 = vld [vmem:[%s14143_s26 + $0x48] sm:$0xff]  }
 0x5df   : > { %6316 = vmatmul.mubr.bf16.vlgmr.msra.gmra.mxu0 %v5996_v36  ;;  %10847 = vmatprep.subr.bf16.mxu1 %v11546_v23  ;;  %v11466_v0 = vld [vmem:[%s14129_s0 + $0x120] ss:$16 sps:$4 sm:$0xff]   ;;  %v11474_v42 = vld [vmem:[%s14129_s0 + $0x4e4] ss:$16 sps:$4 sm:$0xff]   ;;  %v11575_v36 = vld [vmem:[%s14143_s26 + $0x8] sm:$0xff]  }
 0x5e0   : > { %8110 = vmatpush1.bf16.msra.mxu0 %v11424_v16  ;;  %v12054_v57 = vld [vmem:[%s12837_s18] sm:$0xff]  ;;  %v11566_v40 = vld [vmem:[%s14143_s26 + $0x50] sm:$0xff]  }
 0x5e1   : > { %8111 = vmatprep.subr.bf16.mxu0 %v11429_v29  ;;  %v13515_v43 = vpop.eup %12032  ;;  %v11469_v45 = vld [vmem:[%s14129_s0 + $0x100] ss:$16 sps:$4 sm:$0xff]   ;;  %v11477_v37 = vld [vmem:[%s14129_s0 + $0x4c4] ss:$16 sps:$4 sm:$0xff]  }
 0x5e2   : > { %v6536_v22 = vmul.f32 %v12053_v8, %v13515_v43  ;;  %10848 = vmatpush3.bf16.msra.mxu1 %v11550_v7  ;;  %v6535_v31 = vmul.f32 %v12054_v57, %v13515_v43  ;;  %v6540_v60 = vmul.f32 %v12055_v51, %v13515_v43  ;;  %v11472_v14 = vld [vmem:[%s14129_s0 + $0x4e0] ss:$16 sps:$4 sm:$0xff]   ;;  %v11480_v52 = vld [vmem:[%s14129_s0 + $0x4a4] ss:$16 sps:$4 sm:$0xff]   ;;  %v11538_v57 = vld [vmem:[%s14129_s0 + $0x28] ss:$16 sps:$4 sm:$0xff]  }
 0x5e3   : > { %10849 = vmatprep.subr.bf16.mxu1 %v11551_v55  ;;  %v11475_v59 = vld [vmem:[%s14129_s0 + $0x4c0] ss:$16 sps:$4 sm:$0xff]   ;;  %v11483_v5 = vld [vmem:[%s14129_s0 + $0x484] ss:$16 sps:$4 sm:$0xff]   ;;  %v11549_v51 = vld [vmem:[%s14129_s0 + $0x1ec] ss:$16 sps:$4 sm:$0xff]  }
 0x5e4   : > { %8112 = vmatpush1.bf16.msra.mxu0 %v11427_v3  ;;  %v13521_v50 = vpack.c.bf16 %v6536_v22, %v6536_v22  ;;  %v13563_v26 = vpack.c.bf16 %v6535_v31, %v6535_v31  ;;  %v13566_v46 = vpack.c.bf16 %v6540_v60, %v6540_v60  ;;  %v11478_v61 = vld [vmem:[%s14129_s0 + $0x4a0] ss:$16 sps:$4 sm:$0xff]   ;;  %v11486_v9 = vld [vmem:[%s14129_s0 + $0x464] ss:$16 sps:$4 sm:$0xff]   ;;  %v11544_v31 = vld [vmem:[%s14129_s0 + $0xc] ss:$16 sps:$4 sm:$0xff]  }
 0x5e5   : > { %8113 = vmatprep.subr.bf16.mxu0 %v11432_v4  ;;  %v11570_v58 = vld [vmem:[%s14143_s26 + $0x10] sm:$0xff]   ;;  %v11576_v29 = vld [vmem:[%s14143_s26 + $0x40] sm:$0xff]   ;;  %v11547_v60 = vld [vmem:[%s14129_s0 + $0x1e8] ss:$16 sps:$4 sm:$0xff]  }
 0x5e6   : > { %8141 = vmatprep.mubr.bf16.mxu0 %v13521_v50  ;;  %10850 = vmatpush3.bf16.msra.mxu1 %v11555_v13  ;;  %v11481_v17 = vld [vmem:[%s14129_s0 + $0x480] ss:$16 sps:$4 sm:$0xff]   ;;  %v11489_v3 = vld [vmem:[%s14129_s0 + $0x444] ss:$16 sps:$4 sm:$0xff]  }
 0x5e7   : > { %10851 = vmatprep.subr.bf16.mxu1 %v11556_v2  ;;  %v11484_v16 = vld [vmem:[%s14129_s0 + $0x460] ss:$16 sps:$4 sm:$0xff]   ;;  %v11583_v8 = vld [vmem:[%s14129_s0 + $0x2e4] ss:$16 sps:$4 sm:$0xff]  }
 0x5e8   : > { %8114 = vmatpush1.bf16.msra.mxu0 %v11430_v48  ;;  %v11580_v4 = vld [vmem:[%s14143_s26] sm:$0xff]  }
 0x5e9   : > { %8115 = vmatprep.subr.bf16.mxu0 %v11435_v41  ;;  %v11487_v22 = vld [vmem:[%s14129_s0 + $0x440] ss:$16 sps:$4 sm:$0xff]   ;;  %v11492_v48 = vld [vmem:[%s14129_s0 + $0x424] ss:$16 sps:$4 sm:$0xff]  }
 0x5ea   : > { %10852 = vmatpush3.bf16.msra.mxu1 %v11560_v20  ;;  %v11490_v41 = vld [vmem:[%s14129_s0 + $0x420] ss:$16 sps:$4 sm:$0xff]   ;;  %v11525_v20 = vld [vmem:[%s14129_s0 + $0xcc] ss:$16 sps:$4 sm:$0xff]  }
 0x5eb   : > { %10853 = vmatprep.subr.bf16.mxu1 %v11561_v32  ;;  %v11505_v33 = vld [vmem:[%s14129_s0 + $0x580] ss:$16 sps:$4 sm:$0xff]   ;;  %v11528_v32 = vld [vmem:[%s14129_s0 + $0xac] ss:$16 sps:$4 sm:$0xff]  }
 0x5ec   : > { %8116 = vmatpush1.bf16.msra.mxu0 %v11433_v11  ;;  %v11495_v11 = vld [vmem:[%s14129_s0 + $0x404] ss:$16 sps:$4 sm:$0xff]   ;;  %v11508_v19 = vld [vmem:[%s14129_s0 + $0x560] ss:$16 sps:$4 sm:$0xff]  }
 0x5ed   : > { %8117 = vmatprep.subr.bf16.mxu0 %v11438_v56  ;;  %v11493_v56 = vld [vmem:[%s14129_s0 + $0x400] ss:$16 sps:$4 sm:$0xff]  }
 0x5ee   : > { %10854 = vmatpush3.bf16.msra.mxu1 %v11565_v25  ;;  %v11511_v23 = vld [vmem:[%s14129_s0 + $0x540] ss:$16 sps:$4 sm:$0xff]   ;;  %v11557_v25 = vld [vmem:[%s14129_s0 + $0x1a8] ss:$16 sps:$4 sm:$0xff]  }
 0x5ef   : > { %10855 = vmatprep.subr.bf16.mxu1 %v11566_v40  ;;  %v11514_v7 = vld [vmem:[%s14129_s0 + $0x520] ss:$16 sps:$4 sm:$0xff]   ;;  %v11574_v40 = vld [vmem:[%s14129_s0 + $0x14c] ss:$16 sps:$4 sm:$0xff]  }
 0x5f0   : > { %8118 = vmatpush1.bf16.msra.mxu0 %v11436_v49  ;;  %v11498_v49 = vld [vmem:[%s14129_s0 + $0x5e4] ss:$16 sps:$4 sm:$0xff]   ;;  %v11517_v13 = vld [vmem:[%s14129_s0 + $0x500] ss:$16 sps:$4 sm:$0xff]  }
 0x5f1   : > { %8119 = vmatprep.subr.bf16.mxu0 %v11441_v35  ;;  %v11496_v35 = vld [vmem:[%s14129_s0 + $0x5e0] ss:$16 sps:$4 sm:$0xff]  }
 0x5f2   : > { %10856 = vmatpush3.bf16.msra.mxu1 %v11570_v58  ;;  %v12056_v55 = vld [vmem:[%s12837_s18 + $0x20] sm:$0xff]  ;;  %v11572_v58 = vld [vmem:[%s14129_s0 + $0x148] ss:$16 sps:$4 sm:$0xff]  }
 0x5f3   : > { %10857 = vmatprep.subr.bf16.mxu1 %v11571_v18  ;;  %v11586_v18 = vld [vmem:[%s14129_s0 + $0x10c] ss:$16 sps:$4 sm:$0xff]  }
 0x5f4   : > { %8120 = vmatpush1.bf16.msra.mxu0 %v11439_v47  ;;  %v11501_v47 = vld [vmem:[%s14129_s0 + $0x5c4] ss:$16 sps:$4 sm:$0xff]  }
 0x5f5   : > { %8121 = vmatprep.subr.bf16.mxu0 %v11444_v39  ;;  %v11499_v39 = vld [vmem:[%s14129_s0 + $0x5c0] ss:$16 sps:$4 sm:$0xff]  }
 0x5f6   : > { %10858 = vmatpush3.bf16.msra.mxu1 %v11575_v36  ;;  %v11592_v36 = vld [vmem:[%s14129_s0 + $0x4ec] ss:$16 sps:$4 sm:$0xff]  }
 0x5f7   : > { %10859 = vmatprep.subr.bf16.mxu1 %v11576_v29  ;;  %v5837_v29 = vld [vmem:[%s14144_s28] sm:$0x3]  ;;  %s14158_s28 = sld [smem:[#allocation15_spill]] }
 0x5f8   : > { %8122 = vmatpush1.bf16.msra.mxu0 %v11442_v1  ;;  %v11504_v1 = vld [vmem:[%s14129_s0 + $0x5a4] ss:$16 sps:$4 sm:$0xff]  }
 0x5f9   : > { %8123 = vmatprep.subr.bf16.mxu0 %v11447_v10  ;;  %v11502_v10 = vld [vmem:[%s14129_s0 + $0x5a0] ss:$16 sps:$4 sm:$0xff]  }
 0x5fa   : > { %10860 = vmatpush3.bf16.msra.mxu1 %v11580_v4  ;;  %v14145_v4 = vld [vmem:[#allocation17_spill] sm:$0xff] }
 0x5fb   : > { %8150 = vmatprep.subr.bf16.mxu1 %v11583_v8  ;;  %v5846_v8 = vrot.slane %v5837_v29, %v14145_v4 }
 0x5fc   : > { %8124 = vmatpush1.bf16.msra.mxu0 %v11445_v44  ;;  %v11507_v44 = vld [vmem:[%s14129_s0 + $0x584] ss:$16 sps:$4 sm:$0xff]  }
 0x5fd   : > { %8125 = vmatprep.subr.bf16.mxu0 %v11450_v62  ;;  %v11510_v62 = vld [vmem:[%s14129_s0 + $0x564] ss:$16 sps:$4 sm:$0xff]  }
 0x600   : > { %8126 = vmatpush2.bf16.msra.mxu0 %v11448_v53  ;;  %v11513_v53 = vld [vmem:[%s14129_s0 + $0x544] ss:$16 sps:$4 sm:$0xff]  }
 0x601   : > { %8127 = vmatprep.subr.bf16.mxu0 %v11453_v34  ;;  %v11516_v34 = vld [vmem:[%s14129_s0 + $0x524] ss:$16 sps:$4 sm:$0xff]  }
 0x604   : > { %8128 = vmatpush2.bf16.msra.mxu0 %v11451_v24  ;;  %v11519_v24 = vld [vmem:[%s14129_s0 + $0x504] ss:$16 sps:$4 sm:$0xff]  }
 0x605   : > { %8129 = vmatprep.subr.bf16.mxu0 %v11456_v63  ;;  %v6539_v63 = vmul.f32 %v12056_v55, %v13515_v43 }
 0x607   : > { %v13611_v2 = vpack.c.bf16 %v6539_v63, %v6539_v63  ;;  %v12057_v63 = vld [vmem:[%s12837_s18 + $0x18] sm:$0xff] }
 0x608   : > { %8130 = vmatpush2.bf16.msra.mxu0 %v11454_v28  ;;  %v11522_v28 = vld [vmem:[%s14129_s0 + $0xec] ss:$16 sps:$4 sm:$0xff]  }
 0x609   : > { %8131 = vmatprep.subr.bf16.mxu0 %v11459_v27  ;;  %v11520_v27 = vld [vmem:[%s14129_s0 + $0xe8] ss:$16 sps:$4 sm:$0xff]  }
 0x60c   : > { %8132 = vmatpush2.bf16.msra.mxu0 %v11457_v38  ;;  %v11523_v38 = vld [vmem:[%s14129_s0 + $0xc8] ss:$16 sps:$4 sm:$0xff]  }
 0x60d   : > { %8133 = vmatprep.subr.bf16.mxu0 %v11462_v30  ;;  %v11526_v30 = vld [vmem:[%s14129_s0 + $0xa8] ss:$16 sps:$4 sm:$0xff]  }
 0x610   : > { %8134 = vmatpush2.bf16.msra.mxu0 %v11460_v6  ;;  %v11531_v6 = vld [vmem:[%s14129_s0 + $0x8c] ss:$16 sps:$4 sm:$0xff]  }
 0x611   : > { %8135 = vmatprep.subr.bf16.mxu0 %v11465_v12  ;;  %v11529_v12 = vld [vmem:[%s14129_s0 + $0x88] ss:$16 sps:$4 sm:$0xff]  }
 0x614   : > { %8136 = vmatpush2.bf16.msra.mxu0 %v11463_v15  ;;  %v11534_v15 = vld [vmem:[%s14129_s0 + $0x6c] ss:$16 sps:$4 sm:$0xff]  }
 0x615   : > { %8137 = vmatprep.subr.bf16.mxu0 %v11468_v54  ;;  %v11532_v54 = vld [vmem:[%s14129_s0 + $0x68] ss:$16 sps:$4 sm:$0xff]  }
 0x618   : > { %8138 = vmatpush2.bf16.msra.mxu0 %v11466_v0  ;;  %v11535_v0 = vld [vmem:[%s14129_s0 + $0x48] ss:$16 sps:$4 sm:$0xff]  }
 0x619   : > { %8139 = vmatprep.subr.bf16.mxu0 %v11471_v21  ;;  %v11540_v21 = vld [vmem:[%s14129_s0 + $0x2c] ss:$16 sps:$4 sm:$0xff]  }
 0x61c   : > { %8140 = vmatpush2.bf16.msra.mxu0 %v11469_v45  ;;  %v11542_v45 = vld [vmem:[%s14129_s0 + $0x8] ss:$16 sps:$4 sm:$0xff]  }
 0x61d   : > { %8191 = vmatprep.subr.bf16.mxu0 %v11474_v42  ;;  %v11554_v42 = vld [vmem:[%s14129_s0 + $0x1cc] ss:$16 sps:$4 sm:$0xff]  }
 0x61f   : > { %8142 = vmatmul.mubr.bf16.vlgmr.msra.gmra.mxu0 %v13563_v26 }
 0x620   : > { %8192 = vmatpush1.bf16.msra.mxu0 %v11472_v14  ;;  %8223 = vmatprep.mubr.bf16.mxu0 %v13566_v46  ;;  %v11552_v14 = vld [vmem:[%s14129_s0 + $0x1c8] ss:$16 sps:$4 sm:$0xff]  }
 0x621   : > { %8193 = vmatprep.subr.bf16.mxu0 %v11477_v37  ;;  %v11559_v37 = vld [vmem:[%s14129_s0 + $0x1ac] ss:$16 sps:$4 sm:$0xff]  }
 0x624   : > { %8194 = vmatpush1.bf16.msra.mxu0 %v11475_v59  ;;  %v11564_v59 = vld [vmem:[%s14129_s0 + $0x18c] ss:$16 sps:$4 sm:$0xff]  }
 0x625   : > { %8195 = vmatprep.subr.bf16.mxu0 %v11480_v52  ;;  %v11562_v52 = vld [vmem:[%s14129_s0 + $0x188] ss:$16 sps:$4 sm:$0xff]  }
 0x628   : > { %8196 = vmatpush1.bf16.msra.mxu0 %v11478_v61  ;;  %v11569_v61 = vld [vmem:[%s14129_s0 + $0x16c] ss:$16 sps:$4 sm:$0xff]  }
 0x629   : > { %8197 = vmatprep.subr.bf16.mxu0 %v11483_v5  ;;  %v11567_v5 = vld [vmem:[%s14129_s0 + $0x168] ss:$16 sps:$4 sm:$0xff]  }
 0x62c   : > { %8198 = vmatpush1.bf16.msra.mxu0 %v11481_v17  ;;  %v11579_v17 = vld [vmem:[%s14129_s0 + $0x12c] ss:$16 sps:$4 sm:$0xff]  }
 0x62d   : > { %8199 = vmatprep.subr.bf16.mxu0 %v11486_v9  ;;  %v11577_v9 = vld [vmem:[%s14129_s0 + $0x128] ss:$16 sps:$4 sm:$0xff]  }
 0x630   : > { %8200 = vmatpush1.bf16.msra.mxu0 %v11484_v16  ;;  %v11584_v16 = vld [vmem:[%s14129_s0 + $0x108] ss:$16 sps:$4 sm:$0xff]  }
 0x631   : > { %8201 = vmatprep.subr.bf16.mxu0 %v11489_v3  ;;  %v11590_v3 = vld [vmem:[%s14129_s0 + $0x4e8] ss:$16 sps:$4 sm:$0xff]  }
 0x634   : > { %8202 = vmatpush1.bf16.msra.mxu0 %v11487_v22  ;;  %v11598_v22 = vld [vmem:[%s14129_s0 + $0x4cc] ss:$16 sps:$4 sm:$0xff]  }
 0x635   : > { %8203 = vmatprep.subr.bf16.mxu0 %v11492_v48  ;;  %v14146_v48 = vld [vmem:[#allocation18_spill] sm:$0xff] }
 0x638   : > { %8204 = vmatpush1.bf16.msra.mxu0 %v11490_v41  ;;  %v5842_v41 = vrot.slane %v5837_v29, %v14146_v48  ;;  %v11617_v29 = vld [vmem:[%s14129_s0 + $0x220] ss:$16 sps:$4 sm:$0xff]  }
 0x639   : > { %8205 = vmatprep.subr.bf16.mxu0 %v11495_v11 }
 0x63c   : > { %8206 = vmatpush1.bf16.msra.mxu0 %v11493_v56 }
 0x63d   : > { %8207 = vmatprep.subr.bf16.mxu0 %v11498_v49 }
 0x640   : > { %8208 = vmatpush2.bf16.msra.mxu0 %v11496_v35  ;;  %v11596_v35 = vld [vmem:[%s14129_s0 + $0x4c8] ss:$16 sps:$4 sm:$0xff]  }
 0x641   : > { %8209 = vmatprep.subr.bf16.mxu0 %v11501_v47 }
 0x644   : > { %8210 = vmatpush2.bf16.msra.mxu0 %v11499_v39 }
 0x645   : > { %8211 = vmatprep.subr.bf16.mxu0 %v11504_v1  ;;  %v11604_v1 = vld [vmem:[%s14129_s0 + $0x4ac] ss:$16 sps:$4 sm:$0xff]  }
 0x648   : > { %8212 = vmatpush2.bf16.msra.mxu0 %v11502_v10 }
 0x649   : > { %8213 = vmatprep.subr.bf16.mxu0 %v11507_v44 }
 0x64c   : > { %8214 = vmatpush2.bf16.msra.mxu0 %v11505_v33 }
 0x64d   : > { %8215 = vmatprep.subr.bf16.mxu0 %v11510_v62 }
 0x650   : > { %8216 = vmatpush2.bf16.msra.mxu0 %v11508_v19 }
 0x651   : > { %8217 = vmatprep.subr.bf16.mxu0 %v11513_v53  ;;  %v11602_v53 = vld [vmem:[%s14129_s0 + $0x4a8] ss:$16 sps:$4 sm:$0xff]  }
 0x654   : > { %8218 = vmatpush2.bf16.msra.mxu0 %v11511_v23 }
 0x655   : > { %8219 = vmatprep.subr.bf16.mxu0 %v11516_v34 }
 0x658   : > { %8220 = vmatpush2.bf16.msra.mxu0 %v11514_v7 }
 0x659   : > { %8221 = vmatprep.subr.bf16.mxu0 %v11519_v24 }
 0x65c   : > { %8222 = vmatpush2.bf16.msra.mxu0 %v11517_v13  ;;  %v6538_v13 = vmul.f32 %v12057_v63, %v13515_v43  ;;  %v11659_v63 = vld [vmem:[%s14129_s0 + $0x340] ss:$16 sps:$4 sm:$0xff]  }
 0x65d   : > { %8273 = vmatprep.subr.bf16.mxu0 %v11522_v28 }
 0x65f   : > { %8224 = vmatmul.mubr.bf16.vlgmr.msra.gmra.mxu0 %v13611_v2 }
 0x660   : > { %8274 = vmatpush1.bf16.msra.mxu0 %v11520_v27  ;;  %8305 = vmatprep.mubr.bf16.mxu0 %v13521_v50  ;;  %v11537_v50 = vld [vmem:[%s14129_s0 + $0x4c] ss:$16 sps:$4 sm:$0xff]   ;;  %v11608_v27 = vld [vmem:[%s14129_s0 + $0x488] ss:$16 sps:$4 sm:$0xff]  }
 0x661   : > { %8275 = vmatprep.subr.bf16.mxu0 %v11525_v20 }
 0x664   : > { %8276 = vmatpush1.bf16.msra.mxu0 %v11523_v38 }
 0x665   : > { %8277 = vmatprep.subr.bf16.mxu0 %v11528_v32  ;;  %v11616_v32 = vld [vmem:[%s14129_s0 + $0x46c] ss:$16 sps:$4 sm:$0xff]  }
 0x668   : > { %8278 = vmatpush1.bf16.msra.mxu0 %v11526_v30 }
 0x669   : > { %8279 = vmatprep.subr.bf16.mxu0 %v11531_v6 }
 0x66c   : > { %8280 = vmatpush1.bf16.msra.mxu0 %v11529_v12  ;;  %v11581_v12 = vld [vmem:[%s14129_s0 + $0x2e0] ss:$16 sps:$4 sm:$0xff]  }
 0x66d   : > { %8281 = vmatprep.subr.bf16.mxu0 %v11534_v15  ;;  %v13663_v15 = vpack.c.bf16 %v6538_v13, %v6538_v13  ;;  %v11667_v13 = vld [vmem:[%s14129_s0 + $0x324] ss:$16 sps:$4 sm:$0xff]  }
 0x670   : > { %8282 = vmatpush1.bf16.msra.mxu0 %v11532_v54 }
 0x671   : > { %8283 = vmatprep.subr.bf16.mxu0 %v11537_v50  ;;  %v11589_v50 = vld [vmem:[%s14129_s0 + $0x2c4] ss:$16 sps:$4 sm:$0xff]  }
 0x674   : > { %8284 = vmatpush1.bf16.msra.mxu0 %v11535_v0  ;;  %v11614_v0 = vld [vmem:[%s14129_s0 + $0x468] ss:$16 sps:$4 sm:$0xff]  }
 0x675   : > { %8285 = vmatprep.subr.bf16.mxu0 %v11540_v21  ;;  %v11622_v21 = vld [vmem:[%s14129_s0 + $0x44c] ss:$16 sps:$4 sm:$0xff]  }
 0x678   : > { %8286 = vmatpush1.bf16.msra.mxu0 %v11538_v57  ;;  %v11587_v57 = vld [vmem:[%s14129_s0 + $0x2c0] ss:$16 sps:$4 sm:$0xff]  }
 0x679   : > { %8287 = vmatprep.subr.bf16.mxu0 %v11544_v31  ;;  %v11595_v31 = vld [vmem:[%s14129_s0 + $0x2a4] ss:$16 sps:$4 sm:$0xff]  }
 0x67c   : > { %8288 = vmatpush1.bf16.msra.mxu0 %v11542_v45  ;;  %v11620_v45 = vld [vmem:[%s14129_s0 + $0x448] ss:$16 sps:$4 sm:$0xff]  }
 0x67d   : > { %8289 = vmatprep.subr.bf16.mxu0 %v11549_v51  ;;  %v11628_v51 = vld [vmem:[%s14129_s0 + $0x42c] ss:$16 sps:$4 sm:$0xff]  }
 0x680   : > { %8290 = vmatpush2.bf16.msra.mxu0 %v11547_v60  ;;  %v11593_v60 = vld [vmem:[%s14129_s0 + $0x2a0] ss:$16 sps:$4 sm:$0xff]  }
 0x681   : > { %8291 = vmatprep.subr.bf16.mxu0 %v11554_v42  ;;  %v11601_v42 = vld [vmem:[%s14129_s0 + $0x284] ss:$16 sps:$4 sm:$0xff]  }
 0x684   : > { %8292 = vmatpush2.bf16.msra.mxu0 %v11552_v14  ;;  %v11626_v14 = vld [vmem:[%s14129_s0 + $0x428] ss:$16 sps:$4 sm:$0xff]  }
 0x685   : > { %8293 = vmatprep.subr.bf16.mxu0 %v11559_v37  ;;  %v11634_v37 = vld [vmem:[%s14129_s0 + $0x40c] ss:$16 sps:$4 sm:$0xff]  }
 0x688   : > { %8294 = vmatpush2.bf16.msra.mxu0 %v11557_v25  ;;  %v11599_v25 = vld [vmem:[%s14129_s0 + $0x280] ss:$16 sps:$4 sm:$0xff]  }
 0x689   : > { %8295 = vmatprep.subr.bf16.mxu0 %v11564_v59  ;;  %v11607_v59 = vld [vmem:[%s14129_s0 + $0x264] ss:$16 sps:$4 sm:$0xff]  }
 0x68c   : > { %8296 = vmatpush2.bf16.msra.mxu0 %v11562_v52  ;;  %v11632_v52 = vld [vmem:[%s14129_s0 + $0x408] ss:$16 sps:$4 sm:$0xff]  }
 0x68d   : > { %8297 = vmatprep.subr.bf16.mxu0 %v11569_v61  ;;  %v11640_v61 = vld [vmem:[%s14129_s0 + $0x5ec] ss:$16 sps:$4 sm:$0xff]  }
 0x690   : > { %8298 = vmatpush2.bf16.msra.mxu0 %v11567_v5  ;;  %v11605_v5 = vld [vmem:[%s14129_s0 + $0x260] ss:$16 sps:$4 sm:$0xff]  }
 0x691   : > { %8299 = vmatprep.subr.bf16.mxu0 %v11574_v40  ;;  %v11613_v40 = vld [vmem:[%s14129_s0 + $0x244] ss:$16 sps:$4 sm:$0xff]  }
 0x694   : > { %8300 = vmatpush2.bf16.msra.mxu0 %v11572_v58  ;;  %v11638_v58 = vld [vmem:[%s14129_s0 + $0x5e8] ss:$16 sps:$4 sm:$0xff]  }
 0x695   : > { %8301 = vmatprep.subr.bf16.mxu0 %v11579_v17  ;;  %v11646_v17 = vld [vmem:[%s14129_s0 + $0x5cc] ss:$16 sps:$4 sm:$0xff]  }
 0x698   : > { %8302 = vmatpush2.bf16.msra.mxu0 %v11577_v9  ;;  %v11611_v9 = vld [vmem:[%s14129_s0 + $0x240] ss:$16 sps:$4 sm:$0xff]  }
 0x699   : > { %8303 = vmatprep.subr.bf16.mxu0 %v11586_v18  ;;  %v11619_v18 = vld [vmem:[%s14129_s0 + $0x224] ss:$16 sps:$4 sm:$0xff]  }
 0x69c   : > { %8304 = vmatpush2.bf16.msra.mxu0 %v11584_v16  ;;  %v11644_v16 = vld [vmem:[%s14129_s0 + $0x5c8] ss:$16 sps:$4 sm:$0xff]  }
 0x69d   : > { %8355 = vmatprep.subr.bf16.mxu0 %v11592_v36  ;;  %v6274_v11 = vpop.f32.mrf.mxu1  ;;  %v11652_v36 = vld [vmem:[%s14129_s0 + $0x5ac] ss:$16 sps:$4 sm:$0xff]  }
 0x69e   : > { %v6275_v10 = vadd.f32 %v6274_v11, %v5842_v41  ;;  %v11631_v11 = vld [vmem:[%s14129_s0 + $0x3e4] ss:$16 sps:$4 sm:$0xff]  }
 0x69f   : > { %v6317_v56 = vpop.f32.mrf.mxu0  ;;  %8306 = vmatmul.mubr.bf16.vlgmr.msra.gmra.mxu0 %v13563_v26  ;;  %v6276_v49 = vpop.f32.mrf.mxu1 }
 0x6a0   : > { %8356 = vmatpush1.bf16.msra.mxu0 %v11590_v3  ;;  %8387 = vmatprep.mubr.bf16.mxu0 %v13566_v46  ;;  %v6277_v47 = vadd.f32 %v6276_v49, %v5846_v8  ;;  %v11610_v46 = vld [vmem:[%s14129_s0 + $0x48c] ss:$16 sps:$4 sm:$0xff]   ;;  %v6318_v24 = vadd.f32 %v6317_v56, %v6275_v10  ;;  %v11625_v3 = vld [vmem:[%s14129_s0 + $0x204] ss:$16 sps:$4 sm:$0xff]   ;;  %v11656_v56 = vld [vmem:[%s14129_s0 + $0x588] ss:$16 sps:$4 sm:$0xff]  }
 0x6a1   : > { %v6319_v39 = vpop.f32.mrf.mxu0  ;;  %8357 = vmatprep.subr.bf16.mxu0 %v11598_v22  ;;  %v6278_v44 = vpop.f32.mrf.mxu1  ;;  %v11658_v22 = vld [vmem:[%s14129_s0 + $0x58c] ss:$16 sps:$4 sm:$0xff]   ;;  %v11635_v10 = vld [vmem:[%s14129_s0 + $0x3c0] ss:$16 sps:$4 sm:$0xff]  }
 0x6a2   : > { %v6279_v33 = vadd.f32 %v6278_v44, %v5842_v41  ;;  %v6320_v26 = vadd.f32 %v6319_v39, %v6277_v47  ;;  %v6326_v30 = vmax.f32 %v6318_v24, 0.0  ;;  %v11623_v41 = vld [vmem:[%s14129_s0 + $0x200] ss:$16 sps:$4 sm:$0xff]   ;;  %v11664_v49 = vld [vmem:[%s14129_s0 + $0x56c] ss:$16 sps:$4 sm:$0xff]  }
 0x6a3   : > { %v6321_v62 = vpop.f32.mrf.mxu0  ;;  %v6280_v19 = vpop.f32.mrf.mxu1  ;;  %v11637_v47 = vld [vmem:[%s14129_s0 + $0x3c4] ss:$16 sps:$4 sm:$0xff]   ;;  %v11662_v39 = vld [vmem:[%s14129_s0 + $0x568] ss:$16 sps:$4 sm:$0xff]   ;;  %v11653_v24 = vld [vmem:[%s14129_s0 + $0x360] ss:$16 sps:$4 sm:$0xff]  }
 0x6a4   : > { %8358 = vmatpush1.bf16.msra.mxu0 %v11596_v35  ;;  %v6322_v23 = vadd.f32 %v6321_v62, %v6279_v33  ;;  %v6281_v34 = vadd.f32 %v6280_v19, %v5846_v8  ;;  %v6327_v20 = vmax.f32 %v6320_v26, 0.0  ;;  %v11650_v8 = vld [vmem:[%s14129_s0 + $0x5a8] ss:$16 sps:$4 sm:$0xff]   ;;  %v11629_v35 = vld [vmem:[%s14129_s0 + $0x3e0] ss:$16 sps:$4 sm:$0xff]  }
 0x6a5   : > { %v6323_v7 = vpop.f32.mrf.mxu0  ;;  %8359 = vmatprep.subr.bf16.mxu0 %v11604_v1  ;;  %v11670_v1 = vld [vmem:[%s14129_s0 + $0x54c] ss:$16 sps:$4 sm:$0xff]   ;;  %v11643_v44 = vld [vmem:[%s14129_s0 + $0x3a4] ss:$16 sps:$4 sm:$0xff]   ;;  %v11668_v33 = vld [vmem:[%s14129_s0 + $0x548] ss:$16 sps:$4 sm:$0xff]  }
 0x6a6   : > { %v6324_v55 = vadd.f32 %v6323_v7, %v6281_v34  ;;  %v6328_v28 = vmax.f32 %v6322_v23, 0.0  ;;  %v11676_v62 = vld [vmem:[%s14129_s0 + $0x52c] ss:$16 sps:$4 sm:$0xff]   ;;  %v11641_v19 = vld [vmem:[%s14129_s0 + $0x3a0] ss:$16 sps:$4 sm:$0xff]  }
 0x6a7   : > { %v11674_v26 = vld [vmem:[%s14129_s0 + $0x528] ss:$16 sps:$4 sm:$0xff]   ;;  %v11682_v23 = vld [vmem:[%s14129_s0 + $0x50c] ss:$16 sps:$4 sm:$0xff]   ;;  %v11647_v34 = vld [vmem:[%s14129_s0 + $0x380] ss:$16 sps:$4 sm:$0xff]  }
 0x6a8   : > { %8360 = vmatpush1.bf16.msra.mxu0 %v11602_v53  ;;  %v6329_v38 = vmax.f32 %v6324_v55, 0.0  ;;  %v6330_v54 = vpack.c.bf16 %v6328_v28, %v6326_v30  ;;  %v11649_v53 = vld [vmem:[%s14129_s0 + $0x384] ss:$16 sps:$4 sm:$0xff]   ;;  %v11665_v28 = vld [vmem:[%s14129_s0 + $0x320] ss:$16 sps:$4 sm:$0xff]  }
 0x6a9   : > { %8361 = vmatprep.subr.bf16.mxu0 %v11610_v46  ;;  %v11655_v7 = vld [vmem:[%s14129_s0 + $0x364] ss:$16 sps:$4 sm:$0xff]   ;;  %v11680_v46 = vld [vmem:[%s14129_s0 + $0x508] ss:$16 sps:$4 sm:$0xff]  }
 0x6aa   : > { %v6331_v6 = vpack.c.bf16 %v6329_v38, %v6327_v20  ;;  %v11661_v55 = vld [vmem:[%s14129_s0 + $0x344] ss:$16 sps:$4 sm:$0xff]   ;;  %v11671_v20 = vld [vmem:[%s14129_s0 + $0x300] ss:$16 sps:$4 sm:$0xff]  }
 0x6ab   : > { %v11679_v38 = vld [vmem:[%s14129_s0 + $0x6e4] ss:$16 sps:$4 sm:$0xff]  }
 0x6ac   : > { %8362 = vmatpush1.bf16.msra.mxu0 %v11608_v27  ;;  %6499 = vmatprep.mubr.bf16.mxu1 %v6331_v6  ;;  %v11673_v27 = vld [vmem:[%s14129_s0 + $0x304] ss:$16 sps:$4 sm:$0xff]   ;;  %v12059_v6 = vld [vmem:[%s12837_s18 + $0x38] sm:$0xff] }
 0x6ad   : > { %8363 = vmatprep.subr.bf16.mxu0 %v11616_v32  ;;  %6500 = vmatmul.mubr.bf16.vlgmr.msra.gmra.mxu1 %v6330_v54  ;;  %v12058_v32 = vld [vmem:[%s12837_s18 + $0x10] sm:$0xff] }
 0x6ae   : > { %8151 = vmatpush1.bf16.msra.mxu1 %v11581_v12  ;;  %8182 = vmatprep.mubr.bf16.mxu1 %v13663_v15  ;;  %v6537_v30 = vmul.f32 %v12058_v32, %v13515_v43  ;;  %v11677_v12 = vld [vmem:[%s14129_s0 + $0x6e0] ss:$16 sps:$4 sm:$0xff]   ;;  %v11740_v32 = vld [vmem:[%s14129_s0 + $0x268] ss:$16 sps:$4 sm:$0xff]  }
 0x6af   : > { %8152 = vmatprep.subr.bf16.mxu1 %v11589_v50  ;;  %v11685_v50 = vld [vmem:[%s14129_s0 + $0x6c4] ss:$16 sps:$4 sm:$0xff]  }
 0x6b0   : > { %8364 = vmatpush1.bf16.msra.mxu0 %v11614_v0  ;;  %v13726_v54 = vpack.c.bf16 %v6537_v30, %v6537_v30  ;;  %v11830_v30 = vld [vmem:[%s14147_s1 + $0x50] ss:$8 sps:$4 sm:$0xff]  }
 0x6b1   : > { %8365 = vmatprep.subr.bf16.mxu0 %v11622_v21  ;;  %v11683_v21 = vld [vmem:[%s14129_s0 + $0x6c0] ss:$16 sps:$4 sm:$0xff]  }
 0x6b2   : > { %8153 = vmatpush1.bf16.msra.mxu1 %v11587_v57  ;;  %v11688_v57 = vld [vmem:[%s14129_s0 + $0x6a4] ss:$16 sps:$4 sm:$0xff]  }
 0x6b3   : > { %8154 = vmatprep.subr.bf16.mxu1 %v11595_v31  ;;  %v11686_v31 = vld [vmem:[%s14129_s0 + $0x6a0] ss:$16 sps:$4 sm:$0xff]  }
 0x6b4   : > { %8366 = vmatpush1.bf16.msra.mxu0 %v11620_v45  ;;  %v11691_v45 = vld [vmem:[%s14129_s0 + $0x684] ss:$16 sps:$4 sm:$0xff]  }
 0x6b5   : > { %8367 = vmatprep.subr.bf16.mxu0 %v11628_v51  ;;  %v11689_v51 = vld [vmem:[%s14129_s0 + $0x680] ss:$16 sps:$4 sm:$0xff]  }
 0x6b6   : > { %8155 = vmatpush1.bf16.msra.mxu1 %v11593_v60  ;;  %v11694_v60 = vld [vmem:[%s14129_s0 + $0x664] ss:$16 sps:$4 sm:$0xff]  }
 0x6b7   : > { %8156 = vmatprep.subr.bf16.mxu1 %v11601_v42  ;;  %v11692_v42 = vld [vmem:[%s14129_s0 + $0x660] ss:$16 sps:$4 sm:$0xff]  }
 0x6b8   : > { %8368 = vmatpush1.bf16.msra.mxu0 %v11626_v14  ;;  %v11697_v14 = vld [vmem:[%s14129_s0 + $0x644] ss:$16 sps:$4 sm:$0xff]  }
 0x6b9   : > { %8369 = vmatprep.subr.bf16.mxu0 %v11634_v37  ;;  %v11695_v37 = vld [vmem:[%s14129_s0 + $0x640] ss:$16 sps:$4 sm:$0xff]  }
 0x6ba   : > { %8157 = vmatpush1.bf16.msra.mxu1 %v11599_v25  ;;  %v11700_v25 = vld [vmem:[%s14129_s0 + $0x624] ss:$16 sps:$4 sm:$0xff]  }
 0x6bb   : > { %8158 = vmatprep.subr.bf16.mxu1 %v11607_v59  ;;  %v11698_v59 = vld [vmem:[%s14129_s0 + $0x620] ss:$16 sps:$4 sm:$0xff]  }
 0x6bc   : > { %8370 = vmatpush1.bf16.msra.mxu0 %v11632_v52  ;;  %v11703_v52 = vld [vmem:[%s14129_s0 + $0x604] ss:$16 sps:$4 sm:$0xff]  }
 0x6bd   : > { %8371 = vmatprep.subr.bf16.mxu0 %v11640_v61  ;;  %v11701_v61 = vld [vmem:[%s14129_s0 + $0x600] ss:$16 sps:$4 sm:$0xff]  }
 0x6be   : > { %8159 = vmatpush1.bf16.msra.mxu1 %v11605_v5  ;;  %v11706_v5 = vld [vmem:[%s14129_s0 + $0x7e4] ss:$16 sps:$4 sm:$0xff]  }
 0x6bf   : > { %8160 = vmatprep.subr.bf16.mxu1 %v11613_v40  ;;  %v11704_v40 = vld [vmem:[%s14129_s0 + $0x7e0] ss:$16 sps:$4 sm:$0xff]  }
 0x6c0   : > { %8372 = vmatpush2.bf16.msra.mxu0 %v11638_v58  ;;  %v11709_v58 = vld [vmem:[%s14129_s0 + $0x7c4] ss:$16 sps:$4 sm:$0xff]  }
 0x6c1   : > { %8373 = vmatprep.subr.bf16.mxu0 %v11646_v17  ;;  %v11707_v17 = vld [vmem:[%s14129_s0 + $0x7c0] ss:$16 sps:$4 sm:$0xff]  }
 0x6c2   : > { %8161 = vmatpush1.bf16.msra.mxu1 %v11611_v9  ;;  %v11712_v9 = vld [vmem:[%s14129_s0 + $0x7a4] ss:$16 sps:$4 sm:$0xff]  }
 0x6c3   : > { %8162 = vmatprep.subr.bf16.mxu1 %v11619_v18  ;;  %v11710_v18 = vld [vmem:[%s14129_s0 + $0x7a0] ss:$16 sps:$4 sm:$0xff]  }
 0x6c4   : > { %8374 = vmatpush2.bf16.msra.mxu0 %v11644_v16  ;;  %v11715_v16 = vld [vmem:[%s14129_s0 + $0x784] ss:$16 sps:$4 sm:$0xff]  }
 0x6c5   : > { %8375 = vmatprep.subr.bf16.mxu0 %v11652_v36  ;;  %v11713_v36 = vld [vmem:[%s14129_s0 + $0x780] ss:$16 sps:$4 sm:$0xff]  }
 0x6c6   : > { %8163 = vmatpush1.bf16.msra.mxu1 %v11617_v29 }
 0x6c7   : > { %8164 = vmatprep.subr.bf16.mxu1 %v11625_v3  ;;  %v11718_v3 = vld [vmem:[%s14129_s0 + $0x764] ss:$16 sps:$4 sm:$0xff]  }
 0x6c8   : > { %8376 = vmatpush2.bf16.msra.mxu0 %v11650_v8  ;;  %v11716_v8 = vld [vmem:[%s14129_s0 + $0x760] ss:$16 sps:$4 sm:$0xff]  }
 0x6c9   : > { %8377 = vmatprep.subr.bf16.mxu0 %v11658_v22 }
 0x6ca   : > { %8165 = vmatpush1.bf16.msra.mxu1 %v11623_v41  ;;  %v11721_v41 = vld [vmem:[%s14129_s0 + $0x744] ss:$16 sps:$4 sm:$0xff]  }
 0x6cb   : > { %8166 = vmatprep.subr.bf16.mxu1 %v11631_v11 }
 0x6cc   : > { %8378 = vmatpush2.bf16.msra.mxu0 %v11656_v56  ;;  %v11719_v56 = vld [vmem:[%s14129_s0 + $0x740] ss:$16 sps:$4 sm:$0xff]  }
 0x6cd   : > { %8379 = vmatprep.subr.bf16.mxu0 %v11664_v49 }
 0x6ce   : > { %8167 = vmatpush2.bf16.msra.mxu1 %v11629_v35  ;;  %v11724_v35 = vld [vmem:[%s14129_s0 + $0x724] ss:$16 sps:$4 sm:$0xff]  }
 0x6cf   : > { %8168 = vmatprep.subr.bf16.mxu1 %v11637_v47 }
 0x6d0   : > { %8380 = vmatpush2.bf16.msra.mxu0 %v11662_v39  ;;  %v11722_v39 = vld [vmem:[%s14129_s0 + $0x720] ss:$16 sps:$4 sm:$0xff]  }
 0x6d1   : > { %8381 = vmatprep.subr.bf16.mxu0 %v11670_v1 }
 0x6d2   : > { %8169 = vmatpush2.bf16.msra.mxu1 %v11635_v10  ;;  %v11727_v10 = vld [vmem:[%s14129_s0 + $0x704] ss:$16 sps:$4 sm:$0xff]  }
 0x6d3   : > { %8170 = vmatprep.subr.bf16.mxu1 %v11643_v44 }
 0x6d4   : > { %8382 = vmatpush2.bf16.msra.mxu0 %v11668_v33  ;;  %v11725_v33 = vld [vmem:[%s14129_s0 + $0x700] ss:$16 sps:$4 sm:$0xff]  }
 0x6d5   : > { %8383 = vmatprep.subr.bf16.mxu0 %v11676_v62 }
 0x6d6   : > { %8171 = vmatpush2.bf16.msra.mxu1 %v11641_v19  ;;  %v12060_v19 = vld [vmem:[%s12837_s18 + $0x30] sm:$0xff]  ;;  %s14157_s18 = sld [smem:[#allocation8_spill]] }
 0x6d7   : > { %8172 = vmatprep.subr.bf16.mxu1 %v11649_v53  ;;  %v6541_v53 = vmul.f32 %v12060_v19, %v13515_v43 }
 0x6d8   : > { %8384 = vmatpush2.bf16.msra.mxu0 %v11674_v26  ;;  %v11730_v26 = vld [vmem:[%s14129_s0 + $0x2ec] ss:$16 sps:$4 sm:$0xff]  }
 0x6d9   : > { %8385 = vmatprep.subr.bf16.mxu0 %v11682_v23  ;;  %v11728_v23 = vld [vmem:[%s14129_s0 + $0x2e8] ss:$16 sps:$4 sm:$0xff]  }
 0x6da   : > { %8173 = vmatpush2.bf16.msra.mxu1 %v11647_v34  ;;  %v13774_v34 = vpack.c.bf16 %v6541_v53, %v6541_v53  ;;  %v11859_v53 = vld [vmem:[%s14147_s1 + $0xc4] ss:$8 sps:$4 sm:$0xff]  }
 0x6db   : > { %8174 = vmatprep.subr.bf16.mxu1 %v11655_v7  ;;  %v11733_v7 = vld [vmem:[%s14129_s0 + $0x2cc] ss:$16 sps:$4 sm:$0xff]  }
 0x6dc   : > { %8386 = vmatpush2.bf16.msra.mxu0 %v11680_v46  ;;  %v11731_v46 = vld [vmem:[%s14129_s0 + $0x2c8] ss:$16 sps:$4 sm:$0xff]  }
 0x6de   : > { %8175 = vmatpush2.bf16.msra.mxu1 %v11653_v24  ;;  %v11734_v24 = vld [vmem:[%s14129_s0 + $0x2a8] ss:$16 sps:$4 sm:$0xff]  }
 0x6df   : > { %8388 = vmatmul.mubr.bf16.vlgmr.msra.gmra.mxu0 %v13611_v2  ;;  %8176 = vmatprep.subr.bf16.mxu1 %v11661_v55  ;;  %v6542_v2 = vmul.f32 %v12059_v6, %v13515_v43  ;;  %v13754_v29 = vpop.f32.mrf.mxu0  ;;  %v11736_v43 = vld [vmem:[%s14129_s0 + $0x2ac] ss:$16 sps:$4 sm:$0xff]  }
 0x6e0   : > { %v11739_v55 = vld [vmem:[%s14129_s0 + $0x28c] ss:$16 sps:$4 sm:$0xff]  }
 0x6e1   : > { %v13729_v0 = vpack.c.bf16 %v6542_v2, %v6542_v2  ;;  %v13758_v22 = vpop.f32.mrf.mxu0  ;;  %v11745_v6 = vld [vmem:[%s14129_s0 + $0x24c] ss:$16 sps:$4 sm:$0xff]  }
 0x6e2   : > { %8177 = vmatpush2.bf16.msra.mxu1 %v11659_v63  ;;  %v11824_v63 = vld [vmem:[%s14147_s1 + $0x70] ss:$8 sps:$4 sm:$0xff]   ;;  %v11835_v2 = vld [vmem:[%s14147_s1 + $0x44] ss:$8 sps:$4 sm:$0xff]  }
 0x6e3   : > { %8178 = vmatprep.subr.bf16.mxu1 %v11667_v13  ;;  %v8147_v11 = vpop.f32.mrf.mxu0  ;;  %v11826_v13 = vld [vmem:[%s14147_s1 + $0x74] ss:$8 sps:$4 sm:$0xff]  }
 0x6e4   : > { %8841 = vmatprep.subr.bf16.mxu0 %v11826_v13  ;;  %v11766_v11 = vld [vmem:[%s14129_s0 + $0x36c] ss:$16 sps:$4 sm:$0xff]  }
 0x6e5   : > { %v8148_v49 = vpop.f32.mrf.mxu0  ;;  %8842 = vmatpush1.bf16.msra.mxu0 %v11824_v63 }
 0x6e6   : > { %8179 = vmatpush2.bf16.msra.mxu1 %v11665_v28  ;;  %v11829_v28 = vld [vmem:[%s14147_s1 + $0x64] ss:$8 sps:$4 sm:$0xff]   ;;  %v13823_v49 = vld [vmem:[%s14148_s2] sm:$0xf]  ;;  %s14160_s2 = sld [smem:[#allocation10_spill]] }
 0x6e7   : > { %8180 = vmatprep.subr.bf16.mxu1 %v11673_v27  ;;  %v11737_v27 = vld [vmem:[%s14129_s0 + $0x288] ss:$16 sps:$4 sm:$0xff]   ;;  %8843 = vmatprep.subr.bf16.mxu0 %v11829_v28 }
 0x6e8   : > { %v11770_v28 = vld [vmem:[%s14129_s0 + $0x328] ss:$16 sps:$4 sm:$0xff]  }
 0x6ea   : > { %8181 = vmatpush2.bf16.msra.mxu1 %v11671_v20  ;;  %v11742_v20 = vld [vmem:[%s14129_s0 + $0x26c] ss:$16 sps:$4 sm:$0xff]  }
 0x6eb   : > { %8232 = vmatprep.subr.bf16.mxu1 %v11679_v38  ;;  %v11832_v38 = vld [vmem:[%s14147_s1 + $0x54] ss:$8 sps:$4 sm:$0xff]  }
 0x6ed   : > { %8183 = vmatmul.mubr.bf16.vlgmr.msra.gmra.mxu1 %v13726_v54 }
 0x6ee   : > { %8233 = vmatpush1.bf16.msra.mxu1 %v11677_v12  ;;  %8264 = vmatprep.mubr.bf16.mxu1 %v13729_v0  ;;  %v11743_v12 = vld [vmem:[%s14129_s0 + $0x248] ss:$16 sps:$4 sm:$0xff]  }
 0x6ef   : > { %8234 = vmatprep.subr.bf16.mxu1 %v11685_v50  ;;  %v11833_v50 = vld [vmem:[%s14147_s1 + $0x40] ss:$8 sps:$4 sm:$0xff]  }
 0x6f2   : > { %8235 = vmatpush1.bf16.msra.mxu1 %v11683_v21  ;;  %v11748_v21 = vld [vmem:[%s14129_s0 + $0x22c] ss:$16 sps:$4 sm:$0xff]  }
 0x6f3   : > { %8236 = vmatprep.subr.bf16.mxu1 %v11688_v57  ;;  %v11838_v57 = vld [vmem:[%s14147_s1 + $0x34] ss:$8 sps:$4 sm:$0xff]  }
 0x6f6   : > { %8237 = vmatpush1.bf16.msra.mxu1 %v11686_v31  ;;  %v11746_v31 = vld [vmem:[%s14129_s0 + $0x228] ss:$16 sps:$4 sm:$0xff]  }
 0x6f7   : > { %8238 = vmatprep.subr.bf16.mxu1 %v11691_v45  ;;  %v11836_v45 = vld [vmem:[%s14147_s1 + $0x30] ss:$8 sps:$4 sm:$0xff]  }
 0x6fa   : > { %8239 = vmatpush1.bf16.msra.mxu1 %v11689_v51  ;;  %v11751_v51 = vld [vmem:[%s14129_s0 + $0x20c] ss:$16 sps:$4 sm:$0xff]  }
 0x6fb   : > { %8240 = vmatprep.subr.bf16.mxu1 %v11694_v60  ;;  %v11841_v60 = vld [vmem:[%s14147_s1 + $0x24] ss:$8 sps:$4 sm:$0xff]  }
 0x6fe   : > { %8241 = vmatpush1.bf16.msra.mxu1 %v11692_v42  ;;  %v11749_v42 = vld [vmem:[%s14129_s0 + $0x208] ss:$16 sps:$4 sm:$0xff]  }
 0x6ff   : > { %8242 = vmatprep.subr.bf16.mxu1 %v11697_v14  ;;  %v11839_v14 = vld [vmem:[%s14147_s1 + $0x20] ss:$8 sps:$4 sm:$0xff]  }
 0x702   : > { %8243 = vmatpush1.bf16.msra.mxu1 %v11695_v37  ;;  %v11754_v37 = vld [vmem:[%s14129_s0 + $0x3ec] ss:$16 sps:$4 sm:$0xff]  }
 0x703   : > { %8244 = vmatprep.subr.bf16.mxu1 %v11700_v25  ;;  %v11844_v25 = vld [vmem:[%s14147_s1 + $0x14] ss:$8 sps:$4 sm:$0xff]  }
 0x706   : > { %8245 = vmatpush1.bf16.msra.mxu1 %v11698_v59  ;;  %v11752_v59 = vld [vmem:[%s14129_s0 + $0x3e8] ss:$16 sps:$4 sm:$0xff]  }
 0x707   : > { %8246 = vmatprep.subr.bf16.mxu1 %v11703_v52  ;;  %v11842_v52 = vld [vmem:[%s14147_s1 + $0x10] ss:$8 sps:$4 sm:$0xff]  }
 0x70a   : > { %8247 = vmatpush1.bf16.msra.mxu1 %v11701_v61  ;;  %v11757_v61 = vld [vmem:[%s14129_s0 + $0x3cc] ss:$16 sps:$4 sm:$0xff]  }
 0x70b   : > { %8248 = vmatprep.subr.bf16.mxu1 %v11706_v5  ;;  %v11847_v5 = vld [vmem:[%s14147_s1 + $0x4] ss:$8 sps:$4 sm:$0xff]  }
 0x70e   : > { %8249 = vmatpush2.bf16.msra.mxu1 %v11704_v40  ;;  %v11755_v40 = vld [vmem:[%s14129_s0 + $0x3c8] ss:$16 sps:$4 sm:$0xff]  }
 0x70f   : > { %8250 = vmatprep.subr.bf16.mxu1 %v11709_v58  ;;  %v11845_v58 = vld [vmem:[%s14147_s1] ss:$8 sps:$4 sm:$0xff]  }
 0x712   : > { %8251 = vmatpush2.bf16.msra.mxu1 %v11707_v17  ;;  %v11760_v17 = vld [vmem:[%s14129_s0 + $0x3ac] ss:$16 sps:$4 sm:$0xff]  }
 0x713   : > { %8252 = vmatprep.subr.bf16.mxu1 %v11712_v9  ;;  %v11850_v9 = vld [vmem:[%s14147_s1 + $0xf4] ss:$8 sps:$4 sm:$0xff]  }
 0x716   : > { %8253 = vmatpush2.bf16.msra.mxu1 %v11710_v18  ;;  %v11758_v18 = vld [vmem:[%s14129_s0 + $0x3a8] ss:$16 sps:$4 sm:$0xff]  }
 0x717   : > { %8254 = vmatprep.subr.bf16.mxu1 %v11715_v16  ;;  %v11848_v16 = vld [vmem:[%s14147_s1 + $0xf0] ss:$8 sps:$4 sm:$0xff]  }
 0x71a   : > { %8255 = vmatpush2.bf16.msra.mxu1 %v11713_v36  ;;  %v11763_v36 = vld [vmem:[%s14129_s0 + $0x38c] ss:$16 sps:$4 sm:$0xff]  }
 0x71b   : > { %8256 = vmatprep.subr.bf16.mxu1 %v11718_v3  ;;  %v11853_v3 = vld [vmem:[%s14147_s1 + $0xe4] ss:$8 sps:$4 sm:$0xff]  }
 0x71e   : > { %8257 = vmatpush2.bf16.msra.mxu1 %v11716_v8  ;;  %v11761_v8 = vld [vmem:[%s14129_s0 + $0x388] ss:$16 sps:$4 sm:$0xff]  }
 0x71f   : > { %8258 = vmatprep.subr.bf16.mxu1 %v11721_v41  ;;  %v13763_v47 = vpop.f32.mrf.mxu0  ;;  %v11851_v41 = vld [vmem:[%s14147_s1 + $0xe0] ss:$8 sps:$4 sm:$0xff]  }
 0x721   : > { %v13766_v1 = vpop.f32.mrf.mxu0 }
 0x722   : > { %8259 = vmatpush2.bf16.msra.mxu1 %v11719_v56  ;;  %v11856_v56 = vld [vmem:[%s14147_s1 + $0xd4] ss:$8 sps:$4 sm:$0xff]  }
 0x723   : > { %8260 = vmatprep.subr.bf16.mxu1 %v11724_v35  ;;  %v8229_v44 = vpop.f32.mrf.mxu0  ;;  %v14149_v35 = vld [vmem:[#allocation16_spill] sm:$0xff] }
 0x724   : > { %v11854_v44 = vld [vmem:[%s14147_s1 + $0xd0] ss:$8 sps:$4 sm:$0xff]  }
 0x725   : > { %v8230_v62 = vpop.f32.mrf.mxu0 }
 0x726   : > { %8261 = vmatpush2.bf16.msra.mxu1 %v11722_v39  ;;  %v6823_v39 = vsub.s32 3, %v14149_v35  ;;  %v14150_v62 = vsub.s32 2, %v14149_v35  ;;  %v11803_v35 = vld [vmem:[%s14129_s0 + $0x7c8] ss:$16 sps:$4 sm:$0xff]  }
 0x727   : > { %8262 = vmatprep.subr.bf16.mxu1 %v11727_v10  ;;  %v11764_v10 = vld [vmem:[%s14129_s0 + $0x368] ss:$16 sps:$4 sm:$0xff]  }
 0x728   : > { %v6820_v19 = vrot.slane %v13823_v49, %v14150_v62  ;;  %v11814_v62 = vld [vmem:[%s14129_s0 + $0x76c] ss:$16 sps:$4 sm:$0xff]  }
 0x72a   : > { %8263 = vmatpush2.bf16.msra.mxu1 %v11725_v33  ;;  %v11769_v33 = vld [vmem:[%s14129_s0 + $0x34c] ss:$16 sps:$4 sm:$0xff]  }
 0x72b   : > { %8314 = vmatprep.subr.bf16.mxu1 %v11730_v26  ;;  %v6824_v26 = vrot.slane %v13823_v49, %v6823_v39  ;;  %v11808_v39 = vld [vmem:[%s14129_s0 + $0x7ac] ss:$16 sps:$4 sm:$0xff]  }
 0x72d   : > { %8265 = vmatmul.mubr.bf16.vlgmr.msra.gmra.mxu1 %v13774_v34 }
 0x72e   : > { %8315 = vmatpush1.bf16.msra.mxu1 %v11728_v23  ;;  %8346 = vmatprep.mubr.bf16.mxu1 %v13663_v15  ;;  %v11827_v15 = vld [vmem:[%s14147_s1 + $0x60] ss:$8 sps:$4 sm:$0xff]  }
 0x72f   : > { %8316 = vmatprep.subr.bf16.mxu1 %v11733_v7  ;;  %8844 = vmatpush1.bf16.msra.mxu0 %v11827_v15  ;;  %v11767_v23 = vld [vmem:[%s14129_s0 + $0x348] ss:$16 sps:$4 sm:$0xff]  }
 0x730   : > { %8845 = vmatprep.subr.bf16.mxu0 %v11832_v38  ;;  %v11860_v15 = vld [vmem:[%s14147_s1 + $0xb0] ss:$8 sps:$4 sm:$0xff]   ;;  %v11865_v38 = vld [vmem:[%s14147_s1 + $0xa4] ss:$8 sps:$4 sm:$0xff]  }
 0x732   : > { %8317 = vmatpush1.bf16.msra.mxu1 %v11731_v46  ;;  %v11857_v46 = vld [vmem:[%s14147_s1 + $0xc0] ss:$8 sps:$4 sm:$0xff]  }
 0x733   : > { %8318 = vmatprep.subr.bf16.mxu1 %v11736_v43  ;;  %8846 = vmatpush1.bf16.msra.mxu0 %v11830_v30  ;;  %v11772_v43 = vld [vmem:[%s14129_s0 + $0x32c] ss:$16 sps:$4 sm:$0xff]   ;;  %v11773_v30 = vld [vmem:[%s14129_s0 + $0x308] ss:$16 sps:$4 sm:$0xff]  }
 0x734   : > { %8847 = vmatprep.subr.bf16.mxu0 %v11835_v2  ;;  %v11778_v2 = vld [vmem:[%s14129_s0 + $0x6ec] ss:$16 sps:$4 sm:$0xff]  }
 0x736   : > { %8319 = vmatpush1.bf16.msra.mxu1 %v11734_v24 }
 0x737   : > { %8320 = vmatprep.subr.bf16.mxu1 %v11739_v55  ;;  %8848 = vmatpush1.bf16.msra.mxu0 %v11833_v50  ;;  %v11862_v55 = vld [vmem:[%s14147_s1 + $0xb4] ss:$8 sps:$4 sm:$0xff]  }
 0x738   : > { %8849 = vmatprep.subr.bf16.mxu0 %v11838_v57  ;;  %v11781_v50 = vld [vmem:[%s14129_s0 + $0x6cc] ss:$16 sps:$4 sm:$0xff]   ;;  %v11779_v57 = vld [vmem:[%s14129_s0 + $0x6c8] ss:$16 sps:$4 sm:$0xff]  }
 0x73a   : > { %8321 = vmatpush1.bf16.msra.mxu1 %v11737_v27 }
 0x73b   : > { %8322 = vmatprep.subr.bf16.mxu1 %v11742_v20  ;;  %8850 = vmatpush1.bf16.msra.mxu0 %v11836_v45  ;;  %v11775_v20 = vld [vmem:[%s14129_s0 + $0x30c] ss:$16 sps:$4 sm:$0xff]  }
 0x73c   : > { %8851 = vmatprep.subr.bf16.mxu0 %v11841_v60 }
 0x73e   : > { %8323 = vmatpush1.bf16.msra.mxu1 %v11740_v32 }
 0x73f   : > { %8324 = vmatprep.subr.bf16.mxu1 %v11745_v6  ;;  %8852 = vmatpush1.bf16.msra.mxu0 %v11839_v14  ;;  %v11863_v6 = vld [vmem:[%s14147_s1 + $0xa0] ss:$8 sps:$4 sm:$0xff]  }
 0x740   : > { %8853 = vmatprep.subr.bf16.mxu0 %v11844_v25  ;;  %v11782_v14 = vld [vmem:[%s14129_s0 + $0x6a8] ss:$16 sps:$4 sm:$0xff]  }
 0x742   : > { %8325 = vmatpush1.bf16.msra.mxu1 %v11743_v12  ;;  %v11776_v12 = vld [vmem:[%s14129_s0 + $0x6e8] ss:$16 sps:$4 sm:$0xff]  }
 0x743   : > { %8326 = vmatprep.subr.bf16.mxu1 %v11748_v21  ;;  %8854 = vmatpush1.bf16.msra.mxu0 %v11842_v52  ;;  %v11868_v52 = vld [vmem:[%s14147_s1 + $0x94] ss:$8 sps:$4 sm:$0xff]  }
 0x744   : > { %8855 = vmatprep.subr.bf16.mxu0 %v11847_v5  ;;  %v11785_v5 = vld [vmem:[%s14129_s0 + $0x688] ss:$16 sps:$4 sm:$0xff]  }
 0x746   : > { %8327 = vmatpush1.bf16.msra.mxu1 %v11746_v31  ;;  %v13855_v31 = vld [vmem:[%s14151_s7] ss:$0 sm:$0xff]  ;;  %s14161_s7 = sld [smem:[#allocation14_spill]] }
 0x747   : > { %8328 = vmatprep.subr.bf16.mxu1 %v11751_v51  ;;  %8856 = vmatpush1.bf16.msra.mxu0 %v11845_v58  ;;  %v11784_v51 = vld [vmem:[%s14129_s0 + $0x6ac] ss:$16 sps:$4 sm:$0xff]   ;;  %v11869_v58 = vld [vmem:[%s14147_s1 + $0x80] ss:$8 sps:$4 sm:$0xff]  }
 0x748   : > { %8857 = vmatprep.subr.bf16.mxu0 %v11850_v9  ;;  %v11793_v9 = vld [vmem:[%s14129_s0 + $0x64c] ss:$16 sps:$4 sm:$0xff]  }
 0x74a   : > { %8329 = vmatpush1.bf16.msra.mxu1 %v11749_v42 }
 0x74b   : > { %8330 = vmatprep.subr.bf16.mxu1 %v11754_v37  ;;  %8858 = vmatpush2.bf16.msra.mxu0 %v11848_v16  ;;  %v11796_v16 = vld [vmem:[%s14129_s0 + $0x62c] ss:$16 sps:$4 sm:$0xff]  }
 0x74c   : > { %8859 = vmatprep.subr.bf16.mxu0 %v11853_v3  ;;  %v11799_v3 = vld [vmem:[%s14129_s0 + $0x60c] ss:$16 sps:$4 sm:$0xff]  }
 0x74e   : > { %8331 = vmatpush2.bf16.msra.mxu1 %v11752_v59  ;;  %v11866_v59 = vld [vmem:[%s14147_s1 + $0x90] ss:$8 sps:$4 sm:$0xff]  }
 0x74f   : > { %8332 = vmatprep.subr.bf16.mxu1 %v11757_v61  ;;  %8860 = vmatpush2.bf16.msra.mxu0 %v11851_v41  ;;  %v11871_v61 = vld [vmem:[%s14147_s1 + $0x84] ss:$8 sps:$4 sm:$0xff]  }
 0x750   : > { %8861 = vmatprep.subr.bf16.mxu0 %v11856_v56  ;;  %v11802_v41 = vld [vmem:[%s14129_s0 + $0x7ec] ss:$16 sps:$4 sm:$0xff]  }
 0x751   : > { %v11805_v56 = vld [vmem:[%s14129_s0 + $0x7cc] ss:$16 sps:$4 sm:$0xff]  }
 0x752   : > { %8333 = vmatpush2.bf16.msra.mxu1 %v11755_v40  ;;  %v11790_v40 = vld [vmem:[%s14129_s0 + $0x66c] ss:$16 sps:$4 sm:$0xff]  }
 0x753   : > { %8334 = vmatprep.subr.bf16.mxu1 %v11760_v17  ;;  %8862 = vmatpush2.bf16.msra.mxu0 %v11854_v44  ;;  %v11788_v17 = vld [vmem:[%s14129_s0 + $0x668] ss:$16 sps:$4 sm:$0xff]   ;;  %v11811_v44 = vld [vmem:[%s14129_s0 + $0x78c] ss:$16 sps:$4 sm:$0xff]  }
 0x754   : > { %8863 = vmatprep.subr.bf16.mxu0 %v11859_v53  ;;  %v11817_v53 = vld [vmem:[%s14129_s0 + $0x74c] ss:$16 sps:$4 sm:$0xff]  }
 0x756   : > { %8335 = vmatpush2.bf16.msra.mxu1 %v11758_v18  ;;  %v11791_v18 = vld [vmem:[%s14129_s0 + $0x648] ss:$16 sps:$4 sm:$0xff]  }
 0x757   : > { %8336 = vmatprep.subr.bf16.mxu1 %v11763_v36  ;;  %8864 = vmatpush2.bf16.msra.mxu0 %v11857_v46  ;;  %v11794_v36 = vld [vmem:[%s14129_s0 + $0x628] ss:$16 sps:$4 sm:$0xff]  }
 0x758   : > { %8865 = vmatprep.subr.bf16.mxu0 %v11862_v55 }
 0x75a   : > { %8337 = vmatpush2.bf16.msra.mxu1 %v11761_v8  ;;  %v11797_v8 = vld [vmem:[%s14129_s0 + $0x608] ss:$16 sps:$4 sm:$0xff]  }
 0x75b   : > { %8338 = vmatprep.subr.bf16.mxu1 %v11766_v11  ;;  %8866 = vmatpush2.bf16.msra.mxu0 %v11860_v15  ;;  %v11800_v11 = vld [vmem:[%s14129_s0 + $0x7e8] ss:$16 sps:$4 sm:$0xff]  }
 0x75c   : > { %8867 = vmatprep.subr.bf16.mxu0 %v11865_v38 }
 0x75e   : > { %8339 = vmatpush2.bf16.msra.mxu1 %v11764_v10  ;;  %v11806_v10 = vld [vmem:[%s14129_s0 + $0x7a8] ss:$16 sps:$4 sm:$0xff]  }
 0x75f   : > { %v8307_v7 = vpop.f32.mrf.mxu0  ;;  %8340 = vmatprep.subr.bf16.mxu1 %v11769_v33  ;;  %8868 = vmatpush2.bf16.msra.mxu0 %v11863_v6  ;;  %v11809_v33 = vld [vmem:[%s14129_s0 + $0x788] ss:$16 sps:$4 sm:$0xff]   ;;  %v11874_v6 = vld [vmem:[%s14147_s1 + $0x174] ss:$8 sps:$4 sm:$0xff]  }
 0x760   : > { %v13837_v24 = vadd.f32 %v8307_v7, %v6820_v19  ;;  %8869 = vmatprep.subr.bf16.mxu0 %v11868_v52  ;;  %v11812_v19 = vld [vmem:[%s14129_s0 + $0x768] ss:$16 sps:$4 sm:$0xff]   ;;  %v11820_v7 = vld [vmem:[%s14129_s0 + $0x72c] ss:$16 sps:$4 sm:$0xff]  }
 0x761   : > { %v8309_v63 = vpop.f32.mrf.mxu0  ;;  %v11898_v52 = vld [vmem:[%s14147_s1 + $0x1f4] ss:$8 sps:$4 sm:$0xff]  }
 0x762   : > { %v13840_v13 = vadd.f32 %v8309_v63, %v6824_v26  ;;  %8341 = vmatpush2.bf16.msra.mxu1 %v11767_v23  ;;  %v11815_v26 = vld [vmem:[%s14129_s0 + $0x748] ss:$16 sps:$4 sm:$0xff]   ;;  %v11823_v63 = vld [vmem:[%s14129_s0 + $0x70c] ss:$16 sps:$4 sm:$0xff]  }
 0x763   : > { %v8311_v27 = vpop.f32.mrf.mxu0  ;;  %8342 = vmatprep.subr.bf16.mxu1 %v11772_v43  ;;  %8870 = vmatpush2.bf16.msra.mxu0 %v11866_v59  ;;  %v11818_v43 = vld [vmem:[%s14129_s0 + $0x728] ss:$16 sps:$4 sm:$0xff]  }
 0x764   : > { %8871 = vmatprep.subr.bf16.mxu0 %v11871_v61  ;;  %v11821_v27 = vld [vmem:[%s14129_s0 + $0x708] ss:$16 sps:$4 sm:$0xff]  }
 0x765   : > { %v8312_v32 = vpop.f32.mrf.mxu0  ;;  %v11893_v59 = vld [vmem:[%s14147_s1 + $0x100] ss:$8 sps:$4 sm:$0xff]   ;;  %v11896_v61 = vld [vmem:[%s14147_s1 + $0x1f0] ss:$8 sps:$4 sm:$0xff]  }
 0x766   : > { %8343 = vmatpush2.bf16.msra.mxu1 %v11770_v28 }
 0x767   : > { %8344 = vmatprep.subr.bf16.mxu1 %v11775_v20  ;;  %8872 = vmatpush2.bf16.msra.mxu0 %v11869_v58  ;;  %v11904_v58 = vld [vmem:[%s14147_s1 + $0x1d4] ss:$8 sps:$4 sm:$0xff]  }
 0x76a   : > { %8345 = vmatpush2.bf16.msra.mxu1 %v11773_v30  ;;  %v11872_v30 = vld [vmem:[%s14147_s1 + $0x170] ss:$8 sps:$4 sm:$0xff]  }
 0x76b   : > { %8396 = vmatprep.subr.bf16.mxu1 %v11778_v2  ;;  %v11877_v2 = vld [vmem:[%s14147_s1 + $0x164] ss:$8 sps:$4 sm:$0xff]  }
 0x76d   : > { %8347 = vmatmul.mubr.bf16.vlgmr.msra.gmra.mxu1 %v13726_v54  ;;  %v10861_v21 = vpop.f32.mrf.mxu1 }
 0x76e   : > { %8397 = vmatpush1.bf16.msra.mxu1 %v11776_v12  ;;  %8428 = vmatprep.mubr.bf16.mxu1 %v13729_v0  ;;  %v11787_v0 = vld [vmem:[%s14129_s0 + $0x68c] ss:$16 sps:$4 sm:$0xff]   ;;  %v11875_v12 = vld [vmem:[%s14147_s1 + $0x160] ss:$8 sps:$4 sm:$0xff]  }
 0x76f   : > { %v10862_v45 = vpop.f32.mrf.mxu1  ;;  %8398 = vmatprep.subr.bf16.mxu1 %v11781_v50  ;;  %v11878_v50 = vld [vmem:[%s14147_s1 + $0x150] ss:$8 sps:$4 sm:$0xff]  }
 0x770   : > { %v10863_v60 = vadd.f32 %v10862_v45, %v10861_v21  ;;  %v11883_v21 = vld [vmem:[%s14147_s1 + $0x144] ss:$8 sps:$4 sm:$0xff]   ;;  %v11886_v45 = vld [vmem:[%s14147_s1 + $0x134] ss:$8 sps:$4 sm:$0xff]  }
 0x771   : > { %v10864_v42 = vpop.f32.mrf.mxu1 }
 0x772   : > { %v13859_v54 = vadd.f32 %v10863_v60, %v13855_v31  ;;  %8399 = vmatpush1.bf16.msra.mxu1 %v11779_v57  ;;  %v11881_v57 = vld [vmem:[%s14147_s1 + $0x140] ss:$8 sps:$4 sm:$0xff]   ;;  %v11889_v60 = vld [vmem:[%s14147_s1 + $0x124] ss:$8 sps:$4 sm:$0xff]  }
 0x773   : > { %v10865_v37 = vpop.f32.mrf.mxu1  ;;  %8400 = vmatprep.subr.bf16.mxu1 %v11784_v51  ;;  %v11884_v51 = vld [vmem:[%s14147_s1 + $0x130] ss:$8 sps:$4 sm:$0xff]  }
 0x774   : > { %v13863_v25 = vadd.f32 %v10865_v37, %v10864_v42  ;;  %v11887_v42 = vld [vmem:[%s14147_s1 + $0x120] ss:$8 sps:$4 sm:$0xff]   ;;  %v11890_v37 = vld [vmem:[%s14147_s1 + $0x110] ss:$8 sps:$4 sm:$0xff]  }
 0x776   : > { %8401 = vmatpush1.bf16.msra.mxu1 %v11782_v14  ;;  %v11892_v14 = vld [vmem:[%s14147_s1 + $0x114] ss:$8 sps:$4 sm:$0xff]  }
 0x777   : > { %8402 = vmatprep.subr.bf16.mxu1 %v11787_v0  ;;  %v11895_v0 = vld [vmem:[%s14147_s1 + $0x104] ss:$8 sps:$4 sm:$0xff]  }
 0x77a   : > { %8403 = vmatpush1.bf16.msra.mxu1 %v11785_v5  ;;  %v11901_v5 = vld [vmem:[%s14147_s1 + $0x1e4] ss:$8 sps:$4 sm:$0xff]  }
 0x77b   : > { %8404 = vmatprep.subr.bf16.mxu1 %v11790_v40  ;;  %v11899_v40 = vld [vmem:[%s14147_s1 + $0x1e0] ss:$8 sps:$4 sm:$0xff]  }
 0x77e   : > { %8405 = vmatpush1.bf16.msra.mxu1 %v11788_v17  ;;  %v11902_v17 = vld [vmem:[%s14147_s1 + $0x1d0] ss:$8 sps:$4 sm:$0xff]  }
 0x77f   : > { %8406 = vmatprep.subr.bf16.mxu1 %v11793_v9  ;;  %v11907_v9 = vld [vmem:[%s14147_s1 + $0x1c4] ss:$8 sps:$4 sm:$0xff]  }
 0x782   : > { %8407 = vmatpush1.bf16.msra.mxu1 %v11791_v18  ;;  %v11905_v18 = vld [vmem:[%s14147_s1 + $0x1c0] ss:$8 sps:$4 sm:$0xff]  }
 0x783   : > { %8408 = vmatprep.subr.bf16.mxu1 %v11796_v16  ;;  %v11910_v16 = vld [vmem:[%s14147_s1 + $0x1b4] ss:$8 sps:$4 sm:$0xff]  }
 0x786   : > { %8409 = vmatpush1.bf16.msra.mxu1 %v11794_v36  ;;  %v6812_v36 = vrot.slane %v13823_v49, %v14146_v48 }
 0x787   : > { %8410 = vmatprep.subr.bf16.mxu1 %v11799_v3  ;;  %v11908_v3 = vld [vmem:[%s14147_s1 + $0x1b0] ss:$8 sps:$4 sm:$0xff]  }
 0x78a   : > { %8411 = vmatpush1.bf16.msra.mxu1 %v11797_v8  ;;  %v11913_v8 = vld [vmem:[%s14147_s1 + $0x1a4] ss:$8 sps:$4 sm:$0xff]  }
 0x78b   : > { %8412 = vmatprep.subr.bf16.mxu1 %v11802_v41  ;;  %v8144_v41 = vadd.f32 %v13754_v29, %v6812_v36  ;;  %v14154_v36 = vmov 0  }
 0x78e   : > { %8413 = vmatpush2.bf16.msra.mxu1 %v11800_v11  ;;  %v6816_v11 = vrot.slane %v13823_v49, %v14145_v4 }
 0x78f   : > { %8414 = vmatprep.subr.bf16.mxu1 %v11805_v56  ;;  %v11911_v56 = vld [vmem:[%s14147_s1 + $0x1a0] ss:$8 sps:$4 sm:$0xff]  }
 0x792   : > { %8415 = vmatpush2.bf16.msra.mxu1 %v11803_v35  ;;  %v8146_v35 = vadd.f32 %v13758_v22, %v6816_v11  ;;  %v11914_v22 = vld [vmem:[%s14147_s1 + $0x190] ss:$8 sps:$4 sm:$0xff]   ;;  %v11929_v11 = vld [vmem:[%s14152_s10 + $0x40] ss:$8 sps:$4 sm:$0xff]  }
 0x793   : > { %8416 = vmatprep.subr.bf16.mxu1 %v11808_v39 }
 0x796   : > { %8417 = vmatpush2.bf16.msra.mxu1 %v11806_v10 }
 0x797   : > { %8418 = vmatprep.subr.bf16.mxu1 %v11811_v44 }
 0x79a   : > { %8419 = vmatpush2.bf16.msra.mxu1 %v11809_v33 }
 0x79b   : > { %8420 = vmatprep.subr.bf16.mxu1 %v11814_v62 }
 0x79e   : > { %8421 = vmatpush2.bf16.msra.mxu1 %v11812_v19 }
 0x79f   : > { %v13890_v23 = vpop.f32.mrf.mxu0  ;;  %8422 = vmatprep.subr.bf16.mxu1 %v11817_v53 }
 0x7a1   : > { %v13893_v46 = vpop.f32.mrf.mxu0 }
 0x7a2   : > { %8423 = vmatpush2.bf16.msra.mxu1 %v11815_v26 }
 0x7a3   : > { %v8393_v55 = vpop.f32.mrf.mxu0  ;;  %8424 = vmatprep.subr.bf16.mxu1 %v11820_v7 }
 0x7a5   : > { %v8394_v28 = vpop.f32.mrf.mxu0 }
 0x7a6   : > { %8425 = vmatpush2.bf16.msra.mxu1 %v11818_v43  ;;  %v11916_v43 = vld [vmem:[%s14147_s1 + $0x194] ss:$8 sps:$4 sm:$0xff]   ;;  %v11919_v28 = vld [vmem:[%s14147_s1 + $0x184] ss:$8 sps:$4 sm:$0xff]  }
 0x7a7   : > { %8426 = vmatprep.subr.bf16.mxu1 %v11823_v63 }
 0x7aa   : > { %8427 = vmatpush2.bf16.msra.mxu1 %v11821_v27  ;;  %v11917_v27 = vld [vmem:[%s14147_s1 + $0x180] ss:$8 sps:$4 sm:$0xff]  }
 0x7ab   : > { %8882 = vmatprep.subr.bf16.mxu1 %v11874_v6  ;;  %v11945_v6 = vld [vmem:[%s14153_s11 + $0x38] sm:$0xff]  }
 0x7ad   : > { %8429 = vmatmul.mubr.bf16.vlgmr.msra.gmra.mxu1 %v13774_v34  ;;  %v13899_v15 = vpop.f32.mrf.mxu1  ;;  %v11880_v34 = vld [vmem:[%s14147_s1 + $0x154] ss:$8 sps:$4 sm:$0xff]  }
 0x7ae   : > { %8883 = vmatpush1.bf16.msra.mxu1 %v11872_v30  ;;  %v8185_v39 = vadd.f32 %v13899_v15, %v8144_v41  ;;  %v11944_v30 = vld [vmem:[%s14153_s11 + $0x78] sm:$0xff]   ;;  %v11931_v41 = vld [vmem:[%s14152_s10 + $0x44] ss:$8 sps:$4 sm:$0xff]  }
 0x7af   : > { %v13901_v20 = vpop.f32.mrf.mxu1  ;;  %8884 = vmatprep.subr.bf16.mxu1 %v11877_v2  ;;  %v11946_v2 = vld [vmem:[%s14153_s11 + $0x70] sm:$0xff]   ;;  %10867 = vmatprep.subr.bf16.mxu0 %v11944_v30 }
 0x7b0   : > { %v8187_v10 = vadd.f32 %v13901_v20, %v8146_v35  ;;  %v8226_v44 = vadd.f32 %v13763_v47, %v8185_v39  ;;  %v11932_v35 = vld [vmem:[%s14152_s10 + $0x30] ss:$8 sps:$4 sm:$0xff]   ;;  %v11937_v39 = vld [vmem:[%s14152_s10 + $0x24] ss:$8 sps:$4 sm:$0xff]   ;;  %v11998_v30 = vld [vmem:[%s14156_s16 + $0x34] ss:$8 sps:$4 sm:$0xff]  }
 0x7b1   : > { %v8188_v38 = vpop.f32.mrf.mxu1 }
 0x7b2   : > { %8885 = vmatpush1.bf16.msra.mxu1 %v11875_v12  ;;  %v8228_v49 = vadd.f32 %v13766_v1, %v8187_v10  ;;  %v11922_v1 = vld [vmem:[%s14152_s10 + $0x74] ss:$8 sps:$4 sm:$0xff]   ;;  %v11935_v10 = vld [vmem:[%s14152_s10 + $0x20] ss:$8 sps:$4 sm:$0xff]  }
 0x7b3   : > { %v8189_v32 = vpop.f32.mrf.mxu1  ;;  %8886 = vmatprep.subr.bf16.mxu1 %v11880_v34  ;;  %v11947_v12 = vld [vmem:[%s14153_s11 + $0x30] sm:$0xff]   ;;  %v11948_v34 = vld [vmem:[%s14153_s11 + $0x68] sm:$0xff]  }
 0x7b6   : > { %8887 = vmatpush1.bf16.msra.mxu1 %v11878_v50  ;;  %v11949_v50 = vld [vmem:[%s14153_s11 + $0x28] sm:$0xff]  }
 0x7b7   : > { %8888 = vmatprep.subr.bf16.mxu1 %v11883_v21  ;;  %v11950_v21 = vld [vmem:[%s14153_s11 + $0x60] sm:$0xff]  }
 0x7ba   : > { %8889 = vmatpush1.bf16.msra.mxu1 %v11881_v57  ;;  %v11951_v57 = vld [vmem:[%s14153_s11 + $0x20] sm:$0xff]  }
 0x7bb   : > { %8890 = vmatprep.subr.bf16.mxu1 %v11886_v45  ;;  %v11952_v45 = vld [vmem:[%s14153_s11 + $0x58] sm:$0xff]  }
 0x7be   : > { %8891 = vmatpush1.bf16.msra.mxu1 %v11884_v51  ;;  %v11953_v51 = vld [vmem:[%s14153_s11 + $0x18] sm:$0xff]  }
 0x7bf   : > { %8892 = vmatprep.subr.bf16.mxu1 %v11889_v60  ;;  %v11954_v60 = vld [vmem:[%s14153_s11 + $0x50] sm:$0xff]  }
 0x7c2   : > { %8893 = vmatpush1.bf16.msra.mxu1 %v11887_v42  ;;  %v11955_v42 = vld [vmem:[%s14153_s11 + $0x10] sm:$0xff]  }
 0x7c3   : > { %8894 = vmatprep.subr.bf16.mxu1 %v11892_v14 }
 0x7c6   : > { %8895 = vmatpush1.bf16.msra.mxu1 %v11890_v37 }
 0x7c7   : > { %8896 = vmatprep.subr.bf16.mxu1 %v11895_v0 }
 0x7ca   : > { %8897 = vmatpush1.bf16.msra.mxu1 %v11893_v59 }
 0x7cb   : > { %8898 = vmatprep.subr.bf16.mxu1 %v11898_v52 }
 0x7ce   : > { %8899 = vmatpush2.bf16.msra.mxu1 %v11896_v61 }
 0x7cf   : > { %8900 = vmatprep.subr.bf16.mxu1 %v11901_v5 }
 0x7d2   : > { %8901 = vmatpush2.bf16.msra.mxu1 %v11899_v40 }
 0x7d3   : > { %8902 = vmatprep.subr.bf16.mxu1 %v11904_v58 }
 0x7d6   : > { %8903 = vmatpush2.bf16.msra.mxu1 %v11902_v17 }
 0x7d7   : > { %8904 = vmatprep.subr.bf16.mxu1 %v11907_v9 }
 0x7da   : > { %8905 = vmatpush2.bf16.msra.mxu1 %v11905_v18 }
 0x7db   : > { %8906 = vmatprep.subr.bf16.mxu1 %v11910_v16 }
 0x7de   : > { %8907 = vmatpush2.bf16.msra.mxu1 %v11908_v3  ;;  %v11928_v3 = vld [vmem:[%s14152_s10 + $0x54] ss:$8 sps:$4 sm:$0xff]  }
 0x7df   : > { %8908 = vmatprep.subr.bf16.mxu1 %v11913_v8  ;;  %v11926_v8 = vld [vmem:[%s14152_s10 + $0x50] ss:$8 sps:$4 sm:$0xff]  }
 0x7e2   : > { %8909 = vmatpush2.bf16.msra.mxu1 %v11911_v56  ;;  %v11934_v56 = vld [vmem:[%s14152_s10 + $0x34] ss:$8 sps:$4 sm:$0xff]  }
 0x7e3   : > { %8910 = vmatprep.subr.bf16.mxu1 %v11916_v43 }
 0x7e6   : > { %8911 = vmatpush2.bf16.msra.mxu1 %v11914_v22  ;;  %v11956_v22 = vld [vmem:[%s14153_s11 + $0x48] sm:$0xff]  }
 0x7e7   : > { %8912 = vmatprep.subr.bf16.mxu1 %v11919_v28  ;;  %v11984_v28 = vld [vmem:[%s14156_s16 + $0x70] ss:$8 sps:$4 sm:$0xff]  }
 0x7ea   : > { %8913 = vmatpush2.bf16.msra.mxu1 %v11917_v27  ;;  %v11989_v27 = vld [vmem:[%s14156_s16 + $0x64] ss:$8 sps:$4 sm:$0xff]  }
 0x7eb   : > { %9216 = vmatprep.subr.bf16.mxu1 %v11922_v1  ;;  %v11987_v1 = vld [vmem:[%s14156_s16 + $0x60] ss:$8 sps:$4 sm:$0xff]  }
 0x7ed   : > { %v8266_v33 = vpop.f32.mrf.mxu1 }
 0x7ee   : > { %v8267_v29 = vadd.f32 %v8266_v33, %v8226_v44  ;;  %v11940_v44 = vld [vmem:[%s14152_s10 + $0x14] ss:$8 sps:$4 sm:$0xff]   ;;  %v11938_v33 = vld [vmem:[%s14152_s10 + $0x10] ss:$8 sps:$4 sm:$0xff]  }
 0x7ef   : > { %v8268_v62 = vpop.f32.mrf.mxu1 }
 0x7f0   : > { %v8269_v19 = vadd.f32 %v8268_v62, %v8228_v49  ;;  %v8437_v53 = vmax.f32 %v8267_v29, 0.0  ;;  %v11943_v29 = vld [vmem:[%s14152_s10 + $0x4] ss:$8 sps:$4 sm:$0xff]   ;;  %v11941_v49 = vld [vmem:[%s14152_s10] ss:$8 sps:$4 sm:$0xff]   ;;  %v6505_v62 = vadd.f32 %v13863_v25, %v13855_v31 }
 0x7f1   : > { %v8270_v26 = vpop.f32.mrf.mxu1  ;;  %v11958_v31 = vld [vmem:[%s14153_s11 + $0x40] sm:$0xff]  }
 0x7f2   : > { %v8438_v7 = vmax.f32 %v8269_v19, 0.0  ;;  %v8441_v47 = vpack.c.bf16 %v8437_v53, %v8437_v53  ;;  %v9119_v19 = vpack.c.bf16 %v6505_v62, %v6505_v62  ;;  %v11959_v25 = vld [vmem:[%s14153_s11] sm:$0xff]  }
 0x7f3   : > { %v8271_v55 = vpop.f32.mrf.mxu1  ;;  %v12007_v62 = vld [vmem:[%s14156_s16 + $0x4] ss:$8 sps:$4 sm:$0xff]  }
 0x7f4   : > { %v8442_v63 = vpack.c.bf16 %v8438_v7, %v8438_v7  ;;  %v11957_v55 = vld [vmem:[%s14153_s11 + $0x8] sm:$0xff]  }
 0x7f6   : > { %8873 = vmatprep.mubr.bf16.mxu0 %v8442_v63  ;;  %v11962_v63 = vld [vmem:[%s14155_s15 + $0x74] ss:$8 sps:$4 sm:$0xff]  }
 0x7f7   : > { %8874 = vmatmul.mubr.bf16.vlgmr.msra.gmra.mxu0 %v8441_v47  ;;  %v11986_v47 = vld [vmem:[%s14156_s16 + $0x74] ss:$8 sps:$4 sm:$0xff]  }
 0x7f8   : > { %10868 = vmatpush3.bf16.msra.mxu0 %v11945_v6  ;;  %v11996_v6 = vld [vmem:[%s14156_s16 + $0x30] ss:$8 sps:$4 sm:$0xff]  }
 0x7f9   : > { %10869 = vmatprep.subr.bf16.mxu0 %v11946_v2  ;;  %v12001_v2 = vld [vmem:[%s14156_s16 + $0x24] ss:$8 sps:$4 sm:$0xff]  }
 0x7fc   : > { %10870 = vmatpush3.bf16.msra.mxu0 %v11947_v12  ;;  %v11999_v12 = vld [vmem:[%s14156_s16 + $0x20] ss:$8 sps:$4 sm:$0xff]  }
 0x7fd   : > { %10871 = vmatprep.subr.bf16.mxu0 %v11948_v34  ;;  %v8509_v34 = vld [vmem:[%s14157_s18] sm:$0x3]  ;;  %s10006_s18 = sshll.u32 %s14165_s23, 3 }
 0x800   : > { %10872 = vmatpush3.bf16.msra.mxu0 %v11949_v50  ;;  %v8514_v50 = vrot.slane %v8509_v34, %v14146_v48 }
 0x801   : > { %10873 = vmatprep.subr.bf16.mxu0 %v11950_v21  ;;  %v8518_v21 = vrot.slane %v8509_v34, %v14145_v4  ;;  %v12018_v34 = vld [vmem:[%s14158_s28 + $0x50] sm:$0xff]  }
 0x804   : > { %10874 = vmatpush3.bf16.msra.mxu0 %v11951_v57 }
 0x805   : > { %10875 = vmatprep.subr.bf16.mxu0 %v11952_v45 }
 0x808   : > { %10876 = vmatpush3.bf16.msra.mxu0 %v11953_v51 }
 0x809   : > { %10877 = vmatprep.subr.bf16.mxu0 %v11954_v60 }
 0x80c   : > { %10878 = vmatpush3.bf16.msra.mxu0 %v11955_v42 }
 0x80d   : > { %10879 = vmatprep.subr.bf16.mxu0 %v11956_v22  ;;  %v12012_v22 = vld [vmem:[%s14158_s28 + $0x68] sm:$0xff]  }
 0x810   : > { %10880 = vmatpush3.bf16.msra.mxu0 %v11957_v55  ;;  %v12014_v55 = vld [vmem:[%s14158_s28 + $0x60] sm:$0xff]  }
 0x811   : > { %10881 = vmatprep.subr.bf16.mxu0 %v11958_v31  ;;  %v12015_v31 = vld [vmem:[%s14158_s28 + $0x20] sm:$0xff]  }
 0x814   : > { %10882 = vmatpush3.bf16.msra.mxu0 %v11959_v25  ;;  %v12016_v25 = vld [vmem:[%s14158_s28 + $0x58] sm:$0xff]  }
 0x815   : > { %9337 = vmatprep.subr.bf16.mxu0 %v11962_v63  ;;  %v12017_v63 = vld [vmem:[%s14158_s28 + $0x18] sm:$0xff]  }
 0x82d   : > { %v8348_v15 = vpop.f32.mrf.mxu1 }
 0x82e   : > { %v8349_v14 = vadd.f32 %v8348_v15, %v13837_v24  ;;  %v11920_v24 = vld [vmem:[%s14152_s10 + $0x70] ss:$8 sps:$4 sm:$0xff]   ;;  %v11992_v15 = vld [vmem:[%s14156_s16 + $0x54] ss:$8 sps:$4 sm:$0xff]  }
 0x82f   : > { %v8350_v20 = vpop.f32.mrf.mxu1 }
 0x830   : > { %v8351_v37 = vadd.f32 %v8350_v20, %v13840_v13  ;;  %v8390_v0 = vadd.f32 %v13890_v23, %v8349_v14  ;;  %v11925_v23 = vld [vmem:[%s14152_s10 + $0x64] ss:$8 sps:$4 sm:$0xff]   ;;  %v11990_v20 = vld [vmem:[%s14156_s16 + $0x50] ss:$8 sps:$4 sm:$0xff]  }
 0x831   : > { %v8352_v38 = vpop.f32.mrf.mxu1 }
 0x832   : > { %v8392_v61 = vadd.f32 %v13893_v46, %v8351_v37  ;;  %v11923_v46 = vld [vmem:[%s14152_s10 + $0x60] ss:$8 sps:$4 sm:$0xff]   ;;  %v11995_v38 = vld [vmem:[%s14156_s16 + $0x44] ss:$8 sps:$4 sm:$0xff]  }
 0x833   : > { %v8353_v32 = vpop.f32.mrf.mxu1 }
 0x834   : > { %v11993_v32 = vld [vmem:[%s14156_s16 + $0x40] ss:$8 sps:$4 sm:$0xff]  }
 0x86d   : > { %v8430_v59 = vpop.f32.mrf.mxu1 }
 0x86e   : > { %v8431_v52 = vadd.f32 %v8430_v59, %v8390_v0 }
 0x86f   : > { %v8432_v5 = vpop.f32.mrf.mxu1 }
 0x870   : > { %v8433_v40 = vadd.f32 %v8432_v5, %v8392_v61  ;;  %v8439_v58 = vmax.f32 %v8431_v52, 0.0  ;;  %v11960_v5 = vld [vmem:[%s14155_s15 + $0x70] ss:$8 sps:$4 sm:$0xff]  }
 0x871   : > { %v8434_v17 = vpop.f32.mrf.mxu1 }
 0x872   : > { %v8440_v9 = vmax.f32 %v8433_v40, 0.0  ;;  %v8443_v13 = vpack.c.bf16 %v8439_v58, %v8439_v58  ;;  %v11965_v58 = vld [vmem:[%s14155_s15 + $0x64] ss:$8 sps:$4 sm:$0xff]   ;;  %v11963_v17 = vld [vmem:[%s14155_s15 + $0x60] ss:$8 sps:$4 sm:$0xff]  }
 0x873   : > { %v8435_v18 = vpop.f32.mrf.mxu1 }
 0x874   : > { %v8444_v16 = vpack.c.bf16 %v8440_v9, %v8440_v9  ;;  %v11968_v9 = vld [vmem:[%s14155_s15 + $0x54] ss:$8 sps:$4 sm:$0xff]   ;;  %v11966_v18 = vld [vmem:[%s14155_s15 + $0x50] ss:$8 sps:$4 sm:$0xff]  }
 0x876   : > { %8914 = vmatprep.mubr.bf16.mxu1 %v8444_v16  ;;  %v11971_v16 = vld [vmem:[%s14155_s15 + $0x44] ss:$8 sps:$4 sm:$0xff]  }
 0x877   : > { %8915 = vmatmul.mubr.bf16.vlgmr.msra.gmra.mxu1 %v8443_v13  ;;  %v11974_v13 = vld [vmem:[%s14155_s15 + $0x34] ss:$8 sps:$4 sm:$0xff]  }
 0x878   : > { %9217 = vmatpush1.bf16.msra.mxu1 %v11920_v24  ;;  %9248 = vmatprep.mubr.bf16.mxu1 %v14154_v36  ;;  %v11969_v24 = vld [vmem:[%s14155_s15 + $0x40] ss:$8 sps:$4 sm:$0xff]  }
 0x879   : > { %9218 = vmatprep.subr.bf16.mxu1 %v11925_v23  ;;  %v11972_v23 = vld [vmem:[%s14155_s15 + $0x30] ss:$8 sps:$4 sm:$0xff]  }
 0x87c   : > { %9219 = vmatpush1.bf16.msra.mxu1 %v11923_v46  ;;  %v11977_v46 = vld [vmem:[%s14155_s15 + $0x24] ss:$8 sps:$4 sm:$0xff]  }
 0x87d   : > { %9220 = vmatprep.subr.bf16.mxu1 %v11928_v3  ;;  %v11980_v3 = vld [vmem:[%s14155_s15 + $0x14] ss:$8 sps:$4 sm:$0xff]  }
 0x880   : > { %9221 = vmatpush1.bf16.msra.mxu1 %v11926_v8  ;;  %v11978_v8 = vld [vmem:[%s14155_s15 + $0x10] ss:$8 sps:$4 sm:$0xff]  }
 0x881   : > { %9222 = vmatprep.subr.bf16.mxu1 %v11931_v41 }
 0x884   : > { %9223 = vmatpush1.bf16.msra.mxu1 %v11929_v11  ;;  %v11983_v11 = vld [vmem:[%s14155_s15 + $0x4] ss:$8 sps:$4 sm:$0xff]  }
 0x885   : > { %9224 = vmatprep.subr.bf16.mxu1 %v11934_v56 }
 0x888   : > { %9225 = vmatpush1.bf16.msra.mxu1 %v11932_v35  ;;  %v11981_v35 = vld [vmem:[%s14155_s15] ss:$8 sps:$4 sm:$0xff]  }
 0x889   : > { %9226 = vmatprep.subr.bf16.mxu1 %v11937_v39 }
 0x88c   : > { %9227 = vmatpush1.bf16.msra.mxu1 %v11935_v10 }
 0x88d   : > { %9228 = vmatprep.subr.bf16.mxu1 %v11940_v44  ;;  %v9102_v44 = vpack.c.bf16 %v13859_v54, %v13859_v54  ;;  %v12010_v54 = vld [vmem:[%s14158_s28 + $0x70] sm:$0xff]  }
 0x890   : > { %9229 = vmatpush1.bf16.msra.mxu1 %v11938_v33  ;;  %v12002_v33 = vld [vmem:[%s14156_s16 + $0x10] ss:$8 sps:$4 sm:$0xff]  }
 0x891   : > { %9230 = vmatprep.subr.bf16.mxu1 %v11943_v29  ;;  %v12004_v29 = vld [vmem:[%s14156_s16 + $0x14] ss:$8 sps:$4 sm:$0xff]  }
 0x894   : > { %9231 = vmatpush1.bf16.msra.mxu1 %v11941_v49  ;;  %v12005_v49 = vld [vmem:[%s14156_s16] ss:$8 sps:$4 sm:$0xff]  }
 0x895   : > { %9475 = vmatprep.subr.bf16.mxu1 %v11986_v47  ;;  %v10545_v47 = vld [vmem:[%s14160_s2] ss:$0 sm:$0xff]  ;;  %s1106_s2 = scalar_lea.vmem %s12266_s20, %s10006_s18 }
 0x897   : > { %9249 = vmatmul.mubr.bf16.vlgmr.msra.gmra.mxu1 %v9119_v19  ;;  %v14159_v19 = vmov 0.0  }
 0x898   : > { %9507 = vmatprep.mubr.bf16.mxu1 %v14154_v36  ;;  %9476 = vmatpush1.bf16.msra.mxu1 %v11984_v28 }
 0x899   : > { %9477 = vmatprep.subr.bf16.mxu1 %v11989_v27 }
 0x89c   : > { %9478 = vmatpush1.bf16.msra.mxu1 %v11987_v1 }
 0x89d   : > { %9479 = vmatprep.subr.bf16.mxu1 %v11992_v15 }
 0x8a0   : > { %9480 = vmatpush1.bf16.msra.mxu1 %v11990_v20 }
 0x8a1   : > { %9481 = vmatprep.subr.bf16.mxu1 %v11995_v38 }
 0x8a4   : > { %9482 = vmatpush1.bf16.msra.mxu1 %v11993_v32 }
 0x8a5   : > { %9483 = vmatprep.subr.bf16.mxu1 %v11998_v30 }
 0x8a8   : > { %9484 = vmatpush1.bf16.msra.mxu1 %v11996_v6 }
 0x8a9   : > { %9485 = vmatprep.subr.bf16.mxu1 %v12001_v2 }
 0x8ac   : > { %9486 = vmatpush1.bf16.msra.mxu1 %v11999_v12 }
 0x8ad   : > { %9487 = vmatprep.subr.bf16.mxu1 %v12004_v29 }
 0x8b0   : > { %9488 = vmatpush1.bf16.msra.mxu1 %v12002_v33 }
 0x8b1   : > { %9489 = vmatprep.subr.bf16.mxu1 %v12007_v62  ;;  %v10627_v62 = vld [vmem:[%s12261_s12] ss:$0 sm:$0xff] }
 0x8b4   : > { %9490 = vmatpush1.bf16.msra.mxu1 %v12005_v49 }
 0x8b5   : > { %11160 = vmatprep.subr.bf16.mxu1 %v14159_v19 }
 0x8b7   : > { %v8875_v53 = vpop.f32.mrf.mxu0 }
 0x8b8   : > { %v8876_v57 = vadd.f32 %v8875_v53, %v8514_v50  ;;  %v12008_v53 = vld [vmem:[%s14158_s28 + $0x78] sm:$0xff]   ;;  %v12019_v50 = vld [vmem:[%s14158_s28 + $0x10] sm:$0xff]  }
 0x8b9   : > { %v8877_v26 = vpop.f32.mrf.mxu0 }
 0x8ba   : > { %v8878_v51 = vadd.f32 %v8877_v26, %v8518_v21  ;;  %v12009_v26 = vld [vmem:[%s14158_s28 + $0x38] sm:$0xff]   ;;  %v12020_v21 = vld [vmem:[%s14158_s28 + $0x48] sm:$0xff]  }
 0x8bb   : > { %v8879_v7 = vpop.f32.mrf.mxu0 }
 0x8bc   : > { %v12011_v7 = vld [vmem:[%s14158_s28 + $0x30] sm:$0xff]  }
 0x8bd   : > { %v8880_v43 = vpop.f32.mrf.mxu0 }
 0x8be   : > { %v12013_v43 = vld [vmem:[%s14158_s28 + $0x28] sm:$0xff]  }
 0x937   : > { %v8916_v45 = vpop.f32.mrf.mxu1 }
 0x938   : > { %v8917_v60 = vadd.f32 %v8916_v45, %v8876_v57  ;;  %v12021_v57 = vld [vmem:[%s14158_s28 + $0x8] sm:$0xff]   ;;  %v12022_v45 = vld [vmem:[%s14158_s28 + $0x40] sm:$0xff]  }
 0x939   : > { %v8918_v42 = vpop.f32.mrf.mxu1 }
 0x93a   : > { %v8919_v14 = vadd.f32 %v8918_v42, %v8878_v51  ;;  %v8923_v37 = vmax.f32 %v8917_v60, 0.0  ;;  %v12024_v51 = vld [vmem:[%s12256_s4 + $0x38] sm:$0xff]   ;;  %v12023_v60 = vld [vmem:[%s14158_s28] sm:$0xff]   ;;  %v12025_v42 = vld [vmem:[%s12256_s4 + $0x30] sm:$0xff]  }
 0x93b   : > { %v8920_v0 = vpop.f32.mrf.mxu1 }
 0x93c   : > { %v8924_v59 = vmax.f32 %v8919_v14, 0.0  ;;  %v8925_v40 = vpack.c.bf16 %v8923_v37, %v8923_v37  ;;  %v12026_v14 = vld [vmem:[%s12256_s4 + $0x28] sm:$0xff]   ;;  %v12027_v37 = vld [vmem:[%s12256_s4 + $0x20] sm:$0xff]   ;;  %v12028_v0 = vld [vmem:[%s12256_s4 + $0x18] sm:$0xff]  }
 0x93d   : > { %v8921_v52 = vpop.f32.mrf.mxu1 }
 0x93e   : > { %v8926_v61 = vpack.c.bf16 %v8924_v59, %v8924_v59  ;;  %v9518_v59 = vld [vmem:[%s14161_s7] sm:$0x3] }
 0x940   : > { %9094 = vmatprep.mubr.bf16.mxu0 %v8926_v61  ;;  %v9523_v61 = vrot.slane %v9518_v59, %v14146_v48 }
 0x941   : > { %9095 = vmatmul.mubr.bf16.vlgmr.msra.gmra.mxu0 %v8925_v40 }
 0x942   : > { %9338 = vmatpush1.bf16.msra.mxu0 %v11960_v5  ;;  %9369 = vmatprep.mubr.bf16.mxu0 %v14154_v36  ;;  %v11975_v36 = vld [vmem:[%s14155_s15 + $0x20] ss:$8 sps:$4 sm:$0xff]  }
 0x943   : > { %9339 = vmatprep.subr.bf16.mxu0 %v11965_v58 }
 0x946   : > { %9340 = vmatpush1.bf16.msra.mxu0 %v11963_v17  ;;  %v9527_v17 = vrot.slane %v9518_v59, %v14145_v4  ;;  %v12030_v4 = vld [vmem:[%s12256_s4 + $0x8] sm:$0xff]  }
 0x947   : > { %9341 = vmatprep.subr.bf16.mxu0 %v11968_v9 }
 0x94a   : > { %9342 = vmatpush1.bf16.msra.mxu0 %v11966_v18 }
 0x94b   : > { %9343 = vmatprep.subr.bf16.mxu0 %v11971_v16 }
 0x94e   : > { %9344 = vmatpush1.bf16.msra.mxu0 %v11969_v24 }
 0x94f   : > { %9345 = vmatprep.subr.bf16.mxu0 %v11974_v13 }
 0x952   : > { %9346 = vmatpush1.bf16.msra.mxu0 %v11972_v23 }
 0x953   : > { %9347 = vmatprep.subr.bf16.mxu0 %v11977_v46 }
 0x956   : > { %9348 = vmatpush1.bf16.msra.mxu0 %v11975_v36 }
 0x957   : > { %v14015_v41 = vpop.f32.mrf.mxu1  ;;  %9349 = vmatprep.subr.bf16.mxu0 %v11980_v3 }
 0x959   : > { %v14018_v56 = vpop.f32.mrf.mxu1 }
 0x95a   : > { %9350 = vmatpush1.bf16.msra.mxu0 %v11978_v8  ;;  %v12029_v8 = vld [vmem:[%s12256_s4 + $0x10] sm:$0xff]  }
 0x95b   : > { %v9254_v39 = vpop.f32.mrf.mxu1  ;;  %9351 = vmatprep.subr.bf16.mxu0 %v11983_v11 }
 0x95d   : > { %v9255_v10 = vpop.f32.mrf.mxu1 }
 0x95e   : > { %9352 = vmatpush1.bf16.msra.mxu0 %v11981_v35 }
 0x95f   : > { %10889 = vmatprep.subr.bf16.mxu0 %v12008_v53 }
 0x961   : > { %9370 = vmatmul.mubr.bf16.vlgmr.msra.gmra.mxu0 %v9102_v44 }
 0x962   : > { %10890 = vmatpush3.bf16.msra.mxu0 %v12009_v26 }
 0x963   : > { %10891 = vmatprep.subr.bf16.mxu0 %v12010_v54 }
 0x966   : > { %10892 = vmatpush3.bf16.msra.mxu0 %v12011_v7 }
 0x967   : > { %10893 = vmatprep.subr.bf16.mxu0 %v12012_v22 }
 0x96a   : > { %10894 = vmatpush3.bf16.msra.mxu0 %v12013_v43 }
 0x96b   : > { %10895 = vmatprep.subr.bf16.mxu0 %v12014_v55 }
 0x96e   : > { %10896 = vmatpush3.bf16.msra.mxu0 %v12015_v31 }
 0x96f   : > { %10897 = vmatprep.subr.bf16.mxu0 %v12016_v25 }
 0x972   : > { %10898 = vmatpush3.bf16.msra.mxu0 %v12017_v63 }
 0x973   : > { %10899 = vmatprep.subr.bf16.mxu0 %v12018_v34 }
 0x976   : > { %10900 = vmatpush3.bf16.msra.mxu0 %v12019_v50 }
 0x977   : > { %10901 = vmatprep.subr.bf16.mxu0 %v12020_v21 }
 0x97a   : > { %10902 = vmatpush3.bf16.msra.mxu0 %v12021_v57 }
 0x97b   : > { %10903 = vmatprep.subr.bf16.mxu0 %v12022_v45 }
 0x97e   : > { %10904 = vmatpush3.bf16.msra.mxu0 %v12023_v60 }
 0xa01   : > { %v10883_v28 = vpop.f32.mrf.mxu0 }
 0xa03   : > { %v10884_v27 = vpop.f32.mrf.mxu0 }
 0xa04   : > { %v10885_v1 = vadd.f32 %v10884_v27, %v10883_v28 }
 0xa05   : > { %v10886_v15 = vpop.f32.mrf.mxu0 }
 0xa06   : > { %v9097_v20 = vadd.f32 %v10885_v1, %v10545_v47 }
 0xa07   : > { %v10887_v38 = vpop.f32.mrf.mxu0 }
 0xa08   : > { %v9378_v32 = vpack.c.bf16 %v9097_v20, %v9097_v20 }
 0xa0a   : > { %9508 = vmatmul.mubr.bf16.vlgmr.msra.gmra.mxu1 %v9378_v32 }
 0xa0b   : > { %11176 = vmatprep.mubr.msk.bf16.mxu1 %vm12101_vm0, %v14159_v19  ;;  %11161 = vmatpush3.bf16.msra.mxu1 %v12024_v51 }
 0xa0c   : > { %11162 = vmatprep.subr.bf16.mxu1 %v14159_v19 }
 0xa0f   : > { %11163 = vmatpush3.bf16.msra.mxu1 %v12025_v42 }
 0xa10   : > { %11164 = vmatprep.subr.bf16.mxu1 %v14159_v19 }
 0xa13   : > { %11165 = vmatpush3.bf16.msra.mxu1 %v12026_v14 }
 0xa14   : > { %11166 = vmatprep.subr.bf16.mxu1 %v14159_v19 }
 0xa17   : > { %11167 = vmatpush3.bf16.msra.mxu1 %v12027_v37 }
 0xa18   : > { %11168 = vmatprep.subr.bf16.mxu1 %v14159_v19 }
 0xa1b   : > { %11169 = vmatpush3.bf16.msra.mxu1 %v12028_v0 }
 0xa1c   : > { %11170 = vmatprep.subr.bf16.mxu1 %v14159_v19 }
 0xa1f   : > { %11171 = vmatpush3.bf16.msra.mxu1 %v12029_v8 }
 0xa20   : > { %11172 = vmatprep.subr.bf16.mxu1 %v14159_v19 }
 0xa21   : > { %v9371_v30 = vpop.f32.mrf.mxu0 }
 0xa22   : > { %v9372_v52 = vadd.f32 %v9371_v30, %v14015_v41  ;;  %v12031_v41 = vld [vmem:[%s12256_s4] sm:$0xff]  }
 0xa23   : > { %v9373_v6 = vpop.f32.mrf.mxu0  ;;  %11173 = vmatpush3.bf16.msra.mxu1 %v12030_v4 }
 0xa24   : > { %v9374_v40 = vadd.f32 %v9373_v6, %v14018_v56  ;;  %11174 = vmatprep.subr.bf16.mxu1 %v14159_v19  ;;  %v10610_v56 = vld [vmem:[%s12251_s27] ss:$0 sm:$0xff] }
 0xa25   : > { %v9375_v2 = vpop.f32.mrf.mxu0 }
 0xa27   : > { %v9376_v12 = vpop.f32.mrf.mxu0  ;;  %11175 = vmatpush3.bf16.msra.mxu1 %v12031_v41 }
 0xaca   : > { %v9509_v5 = vpop.f32.mrf.mxu1 }
 0xacb   : > { %v9516_v58 = vadd.f32 %v9509_v5, %v9372_v52 }
 0xacc   : > { %v9511_v9 = vpop.f32.mrf.mxu1 }
 0xacd   : > { %v9530_v18 = vadd.f32 %v9523_v61, %v9516_v58  ;;  %v9517_v16 = vadd.f32 %v9511_v9, %v9374_v40 }
 0xace   : > { %v9513_v24 = vpop.f32.mrf.mxu1 }
 0xacf   : > { %v9531_v13 = vadd.f32 %v9527_v17, %v9517_v16  ;;  %v9532_v23 = vmax.f32 %v9530_v18, 0.0 }
 0xad0   : > { %v9514_v46 = vpop.f32.mrf.mxu1 }
 0xad1   : > { %v9533_v36 = vmax.f32 %v9531_v13, 0.0  ;;  %v9534_v48 = vpack.c.bf16 %v9532_v23, %v9532_v23 }
 0xad3   : > { %v9535_v3 = vpack.c.bf16 %v9533_v36, %v9533_v36 }
 0xad5   : > { %9703 = vmatprep.mubr.bf16.mxu0 %v9535_v3 }
 0xad6   : > { %9704 = vmatmul.mubr.bf16.vlgmr.msra.gmra.mxu0 %v9534_v48 }
 0xb96   : > { %v10905_v11 = vpop.f32.mrf.mxu0 }
 0xb98   : > { %v10906_v35 = vpop.f32.mrf.mxu0 }
 0xb99   : > { %v10907_v39 = vadd.f32 %v10906_v35, %v10905_v11 }
 0xb9a   : > { %v10908_v10 = vpop.f32.mrf.mxu0 }
 0xb9b   : > { %v9706_v44 = vadd.f32 %v10907_v39, %v10610_v56 }
 0xb9c   : > { %v10909_v33 = vpop.f32.mrf.mxu0 }
 0xb9d   : > { %v9711_v29 = vmax.f32 %v9706_v44, 0.0 }
 0xb9f   : > { %v9712_v49 = vpack.c.bf16 %v9711_v29, %v9711_v29 }
 0xba1   : > { %11177 = vmatmul.mubr.bf16.vlgmr.msra.gmra.mxu1 %v9712_v49 }
 0xc61   : > { %v9818_v53 = vpop.f32.mrf.mxu1 }
 0xc62   : > { %v9819_v26 = vadd.f32 %v10627_v62, %v9818_v53 }
 0xc63   : > { %v11178_v54 = vpop.f32.mrf.mxu1 }
 0xc64   : > { %9824 = vst [vmem:[%s1106_s2] sm:$0xff] %v9819_v26 }
 0xc65   : > { %v9821_v7 = vpop.f32.mrf.mxu1 }
 0xc67   : > { %v11179_v19 = vpop.f32.mrf.mxu1 }
 0xc68 PF: > { %s73_s22 = sadd.s32 1, %s12067_s22  }
 0xc69   : > { %p70_p5 = scmp.ge.s32.totalorder %s73_s22, 4  }
 0xc6b   :  { %72 = sbr.rel (!%p70_p5) target bundleno = 55 (0x37), region = 223 }

</bundles_post_ra>
